<compile_context>
chip_gen: v6e
topology: v6e:2x2x1
jax: 0.10.0
libtpu: 0.0.40
codegen_flags: <defaults>
</compile_context>

<pallas_src>
import jax
import jax.numpy as jnp
from jax import lax
from jax.experimental import pallas as pl
from jax.experimental.pallas import tpu as pltpu


# ----------------------------------------------------------------------------
# helpers: static tile sizes satisfying TPU tiling rules
# ----------------------------------------------------------------------------
def _pick_time_chunk(T, cap=32):
    """Timesteps per K2 grid step (review: raised above 16; sweep 32-128)."""
    for c in range(min(T, cap), 0, -1):
        if T % c == 0:
            return c
    return 1


def _pick_row_tile(M, cap=512):
    """Row tile for K1; multiple of 8 unless it is all of M."""
    if M <= cap:
        return M
    for c in range(cap, 7, -8):
        if M % c == 0:
            return c
    # TODO(synk): pad M to a multiple of 8 at production scale instead of
    #             falling back to the full M (VMEM risk); K1 has an explicit
    #             vmem_limit_bytes as a backstop.
    return M


def _pick_bn_chunk(T, cap=512):
    """Time tile for K3/K4 (decoupled from the recurrence chunk).  K4 writes
    (H, bn_chunk) output blocks, so bn_chunk must be a multiple of 128 or the
    full T to stay lane-dense."""
    if T <= cap:
        return T
    for c in range(cap, 127, -128):
        if T % c == 0:
            return c
    return T


def _const_spec(block_shape, index_map):
    """BlockSpec for a grid-invariant operand: single-buffered where the JAX
    version supports pipeline_mode (second pipeline buffer is pure VMEM waste
    for constant-index operands)."""
    try:
        return pl.BlockSpec(block_shape, index_map, pipeline_mode=pl.Buffered(1))
    except (TypeError, AttributeError):
        return pl.BlockSpec(block_shape, index_map)


# ----------------------------------------------------------------------------
# Kernel 1: fused input projection, both directions in one (C, 6H) matmul.
# ----------------------------------------------------------------------------
def _input_proj_kernel(x_ref, wih_ref, bi_ref, gi_ref):
    g = jnp.dot(x_ref[...], wih_ref[...],
                preferred_element_type=jnp.float32) + bi_ref[...]
    G = gi_ref.shape[-1]                        # 3H
    gi_ref[0] = g[:, :G].astype(gi_ref.dtype)   # forward gates  [r|z|n]
    gi_ref[1] = g[:, G:].astype(gi_ref.dtype)   # backward gates [r|z|n]


# ----------------------------------------------------------------------------
# Kernel 2: fused bidirectional GRU recurrence.  Forward processes chunk t,
# backward processes the mirrored chunk nct-1-t (reversed in-chunk), so both
# hidden states simply persist in scratch across the sequential grid.
# ----------------------------------------------------------------------------
def _gru_kernel(gi_f_ref, gi_b_ref, whh_ref, bhn_ref, hf_ref, hb_ref,
                hf_scr, hb_scr):
    @pl.when(pl.program_id(0) == 0)
    def _():
        hf_scr[...] = jnp.zeros_like(hf_scr)
        hb_scr[...] = jnp.zeros_like(hb_scr)

    chunk = gi_f_ref.shape[0]
    H = hf_scr.shape[-1]
    whh_f = whh_ref[0]          # (H, 3H) bf16, loop-invariant / VMEM resident
    whh_b = whh_ref[1]
    bhn_f = bhn_ref[0]          # (1, H) f32, n-gate hidden bias only
    bhn_b = bhn_ref[1]

    def gru_step(gi, h, whh, bhn):
        # gi (B, 3H) bf16, h (B, H) f32; one fused (H, 3H) MXU matmul per step.
        gh = jnp.dot(h.astype(jnp.bfloat16), whh,
                     preferred_element_type=jnp.float32)
        g = gi.astype(jnp.float32)
        r = jax.nn.sigmoid(g[:, :H] + gh[:, :H])
        z = jax.nn.sigmoid(g[:, H:2 * H] + gh[:, H:2 * H])
        n = jnp.tanh(g[:, 2 * H:] + r * (gh[:, 2 * H:] + bhn))
        return (1.0 - z) * n + z * h

    h_f = hf_scr[...]
    h_b = hb_scr[...]
    # Static Python loop -> static row indices (no per-step dynamic address
    # math); interleaving fwd/bwd overlaps MXU and VPU/EUP work on 1-TC chips.
    # TODO(synk): at production B/H, sweep partial unroll (lax.fori_loop with
    #             unroll=2/4/8) against vreg spill in the bundle dump.
    for i in range(chunk):
        h_f = gru_step(gi_f_ref[i], h_f, whh_f, bhn_f)
        hf_ref[:, i, :] = h_f
        j = chunk - 1 - i                       # backward walks chunk reversed
        h_b = gru_step(gi_b_ref[j], h_b, whh_b, bhn_b)
        hb_ref[:, j, :] = h_b

    hf_scr[...] = h_f
    hb_scr[...] = h_b


# ----------------------------------------------------------------------------
# Kernel 3: BN statistics (sum + sum-of-squares of hf + hb).
# NOTE: the '+=' accumulation is only correct because the grid axis is
# "arbitrary" (sequential); never mark it parallel / core_parallel.
# ----------------------------------------------------------------------------
def _sum_stats_kernel(hf_ref, hb_ref, sum_ref, sq_ref):
    @pl.when(pl.program_id(0) == 0)
    def _():
        sum_ref[...] = jnp.zeros_like(sum_ref)
        sq_ref[...] = jnp.zeros_like(sq_ref)

    s = hf_ref[...] + hb_ref[...]                       # (B, chunk, H) f32
    sum_ref[...] += jnp.sum(s, axis=(0, 1), keepdims=True)
    # TODO(synk): E[x^2]-mean^2 is cancellation-prone at very large T*B; switch
    #             to a centered two-pass if tolerance requires.
    sq_ref[...] += jnp.sum(s * s, axis=(0, 1), keepdims=True)


# ----------------------------------------------------------------------------
# Kernel 4: BN apply + layout fold.  Writes (H, bn_chunk) blocks of the final
# (B, H, T) output; the transpose goes through the MXU (eye @ y^T), which is
# free in this bandwidth-bound pass and avoids an extra XLA transpose over HBM.
# ----------------------------------------------------------------------------
def _bn_apply_kernel(hf_ref, hb_ref, scale_ref, shift_ref, eye_ref, o_ref):
    y = (hf_ref[...] + hb_ref[...]) * scale_ref[...] + shift_ref[...]  # (chunk, H)
    o_ref[...] = lax.dot_general(
        eye_ref[...], y, (((1,), (1,)), ((), ())),
        preferred_element_type=jnp.float32)                            # (H, chunk)


# ----------------------------------------------------------------------------
# Wrapper
# ----------------------------------------------------------------------------
def batch_rnn_forward(x_bct, params):
    # x_bct: (B, input_size, T) float32 (PyTorch BatchRNN input convention)
    B, C, T = x_bct.shape
    H = params["whh"].shape[1]
    G = 3 * H

    # time-major flattening so K2 reads (B, 3H) gate rows off the leading axis
    x_flat = jnp.transpose(x_bct, (2, 0, 1)).reshape(T * B, C).astype(jnp.bfloat16)
    M = T * B

    # --- K1: fused input projection (both directions, one matmul, x read once) ---
    tile_m = _pick_row_tile(M)
    gi_flat = pl.pallas_call(
        _input_proj_kernel,
        grid=(M // tile_m,),
        in_specs=[
            pl.BlockSpec((tile_m, C), lambda i: (i, 0)),
            _const_spec((C, 2 * G), lambda i: (0, 0)),
            _const_spec((1, 2 * G), lambda i: (0, 0)),
        ],
        out_specs=pl.BlockSpec((2, tile_m, G), lambda i: (0, i, 0)),
        out_shape=jax.ShapeDtypeStruct((2, M, G), jnp.bfloat16),
        compiler_params=pltpu.CompilerParams(
            dimension_semantics=("parallel",),
            vmem_limit_bytes=32 * 1024 * 1024),
    )(x_flat, params["wih"], params["bi"])
    gi = gi_flat.reshape(2, T, B, G)                # (2, T, B, 3H) bf16

    # --- K2: fused bidirectional recurrence over time chunks ---
    chunk = _pick_time_chunk(T)
    nct = T // chunk
    hf, hb = pl.pallas_call(
        _gru_kernel,
        grid=(nct,),
        in_specs=[
            pl.BlockSpec((None, chunk, B, G), lambda t: (0, t, 0, 0)),
            pl.BlockSpec((None, chunk, B, G), lambda t: (1, nct - 1 - t, 0, 0)),
            _const_spec((2, H, G), lambda t: (0, 0, 0)),
            _const_spec((2, 1, H), lambda t: (0, 0, 0)),
        ],
        out_specs=[
            pl.BlockSpec((B, chunk, H), lambda t: (0, t, 0)),
            pl.BlockSpec((B, chunk, H), lambda t: (0, nct - 1 - t, 0)),
        ],
        out_shape=[jax.ShapeDtypeStruct((B, T, H), jnp.float32)] * 2,
        scratch_shapes=[pltpu.VMEM((B, H), jnp.float32),
                        pltpu.VMEM((B, H), jnp.float32)],
        compiler_params=pltpu.CompilerParams(
            dimension_semantics=("arbitrary",),
            # fits v7x's 64 MiB physical VMEM with headroom; re-derive for
            # production H (bf16 whh + gi/out chunk buffers).
            vmem_limit_bytes=40 * 1024 * 1024),
    )(gi, gi, params["whh"], params["bhn"])          # hf, hb: (B, T, H) f32

    # --- K3: BN batch statistics (sequential accumulation, large streaming tiles) ---
    bn_chunk = _pick_bn_chunk(T)
    n_bn = T // bn_chunk
    ssum, ssq = pl.pallas_call(
        _sum_stats_kernel,
        grid=(n_bn,),
        in_specs=[pl.BlockSpec((B, bn_chunk, H), lambda t: (0, t, 0)),
                  pl.BlockSpec((B, bn_chunk, H), lambda t: (0, t, 0))],
        out_specs=[pl.BlockSpec((1, 1, H), lambda t: (0, 0, 0)),
                   pl.BlockSpec((1, 1, H), lambda t: (0, 0, 0))],
        out_shape=[jax.ShapeDtypeStruct((1, 1, H), jnp.float32)] * 2,
        compiler_params=pltpu.CompilerParams(
            dimension_semantics=("arbitrary",)),      # required for += accum
    )(hf, hb)

    n_elems = float(T * B)
    mean = ssum.reshape(1, H) / n_elems
    var = ssq.reshape(1, H) / n_elems - mean * mean   # biased variance (training BN)
    inv = lax.rsqrt(var + 1e-5)
    scale = params["gamma"].reshape(1, H) * inv
    shift = params["beta"].reshape(1, H) - mean * scale
    eye = jnp.eye(H, dtype=jnp.float32)

    # --- K4: BN apply, output written directly in (B, H, T) module layout ---
    y_bht = pl.pallas_call(
        _bn_apply_kernel,
        grid=(B, n_bn),
        in_specs=[pl.BlockSpec((None, bn_chunk, H), lambda b, t: (b, t, 0)),
                  pl.BlockSpec((None, bn_chunk, H), lambda b, t: (b, t, 0)),
                  _const_spec((1, H), lambda b, t: (0, 0)),
                  _const_spec((1, H), lambda b, t: (0, 0)),
                  _const_spec((H, H), lambda b, t: (0, 0))],
        out_specs=pl.BlockSpec((None, H, bn_chunk), lambda b, t: (b, 0, t)),
        out_shape=jax.ShapeDtypeStruct((B, H, T), jnp.float32),
        compiler_params=pltpu.CompilerParams(
            dimension_semantics=("parallel", "parallel")),
    )(hf, hb, scale, shift, eye)

    return y_bht                                       # (B, H, T)


# ----------------------------------------------------------------------------
# Deterministic parameter init (shapes from BatchRNN.__init__, GRU + BN).
# PyTorch GRU weights are (3H, in), gate order r,z,n.  Input-side weights are
# fused across directions along the gate axis to (C, 6H); r/z biases are
# pre-folded (bih+bhh); the n-gate hidden bias stays separate because it sits
# inside r * (h @ Whh_n + bhh_n).  Matmul operands are stored in bf16.
# ----------------------------------------------------------------------------
def init_params(key, input_size, hidden):
    bound = 1.0 / (hidden ** 0.5)
    keys = jax.random.split(key, 8)

    def u(kk, shape):
        return jax.random.uniform(kk, shape, jnp.float32, -bound, bound)

    def pack_dir(k_wih, k_whh, k_bih, k_bhh):
        w_ih = u(k_wih, (3 * hidden, input_size))
        w_hh = u(k_whh, (3 * hidden, hidden))
        b_ih = u(k_bih, (3 * hidden,))
        b_hh = u(k_bhh, (3 * hidden,))
        wih = w_ih.T                                  # (C, 3H)  [r|z|n]
        whh = w_hh.T                                  # (H, 3H)
        bi = jnp.concatenate([
            b_ih[:hidden] + b_hh[:hidden],                        # r: fold both
            b_ih[hidden:2 * hidden] + b_hh[hidden:2 * hidden],    # z: fold both
            b_ih[2 * hidden:],                                    # n: input bias
        ])
        bhn = b_hh[2 * hidden:]                       # n: hidden bias
        return wih, whh, bi, bhn

    wih_f, whh_f, bi_f, bhn_f = pack_dir(*keys[0:4])
    wih_b, whh_b, bi_b, bhn_b = pack_dir(*keys[4:8])
    return dict(
        wih=jnp.concatenate([wih_f, wih_b], axis=1).astype(jnp.bfloat16),  # (C, 6H)
        bi=jnp.concatenate([bi_f, bi_b]).reshape(1, 6 * hidden),           # (1, 6H)
        whh=jnp.stack([whh_f, whh_b]).astype(jnp.bfloat16),                # (2, H, 3H)
        bhn=jnp.stack([bhn_f, bhn_b]).reshape(2, 1, hidden),               # (2, 1, H)
        gamma=jnp.ones((hidden,), jnp.float32),        # nn.BatchNorm1d defaults
        beta=jnp.zeros((hidden,), jnp.float32),
    )


# ----------------------------------------------------------------------------
# Pure-JAX reference (lax.scan GRU + batch-stat BN) with the same bf16-operand
# / f32-accumulate numerics as the kernels, for a tight correctness check.
# ----------------------------------------------------------------------------
def reference_forward(x_bct, p):
    B, C, T = x_bct.shape
    H = p["whh"].shape[1]
    x_tbc = jnp.transpose(x_bct, (2, 0, 1))                        # (T, B, C)
    gi6 = (jnp.dot(x_tbc.reshape(T * B, C).astype(jnp.bfloat16), p["wih"],
                   preferred_element_type=jnp.float32) + p["bi"])  # (T*B, 6H)
    gi = jnp.stack([gi6[:, :3 * H], gi6[:, 3 * H:]]).astype(jnp.bfloat16)
    gi = gi.reshape(2, T, B, 3 * H)

    def run_dir(gi_d, whh_d, bhn_d, reverse):
        def step(h, gi_t):
            gh = jnp.dot(h.astype(jnp.bfloat16), whh_d,
                         preferred_element_type=jnp.float32)
            g = gi_t.astype(jnp.float32)
            r = jax.nn.sigmoid(g[:, :H] + gh[:, :H])
            z = jax.nn.sigmoid(g[:, H:2 * H] + gh[:, H:2 * H])
            n = jnp.tanh(g[:, 2 * H:] + r * (gh[:, 2 * H:] + bhn_d))
            h_new = (1.0 - z) * n + z * h
            return h_new, h_new

        seq = gi_d[::-1] if reverse else gi_d
        _, hs = lax.scan(step, jnp.zeros((B, H), jnp.float32), seq)
        return hs[::-1] if reverse else hs                         # (T, B, H)

    hf = run_dir(gi[0], p["whh"][0], p["bhn"][0], False)
    hb = run_dir(gi[1], p["whh"][1], p["bhn"][1], True)
    s = hf + hb
    mean = jnp.mean(s, axis=(0, 1), keepdims=True)
    var = jnp.mean((s - mean) ** 2, axis=(0, 1), keepdims=True)
    y = (s - mean) * lax.rsqrt(var + 1e-5) * p["gamma"].reshape(1, 1, H) \
        + p["beta"].reshape(1, 1, H)
    return jnp.transpose(y, (1, 2, 0))                             # (B, H, T)


if __name__ == "__main__":
    B, C, T, H = 2, 16, 8, 32          # batch, input_size, seq len, hidden
    key = jax.random.PRNGKey(0)
    k_x, k_p = jax.random.split(key)
    x = jax.random.normal(k_x, (B, C, T), jnp.float32)
    params = init_params(k_p, C, H)

    fwd = jax.jit(batch_rnn_forward)
    y = jax.block_until_ready(fwd(x, params))
    assert y.shape == (B, H, T), y.shape

    y_ref = reference_forward(x, params)
    err = float(jnp.max(jnp.abs(y - y_ref)))
    if err > 1e-2:
        raise SystemExit(f"mismatch vs reference: max abs err {err}")

    print("KERNEL_OK")
</pallas_src>

<mosaic_0001>
module attributes {stable_mosaic.version = 11 : i64} {
  func.func @_input_proj_kernel(%arg0: i32, %arg1: memref<16x16xbf16, #tpu.memory_space<vmem>>, %arg2: memref<16x192xbf16, #tpu.memory_space<vmem>>, %arg3: memref<1x192xf32, #tpu.memory_space<vmem>>, %arg4: memref<2x16x96xbf16, #tpu.memory_space<vmem>>) attributes {dimension_semantics = [#tpu.dimension_semantics<parallel>], iteration_bounds = array<i64: 1>, scalar_prefetch = 0 : i64, scratch_operands = 0 : i64, tpu.core_type = #tpu.core_type<tc>, window_params = [{transform_indices = @transform_0, window_bounds = array<i64: 16, 16>}, {pipeline_mode = #tpu.pipeline_mode<synchronous>, transform_indices = @transform_1, window_bounds = array<i64: 16, 192>}, {pipeline_mode = #tpu.pipeline_mode<synchronous>, transform_indices = @transform_2, window_bounds = array<i64: 1, 192>}, {transform_indices = @transform_3, window_bounds = array<i64: 2, 16, 96>}]} {
    %c0 = arith.constant 0 : index
    %c0_0 = arith.constant 0 : index
    %0 = vector.load %arg1[%c0, %c0_0] : memref<16x16xbf16, #tpu.memory_space<vmem>>, vector<16x16xbf16>
    %c0_1 = arith.constant 0 : index
    %c0_2 = arith.constant 0 : index
    %1 = vector.load %arg2[%c0_1, %c0_2] : memref<16x192xbf16, #tpu.memory_space<vmem>>, vector<16x192xbf16>
    %cst = arith.constant dense<0.000000e+00> : vector<16x192xf32>
    %2 = tpu.matmul %0, %1, %cst {dimension_numbers = #tpu.dot_dimension_numbers<[1], [0], [0], [1], [0, 0, 1, 1], [], []>} : vector<16x16xbf16>, vector<16x192xbf16>, vector<16x192xf32> -> vector<16x192xf32>
    %c0_3 = arith.constant 0 : index
    %c0_4 = arith.constant 0 : index
    %3 = vector.load %arg3[%c0_3, %c0_4] : memref<1x192xf32, #tpu.memory_space<vmem>>, vector<1x192xf32>
    %4 = vector.broadcast %3 : vector<1x192xf32> to vector<16x192xf32>
    %5 = arith.addf %2, %4 : vector<16x192xf32>
    %6 = vector.extract_strided_slice %5 {offsets = [0, 0], sizes = [16, 96], strides = [1, 1]} : vector<16x192xf32> to vector<16x96xf32>
    %7 = arith.truncf %6 : vector<16x96xf32> to vector<16x96xbf16>
    %c0_5 = arith.constant 0 : index
    %c0_6 = arith.constant 0 : index
    %c0_7 = arith.constant 0 : index
    %8 = vector.load %arg4[%c0_5, %c0_6, %c0_7] : memref<2x16x96xbf16, #tpu.memory_space<vmem>>, vector<1x16x96xbf16>
    %9 = vector.shape_cast %8 : vector<1x16x96xbf16> to vector<16x96xbf16>
    %10 = vector.shape_cast %7 : vector<16x96xbf16> to vector<1x16x96xbf16>
    tpu.vector_store %arg4[%c0_5, %c0_6, %c0_7], %10 {strides = array<i32>} : memref<2x16x96xbf16, #tpu.memory_space<vmem>>, vector<1x16x96xbf16>,
    %11 = vector.extract_strided_slice %5 {offsets = [0, 96], sizes = [16, 96], strides = [1, 1]} : vector<16x192xf32> to vector<16x96xf32>
    %12 = arith.truncf %11 : vector<16x96xf32> to vector<16x96xbf16>
    %c1 = arith.constant 1 : index
    %c0_8 = arith.constant 0 : index
    %c0_9 = arith.constant 0 : index
    %13 = vector.load %arg4[%c1, %c0_8, %c0_9] : memref<2x16x96xbf16, #tpu.memory_space<vmem>>, vector<1x16x96xbf16>
    %14 = vector.shape_cast %13 : vector<1x16x96xbf16> to vector<16x96xbf16>
    %15 = vector.shape_cast %12 : vector<16x96xbf16> to vector<1x16x96xbf16>
    tpu.vector_store %arg4[%c1, %c0_8, %c0_9], %15 {strides = array<i32>} : memref<2x16x96xbf16, #tpu.memory_space<vmem>>, vector<1x16x96xbf16>,
    return
  }
  func.func @transform_0(%arg0: i32) -> (i32, i32) {
    %c0_i32 = arith.constant 0 : i32
    %c0_i32_0 = arith.constant 0 : i32
    return %arg0, %c0_i32 : i32, i32
  }
  func.func @transform_1(%arg0: i32) -> (i32, i32) {
    %c0_i32 = arith.constant 0 : i32
    %c0_i32_0 = arith.constant 0 : i32
    %c0_i32_1 = arith.constant 0 : i32
    return %c0_i32, %c0_i32_0 : i32, i32
  }
  func.func @transform_2(%arg0: i32) -> (i32, i32) {
    %c0_i32 = arith.constant 0 : i32
    %c0_i32_0 = arith.constant 0 : i32
    %c0_i32_1 = arith.constant 0 : i32
    return %c0_i32, %c0_i32_0 : i32, i32
  }
  func.func @transform_3(%arg0: i32) -> (i32, i32, i32) {
    %c0_i32 = arith.constant 0 : i32
    %c0_i32_0 = arith.constant 0 : i32
    %c0_i32_1 = arith.constant 0 : i32
    return %c0_i32, %arg0, %c0_i32_0 : i32, i32, i32
  }
}

module attributes {stable_mosaic.version = 11 : i64} {
  func.func @_gru_kernel(%arg0: i32, %arg1: memref<1x8x2x96xbf16, #tpu.memory_space<vmem>>, %arg2: memref<1x8x2x96xbf16, #tpu.memory_space<vmem>>, %arg3: memref<2x32x96xbf16, #tpu.memory_space<vmem>>, %arg4: memref<2x1x32xf32, #tpu.memory_space<vmem>>, %arg5: memref<2x8x32xf32, #tpu.memory_space<vmem>>, %arg6: memref<2x8x32xf32, #tpu.memory_space<vmem>>, %arg7: memref<2x32xf32, #tpu.memory_space<vmem>>, %arg8: memref<2x32xf32, #tpu.memory_space<vmem>>) attributes {dimension_semantics = [#tpu.dimension_semantics<arbitrary>], iteration_bounds = array<i64: 1>, scalar_prefetch = 0 : i64, scratch_operands = 2 : i64, tpu.core_type = #tpu.core_type<tc>, window_params = [{transform_indices = @transform_0, window_bounds = array<i64: 1, 8, 2, 96>}, {transform_indices = @transform_1, window_bounds = array<i64: 1, 8, 2, 96>}, {pipeline_mode = #tpu.pipeline_mode<synchronous>, transform_indices = @transform_2, window_bounds = array<i64: 2, 32, 96>}, {pipeline_mode = #tpu.pipeline_mode<synchronous>, transform_indices = @transform_3, window_bounds = array<i64: 2, 1, 32>}, {transform_indices = @transform_4, window_bounds = array<i64: 2, 8, 32>}, {transform_indices = @transform_5, window_bounds = array<i64: 2, 8, 32>}]} {
    %c0_i32 = arith.constant 0 : i32
    %0 = arith.cmpi eq, %arg0, %c0_i32 : i32
    %1 = arith.extui %0 : i1 to i32
    %c0_i32_0 = arith.constant 0 : i32
    %2 = arith.cmpi ne, %1, %c0_i32_0 : i32
    scf.if %2 {
      %cst_188 = arith.constant 0.000000e+00 : f32
      %591 = vector.broadcast %cst_188 : f32 to vector<2x32xf32>
      %c0_189 = arith.constant 0 : index
      %c0_190 = arith.constant 0 : index
      %592 = vector.load %arg7[%c0_189, %c0_190] : memref<2x32xf32, #tpu.memory_space<vmem>>, vector<2x32xf32>
      tpu.vector_store %arg7[%c0_189, %c0_190], %591 {strides = array<i32>} : memref<2x32xf32, #tpu.memory_space<vmem>>, vector<2x32xf32>,
      %cst_191 = arith.constant 0.000000e+00 : f32
      %593 = vector.broadcast %cst_191 : f32 to vector<2x32xf32>
      %c0_192 = arith.constant 0 : index
      %c0_193 = arith.constant 0 : index
      %594 = vector.load %arg8[%c0_192, %c0_193] : memref<2x32xf32, #tpu.memory_space<vmem>>, vector<2x32xf32>
      tpu.vector_store %arg8[%c0_192, %c0_193], %593 {strides = array<i32>} : memref<2x32xf32, #tpu.memory_space<vmem>>, vector<2x32xf32>,
    } else {
    }
    %c0 = arith.constant 0 : index
    %c0_1 = arith.constant 0 : index
    %c0_2 = arith.constant 0 : index
    %3 = vector.load %arg3[%c0, %c0_1, %c0_2] : memref<2x32x96xbf16, #tpu.memory_space<vmem>>, vector<1x32x96xbf16>
    %4 = vector.shape_cast %3 : vector<1x32x96xbf16> to vector<32x96xbf16>
    %c1 = arith.constant 1 : index
    %c0_3 = arith.constant 0 : index
    %c0_4 = arith.constant 0 : index
    %5 = vector.load %arg3[%c1, %c0_3, %c0_4] : memref<2x32x96xbf16, #tpu.memory_space<vmem>>, vector<1x32x96xbf16>
    %6 = vector.shape_cast %5 : vector<1x32x96xbf16> to vector<32x96xbf16>
    %c0_5 = arith.constant 0 : index
    %c0_6 = arith.constant 0 : index
    %c0_7 = arith.constant 0 : index
    %7 = vector.load %arg4[%c0_5, %c0_6, %c0_7] : memref<2x1x32xf32, #tpu.memory_space<vmem>>, vector<1x1x32xf32>
    %8 = vector.shape_cast %7 : vector<1x1x32xf32> to vector<1x32xf32>
    %c1_8 = arith.constant 1 : index
    %c0_9 = arith.constant 0 : index
    %c0_10 = arith.constant 0 : index
    %9 = vector.load %arg4[%c1_8, %c0_9, %c0_10] : memref<2x1x32xf32, #tpu.memory_space<vmem>>, vector<1x1x32xf32>
    %10 = vector.shape_cast %9 : vector<1x1x32xf32> to vector<1x32xf32>
    %c0_11 = arith.constant 0 : index
    %c0_12 = arith.constant 0 : index
    %11 = vector.load %arg7[%c0_11, %c0_12] : memref<2x32xf32, #tpu.memory_space<vmem>>, vector<2x32xf32>
    %c0_13 = arith.constant 0 : index
    %c0_14 = arith.constant 0 : index
    %12 = vector.load %arg8[%c0_13, %c0_14] : memref<2x32xf32, #tpu.memory_space<vmem>>, vector<2x32xf32>
    %c0_15 = arith.constant 0 : index
    %c0_16 = arith.constant 0 : index
    %c0_17 = arith.constant 0 : index
    %c0_18 = arith.constant 0 : index
    %13 = vector.load %arg1[%c0_15, %c0_16, %c0_17, %c0_18] : memref<1x8x2x96xbf16, #tpu.memory_space<vmem>>, vector<1x1x2x96xbf16>
    %14 = vector.shape_cast %13 : vector<1x1x2x96xbf16> to vector<2x96xbf16>
    %15 = arith.truncf %11 : vector<2x32xf32> to vector<2x32xbf16>
    %cst = arith.constant dense<0.000000e+00> : vector<2x96xf32>
    %16 = tpu.matmul %15, %4, %cst {dimension_numbers = #tpu.dot_dimension_numbers<[1], [0], [0], [1], [0, 0, 1, 1], [], []>} : vector<2x32xbf16>, vector<32x96xbf16>, vector<2x96xf32> -> vector<2x96xf32>
    %17 = arith.extf %14 : vector<2x96xbf16> to vector<2x96xf32>
    %18 = vector.extract_strided_slice %17 {offsets = [0, 0], sizes = [2, 32], strides = [1, 1]} : vector<2x96xf32> to vector<2x32xf32>
    %19 = vector.extract_strided_slice %16 {offsets = [0, 0], sizes = [2, 32], strides = [1, 1]} : vector<2x96xf32> to vector<2x32xf32>
    %20 = arith.addf %18, %19 : vector<2x32xf32>
    %21 = arith.negf %20 : vector<2x32xf32>
    %22 = math.exp %21 : vector<2x32xf32>
    %cst_19 = arith.constant 1.000000e+00 : f32
    %23 = vector.broadcast %cst_19 : f32 to vector<2x32xf32>
    %24 = arith.addf %23, %22 : vector<2x32xf32>
    %25 = arith.divf %23, %24 : vector<2x32xf32>
    %26 = vector.extract_strided_slice %17 {offsets = [0, 32], sizes = [2, 32], strides = [1, 1]} : vector<2x96xf32> to vector<2x32xf32>
    %27 = vector.extract_strided_slice %16 {offsets = [0, 32], sizes = [2, 32], strides = [1, 1]} : vector<2x96xf32> to vector<2x32xf32>
    %28 = arith.addf %26, %27 : vector<2x32xf32>
    %29 = arith.negf %28 : vector<2x32xf32>
    %30 = math.exp %29 : vector<2x32xf32>
    %cst_20 = arith.constant 1.000000e+00 : f32
    %31 = vector.broadcast %cst_20 : f32 to vector<2x32xf32>
    %32 = arith.addf %31, %30 : vector<2x32xf32>
    %33 = arith.divf %31, %32 : vector<2x32xf32>
    %34 = vector.extract_strided_slice %17 {offsets = [0, 64], sizes = [2, 32], strides = [1, 1]} : vector<2x96xf32> to vector<2x32xf32>
    %35 = vector.extract_strided_slice %16 {offsets = [0, 64], sizes = [2, 32], strides = [1, 1]} : vector<2x96xf32> to vector<2x32xf32>
    %36 = vector.broadcast %8 : vector<1x32xf32> to vector<2x32xf32>
    %37 = arith.addf %35, %36 : vector<2x32xf32>
    %38 = arith.mulf %25, %37 : vector<2x32xf32>
    %39 = arith.addf %34, %38 : vector<2x32xf32>
    %40 = math.tanh %39 : vector<2x32xf32>
    %cst_21 = arith.constant 1.000000e+00 : f32
    %41 = vector.broadcast %cst_21 : f32 to vector<2x32xf32>
    %42 = arith.subf %41, %33 : vector<2x32xf32>
    %43 = arith.mulf %42, %40 : vector<2x32xf32>
    %44 = arith.mulf %33, %11 : vector<2x32xf32>
    %45 = arith.addf %43, %44 : vector<2x32xf32>
    %c0_22 = arith.constant 0 : index
    %c0_23 = arith.constant 0 : index
    %c0_24 = arith.constant 0 : index
    %46 = vector.load %arg5[%c0_22, %c0_23, %c0_24] : memref<2x8x32xf32, #tpu.memory_space<vmem>>, vector<2x1x32xf32>
    %47 = vector.shape_cast %46 : vector<2x1x32xf32> to vector<2x32xf32>
    %48 = vector.shape_cast %45 : vector<2x32xf32> to vector<2x1x32xf32>
    tpu.vector_store %arg5[%c0_22, %c0_23, %c0_24], %48 {strides = array<i32>} : memref<2x8x32xf32, #tpu.memory_space<vmem>>, vector<2x1x32xf32>,
    %c0_25 = arith.constant 0 : index
    %c7 = arith.constant 7 : index
    %c0_26 = arith.constant 0 : index
    %c0_27 = arith.constant 0 : index
    %49 = vector.load %arg2[%c0_25, %c7, %c0_26, %c0_27] : memref<1x8x2x96xbf16, #tpu.memory_space<vmem>>, vector<1x1x2x96xbf16>
    %50 = vector.shape_cast %49 : vector<1x1x2x96xbf16> to vector<2x96xbf16>
    %51 = arith.truncf %12 : vector<2x32xf32> to vector<2x32xbf16>
    %cst_28 = arith.constant dense<0.000000e+00> : vector<2x96xf32>
    %52 = tpu.matmul %51, %6, %cst_28 {dimension_numbers = #tpu.dot_dimension_numbers<[1], [0], [0], [1], [0, 0, 1, 1], [], []>} : vector<2x32xbf16>, vector<32x96xbf16>, vector<2x96xf32> -> vector<2x96xf32>
    %53 = arith.extf %50 : vector<2x96xbf16> to vector<2x96xf32>
    %54 = vector.extract_strided_slice %53 {offsets = [0, 0], sizes = [2, 32], strides = [1, 1]} : vector<2x96xf32> to vector<2x32xf32>
    %55 = vector.extract_strided_slice %52 {offsets = [0, 0], sizes = [2, 32], strides = [1, 1]} : vector<2x96xf32> to vector<2x32xf32>
    %56 = arith.addf %54, %55 : vector<2x32xf32>
    %57 = arith.negf %56 : vector<2x32xf32>
    %58 = math.exp %57 : vector<2x32xf32>
    %cst_29 = arith.constant 1.000000e+00 : f32
    %59 = vector.broadcast %cst_29 : f32 to vector<2x32xf32>
    %60 = arith.addf %59, %58 : vector<2x32xf32>
    %61 = arith.divf %59, %60 : vector<2x32xf32>
    %62 = vector.extract_strided_slice %53 {offsets = [0, 32], sizes = [2, 32], strides = [1, 1]} : vector<2x96xf32> to vector<2x32xf32>
    %63 = vector.extract_strided_slice %52 {offsets = [0, 32], sizes = [2, 32], strides = [1, 1]} : vector<2x96xf32> to vector<2x32xf32>
    %64 = arith.addf %62, %63 : vector<2x32xf32>
    %65 = arith.negf %64 : vector<2x32xf32>
    %66 = math.exp %65 : vector<2x32xf32>
    %cst_30 = arith.constant 1.000000e+00 : f32
    %67 = vector.broadcast %cst_30 : f32 to vector<2x32xf32>
    %68 = arith.addf %67, %66 : vector<2x32xf32>
    %69 = arith.divf %67, %68 : vector<2x32xf32>
    %70 = vector.extract_strided_slice %53 {offsets = [0, 64], sizes = [2, 32], strides = [1, 1]} : vector<2x96xf32> to vector<2x32xf32>
    %71 = vector.extract_strided_slice %52 {offsets = [0, 64], sizes = [2, 32], strides = [1, 1]} : vector<2x96xf32> to vector<2x32xf32>
    %72 = vector.broadcast %10 : vector<1x32xf32> to vector<2x32xf32>
    %73 = arith.addf %71, %72 : vector<2x32xf32>
    %74 = arith.mulf %61, %73 : vector<2x32xf32>
    %75 = arith.addf %70, %74 : vector<2x32xf32>
    %76 = math.tanh %75 : vector<2x32xf32>
    %cst_31 = arith.constant 1.000000e+00 : f32
    %77 = vector.broadcast %cst_31 : f32 to vector<2x32xf32>
    %78 = arith.subf %77, %69 : vector<2x32xf32>
    %79 = arith.mulf %78, %76 : vector<2x32xf32>
    %80 = arith.mulf %69, %12 : vector<2x32xf32>
    %81 = arith.addf %79, %80 : vector<2x32xf32>
    %c0_32 = arith.constant 0 : index
    %c7_33 = arith.constant 7 : index
    %c0_34 = arith.constant 0 : index
    %82 = vector.load %arg6[%c0_32, %c7_33, %c0_34] : memref<2x8x32xf32, #tpu.memory_space<vmem>>, vector<2x1x32xf32>
    %83 = vector.shape_cast %82 : vector<2x1x32xf32> to vector<2x32xf32>
    %84 = vector.shape_cast %81 : vector<2x32xf32> to vector<2x1x32xf32>
    tpu.vector_store %arg6[%c0_32, %c7_33, %c0_34], %84 {strides = array<i32>} : memref<2x8x32xf32, #tpu.memory_space<vmem>>, vector<2x1x32xf32>,
    %c0_35 = arith.constant 0 : index
    %c1_36 = arith.constant 1 : index
    %c0_37 = arith.constant 0 : index
    %c0_38 = arith.constant 0 : index
    %85 = vector.load %arg1[%c0_35, %c1_36, %c0_37, %c0_38] : memref<1x8x2x96xbf16, #tpu.memory_space<vmem>>, vector<1x1x2x96xbf16>
    %86 = vector.shape_cast %85 : vector<1x1x2x96xbf16> to vector<2x96xbf16>
    %87 = arith.truncf %45 : vector<2x32xf32> to vector<2x32xbf16>
    %cst_39 = arith.constant dense<0.000000e+00> : vector<2x96xf32>
    %88 = tpu.matmul %87, %4, %cst_39 {dimension_numbers = #tpu.dot_dimension_numbers<[1], [0], [0], [1], [0, 0, 1, 1], [], []>} : vector<2x32xbf16>, vector<32x96xbf16>, vector<2x96xf32> -> vector<2x96xf32>
    %89 = arith.extf %86 : vector<2x96xbf16> to vector<2x96xf32>
    %90 = vector.extract_strided_slice %89 {offsets = [0, 0], sizes = [2, 32], strides = [1, 1]} : vector<2x96xf32> to vector<2x32xf32>
    %91 = vector.extract_strided_slice %88 {offsets = [0, 0], sizes = [2, 32], strides = [1, 1]} : vector<2x96xf32> to vector<2x32xf32>
    %92 = arith.addf %90, %91 : vector<2x32xf32>
    %93 = arith.negf %92 : vector<2x32xf32>
    %94 = math.exp %93 : vector<2x32xf32>
    %cst_40 = arith.constant 1.000000e+00 : f32
    %95 = vector.broadcast %cst_40 : f32 to vector<2x32xf32>
    %96 = arith.addf %95, %94 : vector<2x32xf32>
    %97 = arith.divf %95, %96 : vector<2x32xf32>
    %98 = vector.extract_strided_slice %89 {offsets = [0, 32], sizes = [2, 32], strides = [1, 1]} : vector<2x96xf32> to vector<2x32xf32>
    %99 = vector.extract_strided_slice %88 {offsets = [0, 32], sizes = [2, 32], strides = [1, 1]} : vector<2x96xf32> to vector<2x32xf32>
    %100 = arith.addf %98, %99 : vector<2x32xf32>
    %101 = arith.negf %100 : vector<2x32xf32>
    %102 = math.exp %101 : vector<2x32xf32>
    %cst_41 = arith.constant 1.000000e+00 : f32
    %103 = vector.broadcast %cst_41 : f32 to vector<2x32xf32>
    %104 = arith.addf %103, %102 : vector<2x32xf32>
    %105 = arith.divf %103, %104 : vector<2x32xf32>
    %106 = vector.extract_strided_slice %89 {offsets = [0, 64], sizes = [2, 32], strides = [1, 1]} : vector<2x96xf32> to vector<2x32xf32>
    %107 = vector.extract_strided_slice %88 {offsets = [0, 64], sizes = [2, 32], strides = [1, 1]} : vector<2x96xf32> to vector<2x32xf32>
    %108 = vector.broadcast %8 : vector<1x32xf32> to vector<2x32xf32>
    %109 = arith.addf %107, %108 : vector<2x32xf32>
    %110 = arith.mulf %97, %109 : vector<2x32xf32>
    %111 = arith.addf %106, %110 : vector<2x32xf32>
    %112 = math.tanh %111 : vector<2x32xf32>
    %cst_42 = arith.constant 1.000000e+00 : f32
    %113 = vector.broadcast %cst_42 : f32 to vector<2x32xf32>
    %114 = arith.subf %113, %105 : vector<2x32xf32>
    %115 = arith.mulf %114, %112 : vector<2x32xf32>
    %116 = arith.mulf %105, %45 : vector<2x32xf32>
    %117 = arith.addf %115, %116 : vector<2x32xf32>
    %c0_43 = arith.constant 0 : index
    %c1_44 = arith.constant 1 : index
    %c0_45 = arith.constant 0 : index
    %118 = vector.load %arg5[%c0_43, %c1_44, %c0_45] : memref<2x8x32xf32, #tpu.memory_space<vmem>>, vector<2x1x32xf32>
    %119 = vector.shape_cast %118 : vector<2x1x32xf32> to vector<2x32xf32>
    %120 = vector.shape_cast %117 : vector<2x32xf32> to vector<2x1x32xf32>
    tpu.vector_store %arg5[%c0_43, %c1_44, %c0_45], %120 {strides = array<i32>} : memref<2x8x32xf32, #tpu.memory_space<vmem>>, vector<2x1x32xf32>,
    %c0_46 = arith.constant 0 : index
    %c6 = arith.constant 6 : index
    %c0_47 = arith.constant 0 : index
    %c0_48 = arith.constant 0 : index
    %121 = vector.load %arg2[%c0_46, %c6, %c0_47, %c0_48] : memref<1x8x2x96xbf16, #tpu.memory_space<vmem>>, vector<1x1x2x96xbf16>
    %122 = vector.shape_cast %121 : vector<1x1x2x96xbf16> to vector<2x96xbf16>
    %123 = arith.truncf %81 : vector<2x32xf32> to vector<2x32xbf16>
    %cst_49 = arith.constant dense<0.000000e+00> : vector<2x96xf32>
    %124 = tpu.matmul %123, %6, %cst_49 {dimension_numbers = #tpu.dot_dimension_numbers<[1], [0], [0], [1], [0, 0, 1, 1], [], []>} : vector<2x32xbf16>, vector<32x96xbf16>, vector<2x96xf32> -> vector<2x96xf32>
    %125 = arith.extf %122 : vector<2x96xbf16> to vector<2x96xf32>
    %126 = vector.extract_strided_slice %125 {offsets = [0, 0], sizes = [2, 32], strides = [1, 1]} : vector<2x96xf32> to vector<2x32xf32>
    %127 = vector.extract_strided_slice %124 {offsets = [0, 0], sizes = [2, 32], strides = [1, 1]} : vector<2x96xf32> to vector<2x32xf32>
    %128 = arith.addf %126, %127 : vector<2x32xf32>
    %129 = arith.negf %128 : vector<2x32xf32>
    %130 = math.exp %129 : vector<2x32xf32>
    %cst_50 = arith.constant 1.000000e+00 : f32
    %131 = vector.broadcast %cst_50 : f32 to vector<2x32xf32>
    %132 = arith.addf %131, %130 : vector<2x32xf32>
    %133 = arith.divf %131, %132 : vector<2x32xf32>
    %134 = vector.extract_strided_slice %125 {offsets = [0, 32], sizes = [2, 32], strides = [1, 1]} : vector<2x96xf32> to vector<2x32xf32>
    %135 = vector.extract_strided_slice %124 {offsets = [0, 32], sizes = [2, 32], strides = [1, 1]} : vector<2x96xf32> to vector<2x32xf32>
    %136 = arith.addf %134, %135 : vector<2x32xf32>
    %137 = arith.negf %136 : vector<2x32xf32>
    %138 = math.exp %137 : vector<2x32xf32>
    %cst_51 = arith.constant 1.000000e+00 : f32
    %139 = vector.broadcast %cst_51 : f32 to vector<2x32xf32>
    %140 = arith.addf %139, %138 : vector<2x32xf32>
    %141 = arith.divf %139, %140 : vector<2x32xf32>
    %142 = vector.extract_strided_slice %125 {offsets = [0, 64], sizes = [2, 32], strides = [1, 1]} : vector<2x96xf32> to vector<2x32xf32>
    %143 = vector.extract_strided_slice %124 {offsets = [0, 64], sizes = [2, 32], strides = [1, 1]} : vector<2x96xf32> to vector<2x32xf32>
    %144 = vector.broadcast %10 : vector<1x32xf32> to vector<2x32xf32>
    %145 = arith.addf %143, %144 : vector<2x32xf32>
    %146 = arith.mulf %133, %145 : vector<2x32xf32>
    %147 = arith.addf %142, %146 : vector<2x32xf32>
    %148 = math.tanh %147 : vector<2x32xf32>
    %cst_52 = arith.constant 1.000000e+00 : f32
    %149 = vector.broadcast %cst_52 : f32 to vector<2x32xf32>
    %150 = arith.subf %149, %141 : vector<2x32xf32>
    %151 = arith.mulf %150, %148 : vector<2x32xf32>
    %152 = arith.mulf %141, %81 : vector<2x32xf32>
    %153 = arith.addf %151, %152 : vector<2x32xf32>
    %c0_53 = arith.constant 0 : index
    %c6_54 = arith.constant 6 : index
    %c0_55 = arith.constant 0 : index
    %154 = vector.load %arg6[%c0_53, %c6_54, %c0_55] : memref<2x8x32xf32, #tpu.memory_space<vmem>>, vector<2x1x32xf32>
    %155 = vector.shape_cast %154 : vector<2x1x32xf32> to vector<2x32xf32>
    %156 = vector.shape_cast %153 : vector<2x32xf32> to vector<2x1x32xf32>
    tpu.vector_store %arg6[%c0_53, %c6_54, %c0_55], %156 {strides = array<i32>} : memref<2x8x32xf32, #tpu.memory_space<vmem>>, vector<2x1x32xf32>,
    %c0_56 = arith.constant 0 : index
    %c2 = arith.constant 2 : index
    %c0_57 = arith.constant 0 : index
    %c0_58 = arith.constant 0 : index
    %157 = vector.load %arg1[%c0_56, %c2, %c0_57, %c0_58] : memref<1x8x2x96xbf16, #tpu.memory_space<vmem>>, vector<1x1x2x96xbf16>
    %158 = vector.shape_cast %157 : vector<1x1x2x96xbf16> to vector<2x96xbf16>
    %159 = arith.truncf %117 : vector<2x32xf32> to vector<2x32xbf16>
    %cst_59 = arith.constant dense<0.000000e+00> : vector<2x96xf32>
    %160 = tpu.matmul %159, %4, %cst_59 {dimension_numbers = #tpu.dot_dimension_numbers<[1], [0], [0], [1], [0, 0, 1, 1], [], []>} : vector<2x32xbf16>, vector<32x96xbf16>, vector<2x96xf32> -> vector<2x96xf32>
    %161 = arith.extf %158 : vector<2x96xbf16> to vector<2x96xf32>
    %162 = vector.extract_strided_slice %161 {offsets = [0, 0], sizes = [2, 32], strides = [1, 1]} : vector<2x96xf32> to vector<2x32xf32>
    %163 = vector.extract_strided_slice %160 {offsets = [0, 0], sizes = [2, 32], strides = [1, 1]} : vector<2x96xf32> to vector<2x32xf32>
    %164 = arith.addf %162, %163 : vector<2x32xf32>
    %165 = arith.negf %164 : vector<2x32xf32>
    %166 = math.exp %165 : vector<2x32xf32>
    %cst_60 = arith.constant 1.000000e+00 : f32
    %167 = vector.broadcast %cst_60 : f32 to vector<2x32xf32>
    %168 = arith.addf %167, %166 : vector<2x32xf32>
    %169 = arith.divf %167, %168 : vector<2x32xf32>
    %170 = vector.extract_strided_slice %161 {offsets = [0, 32], sizes = [2, 32], strides = [1, 1]} : vector<2x96xf32> to vector<2x32xf32>
    %171 = vector.extract_strided_slice %160 {offsets = [0, 32], sizes = [2, 32], strides = [1, 1]} : vector<2x96xf32> to vector<2x32xf32>
    %172 = arith.addf %170, %171 : vector<2x32xf32>
    %173 = arith.negf %172 : vector<2x32xf32>
    %174 = math.exp %173 : vector<2x32xf32>
    %cst_61 = arith.constant 1.000000e+00 : f32
    %175 = vector.broadcast %cst_61 : f32 to vector<2x32xf32>
    %176 = arith.addf %175, %174 : vector<2x32xf32>
    %177 = arith.divf %175, %176 : vector<2x32xf32>
    %178 = vector.extract_strided_slice %161 {offsets = [0, 64], sizes = [2, 32], strides = [1, 1]} : vector<2x96xf32> to vector<2x32xf32>
    %179 = vector.extract_strided_slice %160 {offsets = [0, 64], sizes = [2, 32], strides = [1, 1]} : vector<2x96xf32> to vector<2x32xf32>
    %180 = vector.broadcast %8 : vector<1x32xf32> to vector<2x32xf32>
    %181 = arith.addf %179, %180 : vector<2x32xf32>
    %182 = arith.mulf %169, %181 : vector<2x32xf32>
    %183 = arith.addf %178, %182 : vector<2x32xf32>
    %184 = math.tanh %183 : vector<2x32xf32>
    %cst_62 = arith.constant 1.000000e+00 : f32
    %185 = vector.broadcast %cst_62 : f32 to vector<2x32xf32>
    %186 = arith.subf %185, %177 : vector<2x32xf32>
    %187 = arith.mulf %186, %184 : vector<2x32xf32>
    %188 = arith.mulf %177, %117 : vector<2x32xf32>
    %189 = arith.addf %187, %188 : vector<2x32xf32>
    %c0_63 = arith.constant 0 : index
    %c2_64 = arith.constant 2 : index
    %c0_65 = arith.constant 0 : index
    %190 = vector.load %arg5[%c0_63, %c2_64, %c0_65] : memref<2x8x32xf32, #tpu.memory_space<vmem>>, vector<2x1x32xf32>
    %191 = vector.shape_cast %190 : vector<2x1x32xf32> to vector<2x32xf32>
    %192 = vector.shape_cast %189 : vector<2x32xf32> to vector<2x1x32xf32>
    tpu.vector_store %arg5[%c0_63, %c2_64, %c0_65], %192 {strides = array<i32>} : memref<2x8x32xf32, #tpu.memory_space<vmem>>, vector<2x1x32xf32>,
    %c0_66 = arith.constant 0 : index
    %c5 = arith.constant 5 : index
    %c0_67 = arith.constant 0 : index
    %c0_68 = arith.constant 0 : index
    %193 = vector.load %arg2[%c0_66, %c5, %c0_67, %c0_68] : memref<1x8x2x96xbf16, #tpu.memory_space<vmem>>, vector<1x1x2x96xbf16>
    %194 = vector.shape_cast %193 : vector<1x1x2x96xbf16> to vector<2x96xbf16>
    %195 = arith.truncf %153 : vector<2x32xf32> to vector<2x32xbf16>
    %cst_69 = arith.constant dense<0.000000e+00> : vector<2x96xf32>
    %196 = tpu.matmul %195, %6, %cst_69 {dimension_numbers = #tpu.dot_dimension_numbers<[1], [0], [0], [1], [0, 0, 1, 1], [], []>} : vector<2x32xbf16>, vector<32x96xbf16>, vector<2x96xf32> -> vector<2x96xf32>
    %197 = arith.extf %194 : vector<2x96xbf16> to vector<2x96xf32>
    %198 = vector.extract_strided_slice %197 {offsets = [0, 0], sizes = [2, 32], strides = [1, 1]} : vector<2x96xf32> to vector<2x32xf32>
    %199 = vector.extract_strided_slice %196 {offsets = [0, 0], sizes = [2, 32], strides = [1, 1]} : vector<2x96xf32> to vector<2x32xf32>
    %200 = arith.addf %198, %199 : vector<2x32xf32>
    %201 = arith.negf %200 : vector<2x32xf32>
    %202 = math.exp %201 : vector<2x32xf32>
    %cst_70 = arith.constant 1.000000e+00 : f32
    %203 = vector.broadcast %cst_70 : f32 to vector<2x32xf32>
    %204 = arith.addf %203, %202 : vector<2x32xf32>
    %205 = arith.divf %203, %204 : vector<2x32xf32>
    %206 = vector.extract_strided_slice %197 {offsets = [0, 32], sizes = [2, 32], strides = [1, 1]} : vector<2x96xf32> to vector<2x32xf32>
    %207 = vector.extract_strided_slice %196 {offsets = [0, 32], sizes = [2, 32], strides = [1, 1]} : vector<2x96xf32> to vector<2x32xf32>
    %208 = arith.addf %206, %207 : vector<2x32xf32>
    %209 = arith.negf %208 : vector<2x32xf32>
    %210 = math.exp %209 : vector<2x32xf32>
    %cst_71 = arith.constant 1.000000e+00 : f32
    %211 = vector.broadcast %cst_71 : f32 to vector<2x32xf32>
    %212 = arith.addf %211, %210 : vector<2x32xf32>
    %213 = arith.divf %211, %212 : vector<2x32xf32>
    %214 = vector.extract_strided_slice %197 {offsets = [0, 64], sizes = [2, 32], strides = [1, 1]} : vector<2x96xf32> to vector<2x32xf32>
    %215 = vector.extract_strided_slice %196 {offsets = [0, 64], sizes = [2, 32], strides = [1, 1]} : vector<2x96xf32> to vector<2x32xf32>
    %216 = vector.broadcast %10 : vector<1x32xf32> to vector<2x32xf32>
    %217 = arith.addf %215, %216 : vector<2x32xf32>
    %218 = arith.mulf %205, %217 : vector<2x32xf32>
    %219 = arith.addf %214, %218 : vector<2x32xf32>
    %220 = math.tanh %219 : vector<2x32xf32>
    %cst_72 = arith.constant 1.000000e+00 : f32
    %221 = vector.broadcast %cst_72 : f32 to vector<2x32xf32>
    %222 = arith.subf %221, %213 : vector<2x32xf32>
    %223 = arith.mulf %222, %220 : vector<2x32xf32>
    %224 = arith.mulf %213, %153 : vector<2x32xf32>
    %225 = arith.addf %223, %224 : vector<2x32xf32>
    %c0_73 = arith.constant 0 : index
    %c5_74 = arith.constant 5 : index
    %c0_75 = arith.constant 0 : index
    %226 = vector.load %arg6[%c0_73, %c5_74, %c0_75] : memref<2x8x32xf32, #tpu.memory_space<vmem>>, vector<2x1x32xf32>
    %227 = vector.shape_cast %226 : vector<2x1x32xf32> to vector<2x32xf32>
    %228 = vector.shape_cast %225 : vector<2x32xf32> to vector<2x1x32xf32>
    tpu.vector_store %arg6[%c0_73, %c5_74, %c0_75], %228 {strides = array<i32>} : memref<2x8x32xf32, #tpu.memory_space<vmem>>, vector<2x1x32xf32>,
    %c0_76 = arith.constant 0 : index
    %c3 = arith.constant 3 : index
    %c0_77 = arith.constant 0 : index
    %c0_78 = arith.constant 0 : index
    %229 = vector.load %arg1[%c0_76, %c3, %c0_77, %c0_78] : memref<1x8x2x96xbf16, #tpu.memory_space<vmem>>, vector<1x1x2x96xbf16>
    %230 = vector.shape_cast %229 : vector<1x1x2x96xbf16> to vector<2x96xbf16>
    %231 = arith.truncf %189 : vector<2x32xf32> to vector<2x32xbf16>
    %cst_79 = arith.constant dense<0.000000e+00> : vector<2x96xf32>
    %232 = tpu.matmul %231, %4, %cst_79 {dimension_numbers = #tpu.dot_dimension_numbers<[1], [0], [0], [1], [0, 0, 1, 1], [], []>} : vector<2x32xbf16>, vector<32x96xbf16>, vector<2x96xf32> -> vector<2x96xf32>
    %233 = arith.extf %230 : vector<2x96xbf16> to vector<2x96xf32>
    %234 = vector.extract_strided_slice %233 {offsets = [0, 0], sizes = [2, 32], strides = [1, 1]} : vector<2x96xf32> to vector<2x32xf32>
    %235 = vector.extract_strided_slice %232 {offsets = [0, 0], sizes = [2, 32], strides = [1, 1]} : vector<2x96xf32> to vector<2x32xf32>
    %236 = arith.addf %234, %235 : vector<2x32xf32>
    %237 = arith.negf %236 : vector<2x32xf32>
    %238 = math.exp %237 : vector<2x32xf32>
    %cst_80 = arith.constant 1.000000e+00 : f32
    %239 = vector.broadcast %cst_80 : f32 to vector<2x32xf32>
    %240 = arith.addf %239, %238 : vector<2x32xf32>
    %241 = arith.divf %239, %240 : vector<2x32xf32>
    %242 = vector.extract_strided_slice %233 {offsets = [0, 32], sizes = [2, 32], strides = [1, 1]} : vector<2x96xf32> to vector<2x32xf32>
    %243 = vector.extract_strided_slice %232 {offsets = [0, 32], sizes = [2, 32], strides = [1, 1]} : vector<2x96xf32> to vector<2x32xf32>
    %244 = arith.addf %242, %243 : vector<2x32xf32>
    %245 = arith.negf %244 : vector<2x32xf32>
    %246 = math.exp %245 : vector<2x32xf32>
    %cst_81 = arith.constant 1.000000e+00 : f32
    %247 = vector.broadcast %cst_81 : f32 to vector<2x32xf32>
    %248 = arith.addf %247, %246 : vector<2x32xf32>
    %249 = arith.divf %247, %248 : vector<2x32xf32>
    %250 = vector.extract_strided_slice %233 {offsets = [0, 64], sizes = [2, 32], strides = [1, 1]} : vector<2x96xf32> to vector<2x32xf32>
    %251 = vector.extract_strided_slice %232 {offsets = [0, 64], sizes = [2, 32], strides = [1, 1]} : vector<2x96xf32> to vector<2x32xf32>
    %252 = vector.broadcast %8 : vector<1x32xf32> to vector<2x32xf32>
    %253 = arith.addf %251, %252 : vector<2x32xf32>
    %254 = arith.mulf %241, %253 : vector<2x32xf32>
    %255 = arith.addf %250, %254 : vector<2x32xf32>
    %256 = math.tanh %255 : vector<2x32xf32>
    %cst_82 = arith.constant 1.000000e+00 : f32
    %257 = vector.broadcast %cst_82 : f32 to vector<2x32xf32>
    %258 = arith.subf %257, %249 : vector<2x32xf32>
    %259 = arith.mulf %258, %256 : vector<2x32xf32>
    %260 = arith.mulf %249, %189 : vector<2x32xf32>
    %261 = arith.addf %259, %260 : vector<2x32xf32>
    %c0_83 = arith.constant 0 : index
    %c3_84 = arith.constant 3 : index
    %c0_85 = arith.constant 0 : index
    %262 = vector.load %arg5[%c0_83, %c3_84, %c0_85] : memref<2x8x32xf32, #tpu.memory_space<vmem>>, vector<2x1x32xf32>
    %263 = vector.shape_cast %262 : vector<2x1x32xf32> to vector<2x32xf32>
    %264 = vector.shape_cast %261 : vector<2x32xf32> to vector<2x1x32xf32>
    tpu.vector_store %arg5[%c0_83, %c3_84, %c0_85], %264 {strides = array<i32>} : memref<2x8x32xf32, #tpu.memory_space<vmem>>, vector<2x1x32xf32>,
    %c0_86 = arith.constant 0 : index
    %c4 = arith.constant 4 : index
    %c0_87 = arith.constant 0 : index
    %c0_88 = arith.constant 0 : index
    %265 = vector.load %arg2[%c0_86, %c4, %c0_87, %c0_88] : memref<1x8x2x96xbf16, #tpu.memory_space<vmem>>, vector<1x1x2x96xbf16>
    %266 = vector.shape_cast %265 : vector<1x1x2x96xbf16> to vector<2x96xbf16>
    %267 = arith.truncf %225 : vector<2x32xf32> to vector<2x32xbf16>
    %cst_89 = arith.constant dense<0.000000e+00> : vector<2x96xf32>
    %268 = tpu.matmul %267, %6, %cst_89 {dimension_numbers = #tpu.dot_dimension_numbers<[1], [0], [0], [1], [0, 0, 1, 1], [], []>} : vector<2x32xbf16>, vector<32x96xbf16>, vector<2x96xf32> -> vector<2x96xf32>
    %269 = arith.extf %266 : vector<2x96xbf16> to vector<2x96xf32>
    %270 = vector.extract_strided_slice %269 {offsets = [0, 0], sizes = [2, 32], strides = [1, 1]} : vector<2x96xf32> to vector<2x32xf32>
    %271 = vector.extract_strided_slice %268 {offsets = [0, 0], sizes = [2, 32], strides = [1, 1]} : vector<2x96xf32> to vector<2x32xf32>
    %272 = arith.addf %270, %271 : vector<2x32xf32>
    %273 = arith.negf %272 : vector<2x32xf32>
    %274 = math.exp %273 : vector<2x32xf32>
    %cst_90 = arith.constant 1.000000e+00 : f32
    %275 = vector.broadcast %cst_90 : f32 to vector<2x32xf32>
    %276 = arith.addf %275, %274 : vector<2x32xf32>
    %277 = arith.divf %275, %276 : vector<2x32xf32>
    %278 = vector.extract_strided_slice %269 {offsets = [0, 32], sizes = [2, 32], strides = [1, 1]} : vector<2x96xf32> to vector<2x32xf32>
    %279 = vector.extract_strided_slice %268 {offsets = [0, 32], sizes = [2, 32], strides = [1, 1]} : vector<2x96xf32> to vector<2x32xf32>
    %280 = arith.addf %278, %279 : vector<2x32xf32>
    %281 = arith.negf %280 : vector<2x32xf32>
    %282 = math.exp %281 : vector<2x32xf32>
    %cst_91 = arith.constant 1.000000e+00 : f32
    %283 = vector.broadcast %cst_91 : f32 to vector<2x32xf32>
    %284 = arith.addf %283, %282 : vector<2x32xf32>
    %285 = arith.divf %283, %284 : vector<2x32xf32>
    %286 = vector.extract_strided_slice %269 {offsets = [0, 64], sizes = [2, 32], strides = [1, 1]} : vector<2x96xf32> to vector<2x32xf32>
    %287 = vector.extract_strided_slice %268 {offsets = [0, 64], sizes = [2, 32], strides = [1, 1]} : vector<2x96xf32> to vector<2x32xf32>
    %288 = vector.broadcast %10 : vector<1x32xf32> to vector<2x32xf32>
    %289 = arith.addf %287, %288 : vector<2x32xf32>
    %290 = arith.mulf %277, %289 : vector<2x32xf32>
    %291 = arith.addf %286, %290 : vector<2x32xf32>
    %292 = math.tanh %291 : vector<2x32xf32>
    %cst_92 = arith.constant 1.000000e+00 : f32
    %293 = vector.broadcast %cst_92 : f32 to vector<2x32xf32>
    %294 = arith.subf %293, %285 : vector<2x32xf32>
    %295 = arith.mulf %294, %292 : vector<2x32xf32>
    %296 = arith.mulf %285, %225 : vector<2x32xf32>
    %297 = arith.addf %295, %296 : vector<2x32xf32>
    %c0_93 = arith.constant 0 : index
    %c4_94 = arith.constant 4 : index
    %c0_95 = arith.constant 0 : index
    %298 = vector.load %arg6[%c0_93, %c4_94, %c0_95] : memref<2x8x32xf32, #tpu.memory_space<vmem>>, vector<2x1x32xf32>
    %299 = vector.shape_cast %298 : vector<2x1x32xf32> to vector<2x32xf32>
    %300 = vector.shape_cast %297 : vector<2x32xf32> to vector<2x1x32xf32>
    tpu.vector_store %arg6[%c0_93, %c4_94, %c0_95], %300 {strides = array<i32>} : memref<2x8x32xf32, #tpu.memory_space<vmem>>, vector<2x1x32xf32>,
    %c0_96 = arith.constant 0 : index
    %c4_97 = arith.constant 4 : index
    %c0_98 = arith.constant 0 : index
    %c0_99 = arith.constant 0 : index
    %301 = vector.load %arg1[%c0_96, %c4_97, %c0_98, %c0_99] : memref<1x8x2x96xbf16, #tpu.memory_space<vmem>>, vector<1x1x2x96xbf16>
    %302 = vector.shape_cast %301 : vector<1x1x2x96xbf16> to vector<2x96xbf16>
    %303 = arith.truncf %261 : vector<2x32xf32> to vector<2x32xbf16>
    %cst_100 = arith.constant dense<0.000000e+00> : vector<2x96xf32>
    %304 = tpu.matmul %303, %4, %cst_100 {dimension_numbers = #tpu.dot_dimension_numbers<[1], [0], [0], [1], [0, 0, 1, 1], [], []>} : vector<2x32xbf16>, vector<32x96xbf16>, vector<2x96xf32> -> vector<2x96xf32>
    %305 = arith.extf %302 : vector<2x96xbf16> to vector<2x96xf32>
    %306 = vector.extract_strided_slice %305 {offsets = [0, 0], sizes = [2, 32], strides = [1, 1]} : vector<2x96xf32> to vector<2x32xf32>
    %307 = vector.extract_strided_slice %304 {offsets = [0, 0], sizes = [2, 32], strides = [1, 1]} : vector<2x96xf32> to vector<2x32xf32>
    %308 = arith.addf %306, %307 : vector<2x32xf32>
    %309 = arith.negf %308 : vector<2x32xf32>
    %310 = math.exp %309 : vector<2x32xf32>
    %cst_101 = arith.constant 1.000000e+00 : f32
    %311 = vector.broadcast %cst_101 : f32 to vector<2x32xf32>
    %312 = arith.addf %311, %310 : vector<2x32xf32>
    %313 = arith.divf %311, %312 : vector<2x32xf32>
    %314 = vector.extract_strided_slice %305 {offsets = [0, 32], sizes = [2, 32], strides = [1, 1]} : vector<2x96xf32> to vector<2x32xf32>
    %315 = vector.extract_strided_slice %304 {offsets = [0, 32], sizes = [2, 32], strides = [1, 1]} : vector<2x96xf32> to vector<2x32xf32>
    %316 = arith.addf %314, %315 : vector<2x32xf32>
    %317 = arith.negf %316 : vector<2x32xf32>
    %318 = math.exp %317 : vector<2x32xf32>
    %cst_102 = arith.constant 1.000000e+00 : f32
    %319 = vector.broadcast %cst_102 : f32 to vector<2x32xf32>
    %320 = arith.addf %319, %318 : vector<2x32xf32>
    %321 = arith.divf %319, %320 : vector<2x32xf32>
    %322 = vector.extract_strided_slice %305 {offsets = [0, 64], sizes = [2, 32], strides = [1, 1]} : vector<2x96xf32> to vector<2x32xf32>
    %323 = vector.extract_strided_slice %304 {offsets = [0, 64], sizes = [2, 32], strides = [1, 1]} : vector<2x96xf32> to vector<2x32xf32>
    %324 = vector.broadcast %8 : vector<1x32xf32> to vector<2x32xf32>
    %325 = arith.addf %323, %324 : vector<2x32xf32>
    %326 = arith.mulf %313, %325 : vector<2x32xf32>
    %327 = arith.addf %322, %326 : vector<2x32xf32>
    %328 = math.tanh %327 : vector<2x32xf32>
    %cst_103 = arith.constant 1.000000e+00 : f32
    %329 = vector.broadcast %cst_103 : f32 to vector<2x32xf32>
    %330 = arith.subf %329, %321 : vector<2x32xf32>
    %331 = arith.mulf %330, %328 : vector<2x32xf32>
    %332 = arith.mulf %321, %261 : vector<2x32xf32>
    %333 = arith.addf %331, %332 : vector<2x32xf32>
    %c0_104 = arith.constant 0 : index
    %c4_105 = arith.constant 4 : index
    %c0_106 = arith.constant 0 : index
    %334 = vector.load %arg5[%c0_104, %c4_105, %c0_106] : memref<2x8x32xf32, #tpu.memory_space<vmem>>, vector<2x1x32xf32>
    %335 = vector.shape_cast %334 : vector<2x1x32xf32> to vector<2x32xf32>
    %336 = vector.shape_cast %333 : vector<2x32xf32> to vector<2x1x32xf32>
    tpu.vector_store %arg5[%c0_104, %c4_105, %c0_106], %336 {strides = array<i32>} : memref<2x8x32xf32, #tpu.memory_space<vmem>>, vector<2x1x32xf32>,
    %c0_107 = arith.constant 0 : index
    %c3_108 = arith.constant 3 : index
    %c0_109 = arith.constant 0 : index
    %c0_110 = arith.constant 0 : index
    %337 = vector.load %arg2[%c0_107, %c3_108, %c0_109, %c0_110] : memref<1x8x2x96xbf16, #tpu.memory_space<vmem>>, vector<1x1x2x96xbf16>
    %338 = vector.shape_cast %337 : vector<1x1x2x96xbf16> to vector<2x96xbf16>
    %339 = arith.truncf %297 : vector<2x32xf32> to vector<2x32xbf16>
    %cst_111 = arith.constant dense<0.000000e+00> : vector<2x96xf32>
    %340 = tpu.matmul %339, %6, %cst_111 {dimension_numbers = #tpu.dot_dimension_numbers<[1], [0], [0], [1], [0, 0, 1, 1], [], []>} : vector<2x32xbf16>, vector<32x96xbf16>, vector<2x96xf32> -> vector<2x96xf32>
    %341 = arith.extf %338 : vector<2x96xbf16> to vector<2x96xf32>
    %342 = vector.extract_strided_slice %341 {offsets = [0, 0], sizes = [2, 32], strides = [1, 1]} : vector<2x96xf32> to vector<2x32xf32>
    %343 = vector.extract_strided_slice %340 {offsets = [0, 0], sizes = [2, 32], strides = [1, 1]} : vector<2x96xf32> to vector<2x32xf32>
    %344 = arith.addf %342, %343 : vector<2x32xf32>
    %345 = arith.negf %344 : vector<2x32xf32>
    %346 = math.exp %345 : vector<2x32xf32>
    %cst_112 = arith.constant 1.000000e+00 : f32
    %347 = vector.broadcast %cst_112 : f32 to vector<2x32xf32>
    %348 = arith.addf %347, %346 : vector<2x32xf32>
    %349 = arith.divf %347, %348 : vector<2x32xf32>
    %350 = vector.extract_strided_slice %341 {offsets = [0, 32], sizes = [2, 32], strides = [1, 1]} : vector<2x96xf32> to vector<2x32xf32>
    %351 = vector.extract_strided_slice %340 {offsets = [0, 32], sizes = [2, 32], strides = [1, 1]} : vector<2x96xf32> to vector<2x32xf32>
    %352 = arith.addf %350, %351 : vector<2x32xf32>
    %353 = arith.negf %352 : vector<2x32xf32>
    %354 = math.exp %353 : vector<2x32xf32>
    %cst_113 = arith.constant 1.000000e+00 : f32
    %355 = vector.broadcast %cst_113 : f32 to vector<2x32xf32>
    %356 = arith.addf %355, %354 : vector<2x32xf32>
    %357 = arith.divf %355, %356 : vector<2x32xf32>
    %358 = vector.extract_strided_slice %341 {offsets = [0, 64], sizes = [2, 32], strides = [1, 1]} : vector<2x96xf32> to vector<2x32xf32>
    %359 = vector.extract_strided_slice %340 {offsets = [0, 64], sizes = [2, 32], strides = [1, 1]} : vector<2x96xf32> to vector<2x32xf32>
    %360 = vector.broadcast %10 : vector<1x32xf32> to vector<2x32xf32>
    %361 = arith.addf %359, %360 : vector<2x32xf32>
    %362 = arith.mulf %349, %361 : vector<2x32xf32>
    %363 = arith.addf %358, %362 : vector<2x32xf32>
    %364 = math.tanh %363 : vector<2x32xf32>
    %cst_114 = arith.constant 1.000000e+00 : f32
    %365 = vector.broadcast %cst_114 : f32 to vector<2x32xf32>
    %366 = arith.subf %365, %357 : vector<2x32xf32>
    %367 = arith.mulf %366, %364 : vector<2x32xf32>
    %368 = arith.mulf %357, %297 : vector<2x32xf32>
    %369 = arith.addf %367, %368 : vector<2x32xf32>
    %c0_115 = arith.constant 0 : index
    %c3_116 = arith.constant 3 : index
    %c0_117 = arith.constant 0 : index
    %370 = vector.load %arg6[%c0_115, %c3_116, %c0_117] : memref<2x8x32xf32, #tpu.memory_space<vmem>>, vector<2x1x32xf32>
    %371 = vector.shape_cast %370 : vector<2x1x32xf32> to vector<2x32xf32>
    %372 = vector.shape_cast %369 : vector<2x32xf32> to vector<2x1x32xf32>
    tpu.vector_store %arg6[%c0_115, %c3_116, %c0_117], %372 {strides = array<i32>} : memref<2x8x32xf32, #tpu.memory_space<vmem>>, vector<2x1x32xf32>,
    %c0_118 = arith.constant 0 : index
    %c5_119 = arith.constant 5 : index
    %c0_120 = arith.constant 0 : index
    %c0_121 = arith.constant 0 : index
    %373 = vector.load %arg1[%c0_118, %c5_119, %c0_120, %c0_121] : memref<1x8x2x96xbf16, #tpu.memory_space<vmem>>, vector<1x1x2x96xbf16>
    %374 = vector.shape_cast %373 : vector<1x1x2x96xbf16> to vector<2x96xbf16>
    %375 = arith.truncf %333 : vector<2x32xf32> to vector<2x32xbf16>
    %cst_122 = arith.constant dense<0.000000e+00> : vector<2x96xf32>
    %376 = tpu.matmul %375, %4, %cst_122 {dimension_numbers = #tpu.dot_dimension_numbers<[1], [0], [0], [1], [0, 0, 1, 1], [], []>} : vector<2x32xbf16>, vector<32x96xbf16>, vector<2x96xf32> -> vector<2x96xf32>
    %377 = arith.extf %374 : vector<2x96xbf16> to vector<2x96xf32>
    %378 = vector.extract_strided_slice %377 {offsets = [0, 0], sizes = [2, 32], strides = [1, 1]} : vector<2x96xf32> to vector<2x32xf32>
    %379 = vector.extract_strided_slice %376 {offsets = [0, 0], sizes = [2, 32], strides = [1, 1]} : vector<2x96xf32> to vector<2x32xf32>
    %380 = arith.addf %378, %379 : vector<2x32xf32>
    %381 = arith.negf %380 : vector<2x32xf32>
    %382 = math.exp %381 : vector<2x32xf32>
    %cst_123 = arith.constant 1.000000e+00 : f32
    %383 = vector.broadcast %cst_123 : f32 to vector<2x32xf32>
    %384 = arith.addf %383, %382 : vector<2x32xf32>
    %385 = arith.divf %383, %384 : vector<2x32xf32>
    %386 = vector.extract_strided_slice %377 {offsets = [0, 32], sizes = [2, 32], strides = [1, 1]} : vector<2x96xf32> to vector<2x32xf32>
    %387 = vector.extract_strided_slice %376 {offsets = [0, 32], sizes = [2, 32], strides = [1, 1]} : vector<2x96xf32> to vector<2x32xf32>
    %388 = arith.addf %386, %387 : vector<2x32xf32>
    %389 = arith.negf %388 : vector<2x32xf32>
    %390 = math.exp %389 : vector<2x32xf32>
    %cst_124 = arith.constant 1.000000e+00 : f32
    %391 = vector.broadcast %cst_124 : f32 to vector<2x32xf32>
    %392 = arith.addf %391, %390 : vector<2x32xf32>
    %393 = arith.divf %391, %392 : vector<2x32xf32>
    %394 = vector.extract_strided_slice %377 {offsets = [0, 64], sizes = [2, 32], strides = [1, 1]} : vector<2x96xf32> to vector<2x32xf32>
    %395 = vector.extract_strided_slice %376 {offsets = [0, 64], sizes = [2, 32], strides = [1, 1]} : vector<2x96xf32> to vector<2x32xf32>
    %396 = vector.broadcast %8 : vector<1x32xf32> to vector<2x32xf32>
    %397 = arith.addf %395, %396 : vector<2x32xf32>
    %398 = arith.mulf %385, %397 : vector<2x32xf32>
    %399 = arith.addf %394, %398 : vector<2x32xf32>
    %400 = math.tanh %399 : vector<2x32xf32>
    %cst_125 = arith.constant 1.000000e+00 : f32
    %401 = vector.broadcast %cst_125 : f32 to vector<2x32xf32>
    %402 = arith.subf %401, %393 : vector<2x32xf32>
    %403 = arith.mulf %402, %400 : vector<2x32xf32>
    %404 = arith.mulf %393, %333 : vector<2x32xf32>
    %405 = arith.addf %403, %404 : vector<2x32xf32>
    %c0_126 = arith.constant 0 : index
    %c5_127 = arith.constant 5 : index
    %c0_128 = arith.constant 0 : index
    %406 = vector.load %arg5[%c0_126, %c5_127, %c0_128] : memref<2x8x32xf32, #tpu.memory_space<vmem>>, vector<2x1x32xf32>
    %407 = vector.shape_cast %406 : vector<2x1x32xf32> to vector<2x32xf32>
    %408 = vector.shape_cast %405 : vector<2x32xf32> to vector<2x1x32xf32>
    tpu.vector_store %arg5[%c0_126, %c5_127, %c0_128], %408 {strides = array<i32>} : memref<2x8x32xf32, #tpu.memory_space<vmem>>, vector<2x1x32xf32>,
    %c0_129 = arith.constant 0 : index
    %c2_130 = arith.constant 2 : index
    %c0_131 = arith.constant 0 : index
    %c0_132 = arith.constant 0 : index
    %409 = vector.load %arg2[%c0_129, %c2_130, %c0_131, %c0_132] : memref<1x8x2x96xbf16, #tpu.memory_space<vmem>>, vector<1x1x2x96xbf16>
    %410 = vector.shape_cast %409 : vector<1x1x2x96xbf16> to vector<2x96xbf16>
    %411 = arith.truncf %369 : vector<2x32xf32> to vector<2x32xbf16>
    %cst_133 = arith.constant dense<0.000000e+00> : vector<2x96xf32>
    %412 = tpu.matmul %411, %6, %cst_133 {dimension_numbers = #tpu.dot_dimension_numbers<[1], [0], [0], [1], [0, 0, 1, 1], [], []>} : vector<2x32xbf16>, vector<32x96xbf16>, vector<2x96xf32> -> vector<2x96xf32>
    %413 = arith.extf %410 : vector<2x96xbf16> to vector<2x96xf32>
    %414 = vector.extract_strided_slice %413 {offsets = [0, 0], sizes = [2, 32], strides = [1, 1]} : vector<2x96xf32> to vector<2x32xf32>
    %415 = vector.extract_strided_slice %412 {offsets = [0, 0], sizes = [2, 32], strides = [1, 1]} : vector<2x96xf32> to vector<2x32xf32>
    %416 = arith.addf %414, %415 : vector<2x32xf32>
    %417 = arith.negf %416 : vector<2x32xf32>
    %418 = math.exp %417 : vector<2x32xf32>
    %cst_134 = arith.constant 1.000000e+00 : f32
    %419 = vector.broadcast %cst_134 : f32 to vector<2x32xf32>
    %420 = arith.addf %419, %418 : vector<2x32xf32>
    %421 = arith.divf %419, %420 : vector<2x32xf32>
    %422 = vector.extract_strided_slice %413 {offsets = [0, 32], sizes = [2, 32], strides = [1, 1]} : vector<2x96xf32> to vector<2x32xf32>
    %423 = vector.extract_strided_slice %412 {offsets = [0, 32], sizes = [2, 32], strides = [1, 1]} : vector<2x96xf32> to vector<2x32xf32>
    %424 = arith.addf %422, %423 : vector<2x32xf32>
    %425 = arith.negf %424 : vector<2x32xf32>
    %426 = math.exp %425 : vector<2x32xf32>
    %cst_135 = arith.constant 1.000000e+00 : f32
    %427 = vector.broadcast %cst_135 : f32 to vector<2x32xf32>
    %428 = arith.addf %427, %426 : vector<2x32xf32>
    %429 = arith.divf %427, %428 : vector<2x32xf32>
    %430 = vector.extract_strided_slice %413 {offsets = [0, 64], sizes = [2, 32], strides = [1, 1]} : vector<2x96xf32> to vector<2x32xf32>
    %431 = vector.extract_strided_slice %412 {offsets = [0, 64], sizes = [2, 32], strides = [1, 1]} : vector<2x96xf32> to vector<2x32xf32>
    %432 = vector.broadcast %10 : vector<1x32xf32> to vector<2x32xf32>
    %433 = arith.addf %431, %432 : vector<2x32xf32>
    %434 = arith.mulf %421, %433 : vector<2x32xf32>
    %435 = arith.addf %430, %434 : vector<2x32xf32>
    %436 = math.tanh %435 : vector<2x32xf32>
    %cst_136 = arith.constant 1.000000e+00 : f32
    %437 = vector.broadcast %cst_136 : f32 to vector<2x32xf32>
    %438 = arith.subf %437, %429 : vector<2x32xf32>
    %439 = arith.mulf %438, %436 : vector<2x32xf32>
    %440 = arith.mulf %429, %369 : vector<2x32xf32>
    %441 = arith.addf %439, %440 : vector<2x32xf32>
    %c0_137 = arith.constant 0 : index
    %c2_138 = arith.constant 2 : index
    %c0_139 = arith.constant 0 : index
    %442 = vector.load %arg6[%c0_137, %c2_138, %c0_139] : memref<2x8x32xf32, #tpu.memory_space<vmem>>, vector<2x1x32xf32>
    %443 = vector.shape_cast %442 : vector<2x1x32xf32> to vector<2x32xf32>
    %444 = vector.shape_cast %441 : vector<2x32xf32> to vector<2x1x32xf32>
    tpu.vector_store %arg6[%c0_137, %c2_138, %c0_139], %444 {strides = array<i32>} : memref<2x8x32xf32, #tpu.memory_space<vmem>>, vector<2x1x32xf32>,
    %c0_140 = arith.constant 0 : index
    %c6_141 = arith.constant 6 : index
    %c0_142 = arith.constant 0 : index
    %c0_143 = arith.constant 0 : index
    %445 = vector.load %arg1[%c0_140, %c6_141, %c0_142, %c0_143] : memref<1x8x2x96xbf16, #tpu.memory_space<vmem>>, vector<1x1x2x96xbf16>
    %446 = vector.shape_cast %445 : vector<1x1x2x96xbf16> to vector<2x96xbf16>
    %447 = arith.truncf %405 : vector<2x32xf32> to vector<2x32xbf16>
    %cst_144 = arith.constant dense<0.000000e+00> : vector<2x96xf32>
    %448 = tpu.matmul %447, %4, %cst_144 {dimension_numbers = #tpu.dot_dimension_numbers<[1], [0], [0], [1], [0, 0, 1, 1], [], []>} : vector<2x32xbf16>, vector<32x96xbf16>, vector<2x96xf32> -> vector<2x96xf32>
    %449 = arith.extf %446 : vector<2x96xbf16> to vector<2x96xf32>
    %450 = vector.extract_strided_slice %449 {offsets = [0, 0], sizes = [2, 32], strides = [1, 1]} : vector<2x96xf32> to vector<2x32xf32>
    %451 = vector.extract_strided_slice %448 {offsets = [0, 0], sizes = [2, 32], strides = [1, 1]} : vector<2x96xf32> to vector<2x32xf32>
    %452 = arith.addf %450, %451 : vector<2x32xf32>
    %453 = arith.negf %452 : vector<2x32xf32>
    %454 = math.exp %453 : vector<2x32xf32>
    %cst_145 = arith.constant 1.000000e+00 : f32
    %455 = vector.broadcast %cst_145 : f32 to vector<2x32xf32>
    %456 = arith.addf %455, %454 : vector<2x32xf32>
    %457 = arith.divf %455, %456 : vector<2x32xf32>
    %458 = vector.extract_strided_slice %449 {offsets = [0, 32], sizes = [2, 32], strides = [1, 1]} : vector<2x96xf32> to vector<2x32xf32>
    %459 = vector.extract_strided_slice %448 {offsets = [0, 32], sizes = [2, 32], strides = [1, 1]} : vector<2x96xf32> to vector<2x32xf32>
    %460 = arith.addf %458, %459 : vector<2x32xf32>
    %461 = arith.negf %460 : vector<2x32xf32>
    %462 = math.exp %461 : vector<2x32xf32>
    %cst_146 = arith.constant 1.000000e+00 : f32
    %463 = vector.broadcast %cst_146 : f32 to vector<2x32xf32>
    %464 = arith.addf %463, %462 : vector<2x32xf32>
    %465 = arith.divf %463, %464 : vector<2x32xf32>
    %466 = vector.extract_strided_slice %449 {offsets = [0, 64], sizes = [2, 32], strides = [1, 1]} : vector<2x96xf32> to vector<2x32xf32>
    %467 = vector.extract_strided_slice %448 {offsets = [0, 64], sizes = [2, 32], strides = [1, 1]} : vector<2x96xf32> to vector<2x32xf32>
    %468 = vector.broadcast %8 : vector<1x32xf32> to vector<2x32xf32>
    %469 = arith.addf %467, %468 : vector<2x32xf32>
    %470 = arith.mulf %457, %469 : vector<2x32xf32>
    %471 = arith.addf %466, %470 : vector<2x32xf32>
    %472 = math.tanh %471 : vector<2x32xf32>
    %cst_147 = arith.constant 1.000000e+00 : f32
    %473 = vector.broadcast %cst_147 : f32 to vector<2x32xf32>
    %474 = arith.subf %473, %465 : vector<2x32xf32>
    %475 = arith.mulf %474, %472 : vector<2x32xf32>
    %476 = arith.mulf %465, %405 : vector<2x32xf32>
    %477 = arith.addf %475, %476 : vector<2x32xf32>
    %c0_148 = arith.constant 0 : index
    %c6_149 = arith.constant 6 : index
    %c0_150 = arith.constant 0 : index
    %478 = vector.load %arg5[%c0_148, %c6_149, %c0_150] : memref<2x8x32xf32, #tpu.memory_space<vmem>>, vector<2x1x32xf32>
    %479 = vector.shape_cast %478 : vector<2x1x32xf32> to vector<2x32xf32>
    %480 = vector.shape_cast %477 : vector<2x32xf32> to vector<2x1x32xf32>
    tpu.vector_store %arg5[%c0_148, %c6_149, %c0_150], %480 {strides = array<i32>} : memref<2x8x32xf32, #tpu.memory_space<vmem>>, vector<2x1x32xf32>,
    %c0_151 = arith.constant 0 : index
    %c1_152 = arith.constant 1 : index
    %c0_153 = arith.constant 0 : index
    %c0_154 = arith.constant 0 : index
    %481 = vector.load %arg2[%c0_151, %c1_152, %c0_153, %c0_154] : memref<1x8x2x96xbf16, #tpu.memory_space<vmem>>, vector<1x1x2x96xbf16>
    %482 = vector.shape_cast %481 : vector<1x1x2x96xbf16> to vector<2x96xbf16>
    %483 = arith.truncf %441 : vector<2x32xf32> to vector<2x32xbf16>
    %cst_155 = arith.constant dense<0.000000e+00> : vector<2x96xf32>
    %484 = tpu.matmul %483, %6, %cst_155 {dimension_numbers = #tpu.dot_dimension_numbers<[1], [0], [0], [1], [0, 0, 1, 1], [], []>} : vector<2x32xbf16>, vector<32x96xbf16>, vector<2x96xf32> -> vector<2x96xf32>
    %485 = arith.extf %482 : vector<2x96xbf16> to vector<2x96xf32>
    %486 = vector.extract_strided_slice %485 {offsets = [0, 0], sizes = [2, 32], strides = [1, 1]} : vector<2x96xf32> to vector<2x32xf32>
    %487 = vector.extract_strided_slice %484 {offsets = [0, 0], sizes = [2, 32], strides = [1, 1]} : vector<2x96xf32> to vector<2x32xf32>
    %488 = arith.addf %486, %487 : vector<2x32xf32>
    %489 = arith.negf %488 : vector<2x32xf32>
    %490 = math.exp %489 : vector<2x32xf32>
    %cst_156 = arith.constant 1.000000e+00 : f32
    %491 = vector.broadcast %cst_156 : f32 to vector<2x32xf32>
    %492 = arith.addf %491, %490 : vector<2x32xf32>
    %493 = arith.divf %491, %492 : vector<2x32xf32>
    %494 = vector.extract_strided_slice %485 {offsets = [0, 32], sizes = [2, 32], strides = [1, 1]} : vector<2x96xf32> to vector<2x32xf32>
    %495 = vector.extract_strided_slice %484 {offsets = [0, 32], sizes = [2, 32], strides = [1, 1]} : vector<2x96xf32> to vector<2x32xf32>
    %496 = arith.addf %494, %495 : vector<2x32xf32>
    %497 = arith.negf %496 : vector<2x32xf32>
    %498 = math.exp %497 : vector<2x32xf32>
    %cst_157 = arith.constant 1.000000e+00 : f32
    %499 = vector.broadcast %cst_157 : f32 to vector<2x32xf32>
    %500 = arith.addf %499, %498 : vector<2x32xf32>
    %501 = arith.divf %499, %500 : vector<2x32xf32>
    %502 = vector.extract_strided_slice %485 {offsets = [0, 64], sizes = [2, 32], strides = [1, 1]} : vector<2x96xf32> to vector<2x32xf32>
    %503 = vector.extract_strided_slice %484 {offsets = [0, 64], sizes = [2, 32], strides = [1, 1]} : vector<2x96xf32> to vector<2x32xf32>
    %504 = vector.broadcast %10 : vector<1x32xf32> to vector<2x32xf32>
    %505 = arith.addf %503, %504 : vector<2x32xf32>
    %506 = arith.mulf %493, %505 : vector<2x32xf32>
    %507 = arith.addf %502, %506 : vector<2x32xf32>
    %508 = math.tanh %507 : vector<2x32xf32>
    %cst_158 = arith.constant 1.000000e+00 : f32
    %509 = vector.broadcast %cst_158 : f32 to vector<2x32xf32>
    %510 = arith.subf %509, %501 : vector<2x32xf32>
    %511 = arith.mulf %510, %508 : vector<2x32xf32>
    %512 = arith.mulf %501, %441 : vector<2x32xf32>
    %513 = arith.addf %511, %512 : vector<2x32xf32>
    %c0_159 = arith.constant 0 : index
    %c1_160 = arith.constant 1 : index
    %c0_161 = arith.constant 0 : index
    %514 = vector.load %arg6[%c0_159, %c1_160, %c0_161] : memref<2x8x32xf32, #tpu.memory_space<vmem>>, vector<2x1x32xf32>
    %515 = vector.shape_cast %514 : vector<2x1x32xf32> to vector<2x32xf32>
    %516 = vector.shape_cast %513 : vector<2x32xf32> to vector<2x1x32xf32>
    tpu.vector_store %arg6[%c0_159, %c1_160, %c0_161], %516 {strides = array<i32>} : memref<2x8x32xf32, #tpu.memory_space<vmem>>, vector<2x1x32xf32>,
    %c0_162 = arith.constant 0 : index
    %c7_163 = arith.constant 7 : index
    %c0_164 = arith.constant 0 : index
    %c0_165 = arith.constant 0 : index
    %517 = vector.load %arg1[%c0_162, %c7_163, %c0_164, %c0_165] : memref<1x8x2x96xbf16, #tpu.memory_space<vmem>>, vector<1x1x2x96xbf16>
    %518 = vector.shape_cast %517 : vector<1x1x2x96xbf16> to vector<2x96xbf16>
    %519 = arith.truncf %477 : vector<2x32xf32> to vector<2x32xbf16>
    %cst_166 = arith.constant dense<0.000000e+00> : vector<2x96xf32>
    %520 = tpu.matmul %519, %4, %cst_166 {dimension_numbers = #tpu.dot_dimension_numbers<[1], [0], [0], [1], [0, 0, 1, 1], [], []>} : vector<2x32xbf16>, vector<32x96xbf16>, vector<2x96xf32> -> vector<2x96xf32>
    %521 = arith.extf %518 : vector<2x96xbf16> to vector<2x96xf32>
    %522 = vector.extract_strided_slice %521 {offsets = [0, 0], sizes = [2, 32], strides = [1, 1]} : vector<2x96xf32> to vector<2x32xf32>
    %523 = vector.extract_strided_slice %520 {offsets = [0, 0], sizes = [2, 32], strides = [1, 1]} : vector<2x96xf32> to vector<2x32xf32>
    %524 = arith.addf %522, %523 : vector<2x32xf32>
    %525 = arith.negf %524 : vector<2x32xf32>
    %526 = math.exp %525 : vector<2x32xf32>
    %cst_167 = arith.constant 1.000000e+00 : f32
    %527 = vector.broadcast %cst_167 : f32 to vector<2x32xf32>
    %528 = arith.addf %527, %526 : vector<2x32xf32>
    %529 = arith.divf %527, %528 : vector<2x32xf32>
    %530 = vector.extract_strided_slice %521 {offsets = [0, 32], sizes = [2, 32], strides = [1, 1]} : vector<2x96xf32> to vector<2x32xf32>
    %531 = vector.extract_strided_slice %520 {offsets = [0, 32], sizes = [2, 32], strides = [1, 1]} : vector<2x96xf32> to vector<2x32xf32>
    %532 = arith.addf %530, %531 : vector<2x32xf32>
    %533 = arith.negf %532 : vector<2x32xf32>
    %534 = math.exp %533 : vector<2x32xf32>
    %cst_168 = arith.constant 1.000000e+00 : f32
    %535 = vector.broadcast %cst_168 : f32 to vector<2x32xf32>
    %536 = arith.addf %535, %534 : vector<2x32xf32>
    %537 = arith.divf %535, %536 : vector<2x32xf32>
    %538 = vector.extract_strided_slice %521 {offsets = [0, 64], sizes = [2, 32], strides = [1, 1]} : vector<2x96xf32> to vector<2x32xf32>
    %539 = vector.extract_strided_slice %520 {offsets = [0, 64], sizes = [2, 32], strides = [1, 1]} : vector<2x96xf32> to vector<2x32xf32>
    %540 = vector.broadcast %8 : vector<1x32xf32> to vector<2x32xf32>
    %541 = arith.addf %539, %540 : vector<2x32xf32>
    %542 = arith.mulf %529, %541 : vector<2x32xf32>
    %543 = arith.addf %538, %542 : vector<2x32xf32>
    %544 = math.tanh %543 : vector<2x32xf32>
    %cst_169 = arith.constant 1.000000e+00 : f32
    %545 = vector.broadcast %cst_169 : f32 to vector<2x32xf32>
    %546 = arith.subf %545, %537 : vector<2x32xf32>
    %547 = arith.mulf %546, %544 : vector<2x32xf32>
    %548 = arith.mulf %537, %477 : vector<2x32xf32>
    %549 = arith.addf %547, %548 : vector<2x32xf32>
    %c0_170 = arith.constant 0 : index
    %c7_171 = arith.constant 7 : index
    %c0_172 = arith.constant 0 : index
    %550 = vector.load %arg5[%c0_170, %c7_171, %c0_172] : memref<2x8x32xf32, #tpu.memory_space<vmem>>, vector<2x1x32xf32>
    %551 = vector.shape_cast %550 : vector<2x1x32xf32> to vector<2x32xf32>
    %552 = vector.shape_cast %549 : vector<2x32xf32> to vector<2x1x32xf32>
    tpu.vector_store %arg5[%c0_170, %c7_171, %c0_172], %552 {strides = array<i32>} : memref<2x8x32xf32, #tpu.memory_space<vmem>>, vector<2x1x32xf32>,
    %c0_173 = arith.constant 0 : index
    %c0_174 = arith.constant 0 : index
    %c0_175 = arith.constant 0 : index
    %c0_176 = arith.constant 0 : index
    %553 = vector.load %arg2[%c0_173, %c0_174, %c0_175, %c0_176] : memref<1x8x2x96xbf16, #tpu.memory_space<vmem>>, vector<1x1x2x96xbf16>
    %554 = vector.shape_cast %553 : vector<1x1x2x96xbf16> to vector<2x96xbf16>
    %555 = arith.truncf %513 : vector<2x32xf32> to vector<2x32xbf16>
    %cst_177 = arith.constant dense<0.000000e+00> : vector<2x96xf32>
    %556 = tpu.matmul %555, %6, %cst_177 {dimension_numbers = #tpu.dot_dimension_numbers<[1], [0], [0], [1], [0, 0, 1, 1], [], []>} : vector<2x32xbf16>, vector<32x96xbf16>, vector<2x96xf32> -> vector<2x96xf32>
    %557 = arith.extf %554 : vector<2x96xbf16> to vector<2x96xf32>
    %558 = vector.extract_strided_slice %557 {offsets = [0, 0], sizes = [2, 32], strides = [1, 1]} : vector<2x96xf32> to vector<2x32xf32>
    %559 = vector.extract_strided_slice %556 {offsets = [0, 0], sizes = [2, 32], strides = [1, 1]} : vector<2x96xf32> to vector<2x32xf32>
    %560 = arith.addf %558, %559 : vector<2x32xf32>
    %561 = arith.negf %560 : vector<2x32xf32>
    %562 = math.exp %561 : vector<2x32xf32>
    %cst_178 = arith.constant 1.000000e+00 : f32
    %563 = vector.broadcast %cst_178 : f32 to vector<2x32xf32>
    %564 = arith.addf %563, %562 : vector<2x32xf32>
    %565 = arith.divf %563, %564 : vector<2x32xf32>
    %566 = vector.extract_strided_slice %557 {offsets = [0, 32], sizes = [2, 32], strides = [1, 1]} : vector<2x96xf32> to vector<2x32xf32>
    %567 = vector.extract_strided_slice %556 {offsets = [0, 32], sizes = [2, 32], strides = [1, 1]} : vector<2x96xf32> to vector<2x32xf32>
    %568 = arith.addf %566, %567 : vector<2x32xf32>
    %569 = arith.negf %568 : vector<2x32xf32>
    %570 = math.exp %569 : vector<2x32xf32>
    %cst_179 = arith.constant 1.000000e+00 : f32
    %571 = vector.broadcast %cst_179 : f32 to vector<2x32xf32>
    %572 = arith.addf %571, %570 : vector<2x32xf32>
    %573 = arith.divf %571, %572 : vector<2x32xf32>
    %574 = vector.extract_strided_slice %557 {offsets = [0, 64], sizes = [2, 32], strides = [1, 1]} : vector<2x96xf32> to vector<2x32xf32>
    %575 = vector.extract_strided_slice %556 {offsets = [0, 64], sizes = [2, 32], strides = [1, 1]} : vector<2x96xf32> to vector<2x32xf32>
    %576 = vector.broadcast %10 : vector<1x32xf32> to vector<2x32xf32>
    %577 = arith.addf %575, %576 : vector<2x32xf32>
    %578 = arith.mulf %565, %577 : vector<2x32xf32>
    %579 = arith.addf %574, %578 : vector<2x32xf32>
    %580 = math.tanh %579 : vector<2x32xf32>
    %cst_180 = arith.constant 1.000000e+00 : f32
    %581 = vector.broadcast %cst_180 : f32 to vector<2x32xf32>
    %582 = arith.subf %581, %573 : vector<2x32xf32>
    %583 = arith.mulf %582, %580 : vector<2x32xf32>
    %584 = arith.mulf %573, %513 : vector<2x32xf32>
    %585 = arith.addf %583, %584 : vector<2x32xf32>
    %c0_181 = arith.constant 0 : index
    %c0_182 = arith.constant 0 : index
    %c0_183 = arith.constant 0 : index
    %586 = vector.load %arg6[%c0_181, %c0_182, %c0_183] : memref<2x8x32xf32, #tpu.memory_space<vmem>>, vector<2x1x32xf32>
    %587 = vector.shape_cast %586 : vector<2x1x32xf32> to vector<2x32xf32>
    %588 = vector.shape_cast %585 : vector<2x32xf32> to vector<2x1x32xf32>
    tpu.vector_store %arg6[%c0_181, %c0_182, %c0_183], %588 {strides = array<i32>} : memref<2x8x32xf32, #tpu.memory_space<vmem>>, vector<2x1x32xf32>,
    %c0_184 = arith.constant 0 : index
    %c0_185 = arith.constant 0 : index
    %589 = vector.load %arg7[%c0_184, %c0_185] : memref<2x32xf32, #tpu.memory_space<vmem>>, vector<2x32xf32>
    tpu.vector_store %arg7[%c0_184, %c0_185], %549 {strides = array<i32>} : memref<2x32xf32, #tpu.memory_space<vmem>>, vector<2x32xf32>,
    %c0_186 = arith.constant 0 : index
    %c0_187 = arith.constant 0 : index
    %590 = vector.load %arg8[%c0_186, %c0_187] : memref<2x32xf32, #tpu.memory_space<vmem>>, vector<2x32xf32>
    tpu.vector_store %arg8[%c0_186, %c0_187], %585 {strides = array<i32>} : memref<2x32xf32, #tpu.memory_space<vmem>>, vector<2x32xf32>,
    return
  }
  func.func @transform_0(%arg0: i32) -> (i32, i32, i32, i32) {
    %c0_i32 = arith.constant 0 : i32
    %c0_i32_0 = arith.constant 0 : i32
    %c0_i32_1 = arith.constant 0 : i32
    %c0_i32_2 = arith.constant 0 : i32
    return %c0_i32, %arg0, %c0_i32_0, %c0_i32_1 : i32, i32, i32, i32
  }
  func.func @transform_1(%arg0: i32) -> (i32, i32, i32, i32) {
    %c0_i32 = arith.constant 0 : i32
    %0 = arith.subi %c0_i32, %arg0 : i32
    %c1_i32 = arith.constant 1 : i32
    %c0_i32_0 = arith.constant 0 : i32
    %c0_i32_1 = arith.constant 0 : i32
    %c0_i32_2 = arith.constant 0 : i32
    return %c1_i32, %0, %c0_i32_0, %c0_i32_1 : i32, i32, i32, i32
  }
  func.func @transform_2(%arg0: i32) -> (i32, i32, i32) {
    %c0_i32 = arith.constant 0 : i32
    %c0_i32_0 = arith.constant 0 : i32
    %c0_i32_1 = arith.constant 0 : i32
    %c0_i32_2 = arith.constant 0 : i32
    return %c0_i32, %c0_i32_0, %c0_i32_1 : i32, i32, i32
  }
  func.func @transform_3(%arg0: i32) -> (i32, i32, i32) {
    %c0_i32 = arith.constant 0 : i32
    %c0_i32_0 = arith.constant 0 : i32
    %c0_i32_1 = arith.constant 0 : i32
    %c0_i32_2 = arith.constant 0 : i32
    return %c0_i32, %c0_i32_0, %c0_i32_1 : i32, i32, i32
  }
  func.func @transform_4(%arg0: i32) -> (i32, i32, i32) {
    %c0_i32 = arith.constant 0 : i32
    %c0_i32_0 = arith.constant 0 : i32
    %c0_i32_1 = arith.constant 0 : i32
    return %c0_i32, %arg0, %c0_i32_0 : i32, i32, i32
  }
  func.func @transform_5(%arg0: i32) -> (i32, i32, i32) {
    %c0_i32 = arith.constant 0 : i32
    %0 = arith.subi %c0_i32, %arg0 : i32
    %c0_i32_0 = arith.constant 0 : i32
    %c0_i32_1 = arith.constant 0 : i32
    %c0_i32_2 = arith.constant 0 : i32
    return %c0_i32_0, %0, %c0_i32_1 : i32, i32, i32
  }
}

module attributes {stable_mosaic.version = 11 : i64} {
  func.func @_sum_stats_kernel(%arg0: i32, %arg1: memref<2x8x32xf32, #tpu.memory_space<vmem>>, %arg2: memref<2x8x32xf32, #tpu.memory_space<vmem>>, %arg3: memref<1x1x32xf32, #tpu.memory_space<vmem>>, %arg4: memref<1x1x32xf32, #tpu.memory_space<vmem>>) attributes {dimension_semantics = [#tpu.dimension_semantics<arbitrary>], iteration_bounds = array<i64: 1>, scalar_prefetch = 0 : i64, scratch_operands = 0 : i64, tpu.core_type = #tpu.core_type<tc>, window_params = [{transform_indices = @transform_0, window_bounds = array<i64: 2, 8, 32>}, {transform_indices = @transform_1, window_bounds = array<i64: 2, 8, 32>}, {pipeline_mode = #tpu.pipeline_mode<synchronous>, transform_indices = @transform_2, window_bounds = array<i64: 1, 1, 32>}, {pipeline_mode = #tpu.pipeline_mode<synchronous>, transform_indices = @transform_3, window_bounds = array<i64: 1, 1, 32>}]} {
    %c0_i32 = arith.constant 0 : i32
    %0 = arith.cmpi eq, %arg0, %c0_i32 : i32
    %1 = arith.extui %0 : i1 to i32
    %c0_i32_0 = arith.constant 0 : i32
    %2 = arith.cmpi ne, %1, %c0_i32_0 : i32
    scf.if %2 {
      %cst_19 = arith.constant 0.000000e+00 : f32
      %17 = vector.broadcast %cst_19 : f32 to vector<1x1x32xf32>
      %c0_20 = arith.constant 0 : index
      %c0_21 = arith.constant 0 : index
      %c0_22 = arith.constant 0 : index
      %18 = vector.load %arg3[%c0_20, %c0_21, %c0_22] : memref<1x1x32xf32, #tpu.memory_space<vmem>>, vector<1x1x32xf32>
      tpu.vector_store %arg3[%c0_20, %c0_21, %c0_22], %17 {strides = array<i32>} : memref<1x1x32xf32, #tpu.memory_space<vmem>>, vector<1x1x32xf32>,
      %cst_23 = arith.constant 0.000000e+00 : f32
      %19 = vector.broadcast %cst_23 : f32 to vector<1x1x32xf32>
      %c0_24 = arith.constant 0 : index
      %c0_25 = arith.constant 0 : index
      %c0_26 = arith.constant 0 : index
      %20 = vector.load %arg4[%c0_24, %c0_25, %c0_26] : memref<1x1x32xf32, #tpu.memory_space<vmem>>, vector<1x1x32xf32>
      tpu.vector_store %arg4[%c0_24, %c0_25, %c0_26], %19 {strides = array<i32>} : memref<1x1x32xf32, #tpu.memory_space<vmem>>, vector<1x1x32xf32>,
    } else {
    }
    %c0 = arith.constant 0 : index
    %c0_1 = arith.constant 0 : index
    %c0_2 = arith.constant 0 : index
    %3 = vector.load %arg1[%c0, %c0_1, %c0_2] : memref<2x8x32xf32, #tpu.memory_space<vmem>>, vector<2x8x32xf32>
    %c0_3 = arith.constant 0 : index
    %c0_4 = arith.constant 0 : index
    %c0_5 = arith.constant 0 : index
    %4 = vector.load %arg2[%c0_3, %c0_4, %c0_5] : memref<2x8x32xf32, #tpu.memory_space<vmem>>, vector<2x8x32xf32>
    %5 = arith.addf %3, %4 : vector<2x8x32xf32>
    %c0_6 = arith.constant 0 : index
    %c0_7 = arith.constant 0 : index
    %c0_8 = arith.constant 0 : index
    %6 = vector.load %arg3[%c0_6, %c0_7, %c0_8] : memref<1x1x32xf32, #tpu.memory_space<vmem>>, vector<1x1x32xf32>
    %cst = arith.constant dense<0.000000e+00> : vector<32xf32>
    %7 = vector.multi_reduction <add>, %5, %cst [0, 1] : vector<2x8x32xf32> to vector<32xf32>
    %8 = vector.shape_cast %7 : vector<32xf32> to vector<1x1x32xf32>
    %9 = arith.addf %6, %8 : vector<1x1x32xf32>
    %c0_9 = arith.constant 0 : index
    %c0_10 = arith.constant 0 : index
    %c0_11 = arith.constant 0 : index
    %10 = vector.load %arg3[%c0_9, %c0_10, %c0_11] : memref<1x1x32xf32, #tpu.memory_space<vmem>>, vector<1x1x32xf32>
    tpu.vector_store %arg3[%c0_9, %c0_10, %c0_11], %9 {strides = array<i32>} : memref<1x1x32xf32, #tpu.memory_space<vmem>>, vector<1x1x32xf32>,
    %c0_12 = arith.constant 0 : index
    %c0_13 = arith.constant 0 : index
    %c0_14 = arith.constant 0 : index
    %11 = vector.load %arg4[%c0_12, %c0_13, %c0_14] : memref<1x1x32xf32, #tpu.memory_space<vmem>>, vector<1x1x32xf32>
    %12 = arith.mulf %5, %5 : vector<2x8x32xf32>
    %cst_15 = arith.constant dense<0.000000e+00> : vector<32xf32>
    %13 = vector.multi_reduction <add>, %12, %cst_15 [0, 1] : vector<2x8x32xf32> to vector<32xf32>
    %14 = vector.shape_cast %13 : vector<32xf32> to vector<1x1x32xf32>
    %15 = arith.addf %11, %14 : vector<1x1x32xf32>
    %c0_16 = arith.constant 0 : index
    %c0_17 = arith.constant 0 : index
    %c0_18 = arith.constant 0 : index
    %16 = vector.load %arg4[%c0_16, %c0_17, %c0_18] : memref<1x1x32xf32, #tpu.memory_space<vmem>>, vector<1x1x32xf32>
    tpu.vector_store %arg4[%c0_16, %c0_17, %c0_18], %15 {strides = array<i32>} : memref<1x1x32xf32, #tpu.memory_space<vmem>>, vector<1x1x32xf32>,
    return
  }
  func.func @transform_0(%arg0: i32) -> (i32, i32, i32) {
    %c0_i32 = arith.constant 0 : i32
    %c0_i32_0 = arith.constant 0 : i32
    %c0_i32_1 = arith.constant 0 : i32
    return %c0_i32, %arg0, %c0_i32_0 : i32, i32, i32
  }
  func.func @transform_1(%arg0: i32) -> (i32, i32, i32) {
    %c0_i32 = arith.constant 0 : i32
    %c0_i32_0 = arith.constant 0 : i32
    %c0_i32_1 = arith.constant 0 : i32
    return %c0_i32, %arg0, %c0_i32_0 : i32, i32, i32
  }
  func.func @transform_2(%arg0: i32) -> (i32, i32, i32) {
    %c0_i32 = arith.constant 0 : i32
    %c0_i32_0 = arith.constant 0 : i32
    %c0_i32_1 = arith.constant 0 : i32
    %c0_i32_2 = arith.constant 0 : i32
    return %c0_i32, %c0_i32_0, %c0_i32_1 : i32, i32, i32
  }
  func.func @transform_3(%arg0: i32) -> (i32, i32, i32) {
    %c0_i32 = arith.constant 0 : i32
    %c0_i32_0 = arith.constant 0 : i32
    %c0_i32_1 = arith.constant 0 : i32
    %c0_i32_2 = arith.constant 0 : i32
    return %c0_i32, %c0_i32_0, %c0_i32_1 : i32, i32, i32
  }
}

module attributes {stable_mosaic.version = 11 : i64} {
  func.func @_bn_apply_kernel(%arg0: i32, %arg1: i32, %arg2: memref<1x8x32xf32, #tpu.memory_space<vmem>>, %arg3: memref<1x8x32xf32, #tpu.memory_space<vmem>>, %arg4: memref<1x32xf32, #tpu.memory_space<vmem>>, %arg5: memref<1x32xf32, #tpu.memory_space<vmem>>, %arg6: memref<32x32xf32, #tpu.memory_space<vmem>>, %arg7: memref<1x32x8xf32, #tpu.memory_space<vmem>>) attributes {dimension_semantics = [#tpu.dimension_semantics<parallel>, #tpu.dimension_semantics<parallel>], iteration_bounds = array<i64: 2, 1>, scalar_prefetch = 0 : i64, scratch_operands = 0 : i64, tpu.core_type = #tpu.core_type<tc>, window_params = [{transform_indices = @transform_0, window_bounds = array<i64: 1, 8, 32>}, {transform_indices = @transform_1, window_bounds = array<i64: 1, 8, 32>}, {pipeline_mode = #tpu.pipeline_mode<synchronous>, transform_indices = @transform_2, window_bounds = array<i64: 1, 32>}, {pipeline_mode = #tpu.pipeline_mode<synchronous>, transform_indices = @transform_3, window_bounds = array<i64: 1, 32>}, {pipeline_mode = #tpu.pipeline_mode<synchronous>, transform_indices = @transform_4, window_bounds = array<i64: 32, 32>}, {transform_indices = @transform_5, window_bounds = array<i64: 1, 32, 8>}]} {
    %c0 = arith.constant 0 : index
    %c0_0 = arith.constant 0 : index
    %c0_1 = arith.constant 0 : index
    %0 = vector.load %arg2[%c0, %c0_0, %c0_1] : memref<1x8x32xf32, #tpu.memory_space<vmem>>, vector<1x8x32xf32>
    %1 = vector.shape_cast %0 : vector<1x8x32xf32> to vector<8x32xf32>
    %c0_2 = arith.constant 0 : index
    %c0_3 = arith.constant 0 : index
    %c0_4 = arith.constant 0 : index
    %2 = vector.load %arg3[%c0_2, %c0_3, %c0_4] : memref<1x8x32xf32, #tpu.memory_space<vmem>>, vector<1x8x32xf32>
    %3 = vector.shape_cast %2 : vector<1x8x32xf32> to vector<8x32xf32>
    %4 = arith.addf %1, %3 : vector<8x32xf32>
    %c0_5 = arith.constant 0 : index
    %c0_6 = arith.constant 0 : index
    %5 = vector.load %arg4[%c0_5, %c0_6] : memref<1x32xf32, #tpu.memory_space<vmem>>, vector<1x32xf32>
    %6 = vector.broadcast %5 : vector<1x32xf32> to vector<8x32xf32>
    %7 = arith.mulf %4, %6 : vector<8x32xf32>
    %c0_7 = arith.constant 0 : index
    %c0_8 = arith.constant 0 : index
    %8 = vector.load %arg5[%c0_7, %c0_8] : memref<1x32xf32, #tpu.memory_space<vmem>>, vector<1x32xf32>
    %9 = vector.broadcast %8 : vector<1x32xf32> to vector<8x32xf32>
    %10 = arith.addf %7, %9 : vector<8x32xf32>
    %c0_9 = arith.constant 0 : index
    %c0_10 = arith.constant 0 : index
    %11 = vector.load %arg6[%c0_9, %c0_10] : memref<32x32xf32, #tpu.memory_space<vmem>>, vector<32x32xf32>
    %cst = arith.constant dense<0.000000e+00> : vector<32x8xf32>
    %12 = tpu.matmul %11, %10, %cst {dimension_numbers = #tpu.dot_dimension_numbers<[1], [1], [0], [0], [0, 0, 1, 0], [], []>} : vector<32x32xf32>, vector<8x32xf32>, vector<32x8xf32> -> vector<32x8xf32>
    %c0_11 = arith.constant 0 : index
    %c0_12 = arith.constant 0 : index
    %c0_13 = arith.constant 0 : index
    %13 = vector.load %arg7[%c0_11, %c0_12, %c0_13] : memref<1x32x8xf32, #tpu.memory_space<vmem>>, vector<1x32x8xf32>
    %14 = vector.shape_cast %13 : vector<1x32x8xf32> to vector<32x8xf32>
    %15 = vector.shape_cast %12 : vector<32x8xf32> to vector<1x32x8xf32>
    tpu.vector_store %arg7[%c0_11, %c0_12, %c0_13], %15 {strides = array<i32>} : memref<1x32x8xf32, #tpu.memory_space<vmem>>, vector<1x32x8xf32>,
    return
  }
  func.func @transform_0(%arg0: i32, %arg1: i32) -> (i32, i32, i32) {
    %c0_i32 = arith.constant 0 : i32
    %c0_i32_0 = arith.constant 0 : i32
    return %arg0, %arg1, %c0_i32 : i32, i32, i32
  }
  func.func @transform_1(%arg0: i32, %arg1: i32) -> (i32, i32, i32) {
    %c0_i32 = arith.constant 0 : i32
    %c0_i32_0 = arith.constant 0 : i32
    return %arg0, %arg1, %c0_i32 : i32, i32, i32
  }
  func.func @transform_2(%arg0: i32, %arg1: i32) -> (i32, i32) {
    %c0_i32 = arith.constant 0 : i32
    %c0_i32_0 = arith.constant 0 : i32
    %c0_i32_1 = arith.constant 0 : i32
    return %c0_i32, %c0_i32_0 : i32, i32
  }
  func.func @transform_3(%arg0: i32, %arg1: i32) -> (i32, i32) {
    %c0_i32 = arith.constant 0 : i32
    %c0_i32_0 = arith.constant 0 : i32
    %c0_i32_1 = arith.constant 0 : i32
    return %c0_i32, %c0_i32_0 : i32, i32
  }
  func.func @transform_4(%arg0: i32, %arg1: i32) -> (i32, i32) {
    %c0_i32 = arith.constant 0 : i32
    %c0_i32_0 = arith.constant 0 : i32
    %c0_i32_1 = arith.constant 0 : i32
    return %c0_i32, %c0_i32_0 : i32, i32
  }
  func.func @transform_5(%arg0: i32, %arg1: i32) -> (i32, i32, i32) {
    %c0_i32 = arith.constant 0 : i32
    %c0_i32_0 = arith.constant 0 : i32
    return %arg0, %c0_i32, %arg1 : i32, i32, i32
  }
}

</mosaic_0001>

<bundles_post_ra>
// kernel: batch_rnn_forward.4
= control target key start
LH: loop header
LB: loop body
LE: loop exit
PB: predicated region body
PF: predicated region fallthrough
CT: control target
= control target key end

     0   :  { %v148_v1 = vmov 0   ;;  %vm46_vm0 = vcmask 130048   ;;  %v21_v4 = vlaneseq  ;;  %vm101_vm1 = vcmask 781312   ;;  %s198_s1 = inlined_call_operand.vmem [shape: bf16[16,192], index: 1, kind: input, shape index: {}]   ;;  %s199_s0 = inlined_call_operand.vmem [shape: bf16[16,16], index: 0, kind: input, shape index: {}]   ;;  %s200_s2 = inlined_call_operand.vmem [shape: f32[1,192], index: 2, kind: input, shape index: {}]   ;;  %s201_s3 = inlined_call_operand.vmem [shape: bf16[2,16,96], index: 3, kind: output, shape index: {}]  }
   0x1   :  { %v144_v0 = vld [vmem:[%s198_s1 + $0x4] ss:$8 sps:$4 sm:$0xff]   ;;  %82 = vmatprep.mubr.bf16.mxu0 %v148_v1  ;;  %v146_v2 = vld [vmem:[%s198_s1] ss:$8 sps:$4 sm:$0xff]   ;;  %vm116_vm2 = vcmask 261120  }
   0x2   :  { %64 = vmatprep.subr.bf16.mxu0 %v144_v0  ;;  %v147_v3 = vld [vmem:[%s199_s0] sm:$0xff]   ;;  %v22_v5 = vshrl.u32 %v21_v4, 7 }
   0x3   :  { %65 = vmatpush1.bf16.msra.mxu0 %v146_v2  ;;  %v19_v7 = vld [vmem:[%s200_s2] sm:$0x3]  ;;  %s149_s2 = smov 32  }
   0x4   :  { %v23_v6 = vsub.s32 0, %v22_v5  ;;  %v27_v8 = vsub.s32 1, %v22_v5 }
   0x6   :  { %131 = vmatmul.mubr.msk.bf16.vlgmr.msra.gmra.mxu0 %vm46_vm0, %v147_v3  ;;  %v24_v9 = vrot.slane %v19_v7, %v23_v6  ;;  %v28_v10 = vrot.slane %v19_v7, %v27_v8 }
  0xc6   :  { %v84_v11 = vpop.f32.mrf.mxu0 }
  0xc7   :  { %v85_v12 = vadd.f32 %v84_v11, %v24_v9 }
  0xc8   :  { %v86_v13 = vpop.f32.mrf.mxu0 }
  0xc9   :  { %v138_v14 = vpack.c.bf16 %v85_v12, %v85_v12  ;;  %v87_v15 = vadd.f32 %v86_v13, %v28_v10 }
  0xca   :  { %v88_v16 = vpop.f32.mrf.mxu0 }
  0xcb   :  { %102 = vst.msk [vmem:[%s201_s3] sm:$0xf] %vm101_vm1, %v138_v14  ;;  %v89_v17 = vadd.f32 %v88_v16, %v24_v9  ;;  %v140_v18 = vpack.c.bf16 %v87_v15, %v85_v12 }
  0xcc   :  { %v90_v19 = vpop.f32.mrf.mxu0 }
  0xcd   :  { %v139_v20 = vpack.c.bf16 %v89_v17, %v89_v17  ;;  %v91_v21 = vadd.f32 %v90_v19, %v28_v10  ;;  %110 = vrot.lane.b32.xlu0 %v140_v18, %s149_s2 }
  0xcf   :  { %103 = vst.msk [vmem:[%s201_s3 + $0x4] sm:$0xf] %vm101_vm1, %v139_v20  ;;  %v141_v22 = vpack.c.bf16 %v91_v21, %v89_v17 }
  0xd1   :  { %112 = vrot.lane.b32.xlu0 %v141_v22, %s149_s2 }
 0x13f   :  { %v111_v23 = vpop.permute.xlu0 %110 }
 0x140   :  { %v114_v24 = vrot.slane %v111_v23, 4 }
 0x142   :  { %v117_v25 = vsel %vm116_vm2, %v111_v23, %v114_v24 }
 0x143   :  { %136 = vst.msk [vmem:[%s201_s3 + $0x8] sm:$0xf] %vm101_vm1, %v117_v25  ;;  %v113_v26 = vpop.permute.xlu0 %112 }
 0x144   :  { %v115_v27 = vrot.slane %v113_v26, 4 }
 0x146   :  { %v118_v28 = vsel %vm116_vm2, %v113_v26, %v115_v27 }
 0x147   :  { %137 = vst.msk [vmem:[%s201_s3 + $0xc] sm:$0xf] %vm101_vm1, %v118_v28 }

// kernel: batch_rnn_forward.6
= control target key start
LH: loop header
LB: loop body
LE: loop exit
PB: predicated region body
PF: predicated region fallthrough
CT: control target
= control target key end

     0   :  { %vm17_vm0 = vcmask 253952   ;;  %v63_v0 = vmov 0.0   ;;  %vm27_vm1 = vcmask 261120   ;;  %s118_s0 = inlined_call_operand.vmem [shape: f32[2,8,32], index: 0, kind: input, shape index: {}]   ;;  %s119_s1 = inlined_call_operand.vmem [shape: f32[2,8,32], index: 1, kind: input, shape index: {}]   ;;  %s120_s2 = inlined_call_operand.vmem [shape: f32[1,1,32], index: 2, kind: output, shape index: {0}]   ;;  %s121_s3 = inlined_call_operand.vmem [shape: f32[1,1,32], index: 3, kind: output, shape index: {1}]  }
   0x1   :  { %18 = vst.msk [vmem:[%s120_s2] sm:$0x1] %vm17_vm0, %v63_v0  ;;  %v20_v1 = vld [vmem:[%s118_s0] sm:$0xff]  ;;  %v21_v2 = vld [vmem:[%s118_s0 + $0x8] sm:$0xff]  ;;  %19 = vst.msk [vmem:[%s121_s3] sm:$0x1] %vm17_vm0, %v63_v0 }
   0x2   :  { %v22_v3 = vld [vmem:[%s119_s1] sm:$0xff]  ;;  %v23_v4 = vld [vmem:[%s119_s1 + $0x8] sm:$0xff] }
   0x3   :  { %v24_v5 = vadd.f32 %v22_v3, %v20_v1  ;;  %v25_v6 = vadd.f32 %v23_v4, %v21_v2 }
   0x5   :  { %v28_v7 = vsel %vm27_vm1, %v24_v5, 0.0  ;;  %v41_v8 = vmul.f32 %v24_v5, %v24_v5  ;;  %v29_v9 = vsel %vm27_vm1, %v25_v6, 0.0  ;;  %v42_v10 = vmul.f32 %v25_v6, %v25_v6 }
   0x6   :  { %v30_v11 = vadd.f32 %v29_v9, %v28_v7 }
   0x7   :  { %v43_v12 = vsel %vm27_vm1, %v41_v8, 0.0  ;;  %v44_v13 = vsel %vm27_vm1, %v42_v10, 0.0 }
   0x8   :  { %v31_v14 = vrot.slane %v30_v11, 4  ;;  %v45_v15 = vadd.f32 %v44_v13, %v43_v12  ;;  %v26_v24 = vld [vmem:[%s120_s2] sm:$0x1] }
   0x9   :  { %v40_v27 = vld [vmem:[%s121_s3] sm:$0x1] }
   0xa   :  { %v32_v16 = vadd.f32 %v31_v14, %v30_v11  ;;  %v46_v17 = vrot.slane %v45_v15, 4 }
   0xc   :  { %v33_v18 = vrot.slane %v32_v16, 2  ;;  %v47_v19 = vadd.f32 %v46_v17, %v45_v15 }
   0xe   :  { %v34_v20 = vadd.f32 %v33_v18, %v32_v16  ;;  %v48_v21 = vrot.slane %v47_v19, 2 }
  0x10   :  { %v35_v22 = vrot.slane %v34_v20, 1  ;;  %v49_v23 = vadd.f32 %v48_v21, %v47_v19 }
  0x12   :  { %v36_v25 = vadd.f32 %v35_v22, %v34_v20  ;;  %v50_v26 = vrot.slane %v49_v23, 1 }
  0x14   :  { %v37_v28 = vadd.f32 %v36_v25, %v26_v24  ;;  %v51_v29 = vadd.f32 %v50_v26, %v49_v23 }
  0x16   :  { %39 = vst.msk [vmem:[%s120_s2] sm:$0x1] %vm17_vm0, %v37_v28  ;;  %v52_v30 = vadd.f32 %v51_v29, %v40_v27 }
  0x18   :  { %53 = vst.msk [vmem:[%s121_s3] sm:$0x1] %vm17_vm0, %v52_v30 }

// kernel: batch_rnn_forward.7
= control target key start
LH: loop header
LB: loop body
LE: loop exit
PB: predicated region body
PF: predicated region fallthrough
CT: control target
= control target key end

     0   :  { %s617_s18 = smov 0   ;;  %s619_s19 = smov 0   ;;  %s679_s0 = inlined_call_operand.vmem [shape: f32[2,8,32], index: 0, kind: input, shape index: {}]   ;;  %s680_s1 = inlined_call_operand.vmem [shape: f32[2,8,32], index: 1, kind: input, shape index: {}]   ;;  %s681_s2 = inlined_call_operand.vmem [shape: f32[1,32], index: 2, kind: input, shape index: {}]   ;;  %s682_s3 = inlined_call_operand.vmem [shape: f32[1,32], index: 3, kind: input, shape index: {}]   ;;  %s683_s4 = inlined_call_operand.vmem [shape: f32[32,32], index: 4, kind: input, shape index: {}]   ;;  %s684_s5 = inlined_call_operand.vmem [shape: f32[2,32,8], index: 5, kind: output, shape index: {}]  }
   0x1   :  { %s621_s20 = smov 0  }
   0x2 LB: > { %s27_s21 = sadd.s32 1, %s581_s19  ;;  %p509_p0 = scmp.ge.s32.totalorder %s585_s20, 1  ;;  %s585_s20 = sphi %s621_s20, %s15_s20   ;;  %s581_s19 = sphi %s619_s19, %s686_s19   ;;  %s577_s18 = sphi %s617_s18, %s685_s18  }
   0x3   : > { %p29_p1 = scmp.ge.s32.totalorder %s27_s21, 2  ;;  %p219_p2 = scmp.lt.s32.totalorder %s585_s20, 3 }
   0x5   : > { %s688_s21 = smov (%p29_p1, %s27_s21), 0  ;;  %p220_p3 = pnand %p509_p0, %p219_p2 }
   0x6   : > { %p259_p4 = scmp.lt.s32.totalorder (!%p220_p3), %s577_s18, 1 }
   0x7   : > { %223 = sbr.rel (%p220_p3) target bundleno = 223 (0xdf), region = 40 }
   0xc   : > { %vm304_vm0 = vcmask 261120   ;;  %v300_v0 = vld [vmem:[%s683_s4] sm:$0xff]  ;;  %v302_v1 = vld [vmem:[%s683_s4 + $0x10] sm:$0xff]  ;;  %s690_s18 = smov (!%p259_p4, %s577_s18), 1  ;;  %v301_v9 = vld [vmem:[%s683_s4 + $0x8] sm:$0xff]  ;;  %vm405_vm1 = vcmask 64512  }
   0xd   : > { %531 = vmatprep.mubr.msk.f32.mxu0 %vm304_vm0, %v300_v0  ;;  %534 = vmatprep.mubr.msk.f32.mxu1 %vm304_vm0, %v302_v1  ;;  %s510_s26 = sshll.u32 %s690_s18, 3  ;;  %v514_v4 = vld [vmem:[%s681_s2] ss:$0 sm:$0xff]  ;;  %v303_v10 = vld [vmem:[%s683_s4 + $0x18] sm:$0xff]  ;;  %s523_s16 = sshll.u32 %s690_s18, 5 }
   0xe   : > { %s265_s29 = scalar_lea.vmem %s679_s0, %s510_s26  ;;  %s272_s7 = scalar_lea.vmem %s680_s1, %s510_s26  ;;  %v515_v6 = vld [vmem:[%s682_s3] ss:$0 sm:$0xff] }
   0xf   : > { %v281_v2 = vld [vmem:[%s265_s29] sm:$0xff]  ;;  %s280_s23 = scalar_lea.vmem %s684_s5, %s523_s16 }
  0x10   : > { %v282_v3 = vld [vmem:[%s272_s7] sm:$0xff] }
  0x11   : > { %v283_v5 = vadd.f32 %v282_v3, %v281_v2 }
  0x13   : > { %v291_v7 = vmul.f32 %v514_v4, %v283_v5 }
  0x15   : > { %v299_v8 = vadd.f32 %v515_v6, %v291_v7 }
  0x17   : > { %529 = vmatprep.subr.msk.mxu0 %vm304_vm0, %v299_v8  ;;  %537 = vmatprep.subr.msk.mxu1 %vm304_vm0, %v299_v8 }
  0x18   : > { %530 = vmatpush3.xpose.msk.msra.mxu0 %vm304_vm0, %v299_v8  ;;  %538 = vmatpush3.xpose.msk.msra.mxu1 %vm304_vm0, %v299_v8 }
  0x1b   : > { %532 = vmatmul.mubr.msk.f32.vlgmr.msra.gmra.mxu0 %vm304_vm0, %v301_v9  ;;  %535 = vmatmul.mubr.msk.f32.vlgmr.msra.gmra.mxu1 %vm304_vm0, %v303_v10 }
  0xdb   : > { %v533_v11 = vpop.f32.mrf.mxu0  ;;  %v536_v12 = vpop.f32.mrf.mxu1 }
  0xdc   : > { %407 = vst.msk [vmem:[%s280_s23 + $0x8] sm:$0xff] %vm405_vm1, %v533_v11  ;;  %409 = vst.msk [vmem:[%s280_s23 + $0x18] sm:$0xff] %vm405_vm1, %v536_v12 }
  0xdd   : > { %v386_v13 = vpop.f32.mrf.mxu0  ;;  %v396_v14 = vpop.f32.mrf.mxu1 }
  0xde   : > { %406 = vst.msk [vmem:[%s280_s23] sm:$0xff] %vm405_vm1, %v386_v13  ;;  %408 = vst.msk [vmem:[%s280_s23 + $0x10] sm:$0xff] %vm405_vm1, %v396_v14 }
  0xdf PF: > { %s15_s20 = sadd.s32 1, %s585_s20   ;;  %s685_s18 = smov %s581_s19 }
  0xe0   : > { %p12_p5 = scmp.ge.s32.totalorder %s15_s20, 4   ;;  %s686_s19 = smov %s688_s21 }
  0xe2   :  { %14 = sbr.rel (!%p12_p5) target bundleno = 2 (0x2), region = 73 }

// kernel: batch_rnn_forward.5
= control target key start
LH: loop header
LB: loop body
LE: loop exit
PB: predicated region body
PF: predicated region fallthrough
CT: control target
= control target key end

     0   :  { %vm57_vm0 = vcmask 254976   ;;  %v2278_v0 = vmov 0.0   ;;  %vm2279_vm1 = vmmov 0   ;;  %s2280_s28 = smov 64   ;;  %vm88_vm2 = vcmask 261120   ;;  %s2282_s8 = smov 32   ;;  %s2936_s2 = inlined_call_operand.vmem [shape: bf16[2,32,96], index: 2, kind: input, shape index: {}]   ;;  %s2937_s3 = inlined_call_operand.vmem [shape: f32[2,1,32], index: 3, kind: input, shape index: {}]   ;;  %s2938_s0 = inlined_call_operand.vmem [shape: bf16[2,8,2,96], index: 0, kind: input, shape index: {}, may-alias: {0,1}]   ;;  %s2939_s1 = inlined_call_operand.vmem [shape: bf16[2,8,2,96], index: 1, kind: input, shape index: {}, may-alias: {0,1}]   ;;  %s2940_s4 = inlined_call_operand.vmem [shape: f32[2,8,32], index: 4, kind: output, shape index: {0}]   ;;  %s2941_s5 = inlined_call_operand.vmem [shape: f32[2,8,32], index: 5, kind: output, shape index: {1}]  }
   0x1   :  { %2043 = vmatprep.subr.bf16.mxu0 %v2278_v0  ;;  %2051 = vmatprep.subr.bf16.mxu1 %v2278_v0  ;;  %v2320_v1 = vld [vmem:[%s2936_s2 + $0x8] sm:$0xff]   ;;  %58 = vst.msk [vmem:[#allocation2] sm:$0x3] %vm57_vm0, %v2278_v0  ;;  %59 = vst.msk [vmem:[#allocation3] sm:$0x3] %vm57_vm0, %v2278_v0  ;;  %v2329_v2 = vld [vmem:[%s2936_s2 + $0x18] sm:$0xff]   ;;  %v153_v13 = vlaneseq }
   0x2   :  { %2047 = vmatprep.mubr.msk.bf16.mxu0 %vm2279_vm1, %v2278_v0  ;;  %2055 = vmatprep.mubr.msk.bf16.mxu1 %vm2279_vm1, %v2278_v0  ;;  %v2339_v3 = vld [vmem:[%s2936_s2] sm:$0xff]   ;;  %v2346_v4 = vld [vmem:[%s2936_s2 + $0x10] sm:$0xff]   ;;  %v2281_v11 = vmov 1983009808   ;;  %v1947_v33 = vld [vmem:[%s2939_s1 + $0xf] sm:$0x1] }
   0x3   :  { %2044 = vmatpush3.bf16.msra.mxu0 %v2320_v1  ;;  %2052 = vmatpush3.bf16.msra.mxu1 %v2329_v2  ;;  %v1946_v5 = vld [vmem:[%s2937_s3] ss:$0 sm:$0xff]  ;;  %v1952_v6 = vld [vmem:[%s2937_s3 + $0x1] ss:$0 sm:$0xff]  ;;  %v151_v12 = vunpack.c.l.s4 %v2281_v11  ;;  %v2385_v16 = vshrl.u32 %v153_v13, 7  ;;  %v270_v35 = vunpack.c.l.bf16 %v1947_v33  ;;  %s2283_s9 = smov 96  }
   0x4   :  { %2045 = vmatprep.subr.bf16.mxu0 %v2278_v0  ;;  %2053 = vmatprep.subr.bf16.mxu1 %v2278_v0  ;;  %v74_v31 = vld [vmem:[%s2938_s0] sm:$0x1]  ;;  %vm209_vm3 = vcmask 253952  }
   0x5   :  { %145 = vrot.lane.b32.xlu0 %v1946_v5, %s2280_s28  ;;  %v152_v15 = vunpack.c.0.s8 %v151_v12  ;;  %v132_v32 = vunpack.c.l.bf16 %v74_v31 }
   0x7   :  { %2046 = vmatpush3.bf16.msra.mxu0 %v2339_v3  ;;  %2054 = vmatpush3.bf16.msra.mxu1 %v2346_v4  ;;  %v2390_v18 = vsub.s32 %v152_v15, %v2385_v16 }
   0x8   :  { %v2358_v7 = vld [vmem:[#allocation2] sm:$0x3]  ;;  %v2360_v8 = vld [vmem:[#allocation3] sm:$0x3]  ;;  %2059 = vmatprep.subr.bf16.mxu0 %v2278_v0  ;;  %2067 = vmatprep.subr.bf16.mxu1 %v2278_v0 }
   0x9   :  { %v75_v9 = vpack.c.bf16 %v2358_v7, %v2358_v7  ;;  %v214_v10 = vpack.c.bf16 %v2360_v8, %v2360_v8  ;;  %283 = vrot.lane.b32.xlu0 %v1952_v6, %s2280_s28  ;;  %v180_v49 = vrot.slane %v2358_v7, %v2390_v18  ;;  %v318_v50 = vrot.slane %v2360_v8, %v2390_v18 }
   0xb   :  { %2048 = vmatmul.mubr.msk.bf16.vlgmr.msra.gmra.mxu0 %vm88_vm2, %v75_v9  ;;  %2056 = vmatmul.mubr.msk.bf16.vlgmr.msra.gmra.mxu1 %vm88_vm2, %v214_v10 }
   0xc   :  { %2060 = vmatpush3.bf16.msra.mxu0 %v2320_v1  ;;  %2068 = vmatpush3.bf16.msra.mxu1 %v2329_v2 }
   0xd   :  { %2061 = vmatprep.subr.bf16.mxu0 %v2278_v0  ;;  %2063 = vmatprep.mubr.msk.bf16.mxu0 %vm2279_vm1, %v2278_v0 }
   0xe   :  { %2069 = vmatprep.subr.bf16.mxu1 %v2278_v0  ;;  %2071 = vmatprep.mubr.msk.bf16.mxu1 %vm2279_vm1, %v2278_v0 }
  0x10   :  { %2062 = vmatpush3.bf16.msra.mxu0 %v2339_v3  ;;  %2070 = vmatpush3.bf16.msra.mxu1 %v2346_v4 }
  0x11   :  { %2075 = vmatprep.subr.bf16.mxu0 %v2278_v0  ;;  %2083 = vmatprep.subr.bf16.mxu1 %v2278_v0 }
  0x77   :  { %v2383_v14 = vpop.permute.xlu0 %145 }
  0x7b   :  { %v2387_v17 = vpop.permute.xlu0 %283 }
  0xcb   :  { %v126_v19 = vpop.f32.mrf.mxu0  ;;  %v264_v20 = vpop.f32.mrf.mxu1 }
  0xcc   :  { %v148_v21 = vadd.f32 %v2383_v14, %v126_v19  ;;  %v286_v22 = vadd.f32 %v2387_v17, %v264_v20  ;;  %v133_v34 = vadd.f32 %v132_v32, %v126_v19  ;;  %v271_v37 = vadd.f32 %v270_v35, %v264_v20 }
  0xcd   :  { %v2049_v23 = vpop.f32.mrf.mxu0  ;;  %v2057_v24 = vpop.f32.mrf.mxu1 }
  0xce   :  { %v156_v25 = vrot.slane %v148_v21, %v2390_v18  ;;  %v294_v28 = vrot.slane %v286_v22, %v2390_v18  ;;  %v1945_v36 = vmul.f32 -1.442695, %v133_v34  ;;  %v1951_v38 = vmul.f32 -1.442695, %v271_v37 }
  0xcf   :  { %v129_v26 = vpop.f32.mrf.mxu0  ;;  %v267_v27 = vpop.f32.mrf.mxu1 }
  0xd0   :  { %157 = vrot.lane.b32.xlu1 %v156_v25, %s2280_s28  ;;  %2182 = vpow2.f32 %v1945_v36 }
  0xd1   :  { %v2050_v29 = vpop.f32.mrf.mxu0  ;;  %v2058_v30 = vpop.f32.mrf.mxu1  ;;  %2184 = vpow2.f32 %v1951_v38 }
  0xd2   :  { %v1953_v30 = vld [vmem:[%s2938_s0 + $0x1] sm:$0x1] }
  0xd3   :  { %v398_v31 = vunpack.c.l.bf16 %v1953_v30 }
  0xd4   :  { %295 = vrot.lane.b32.xlu1 %v294_v28, %s2280_s28 }
  0xdd   :  { %v2183_v39 = vpop.eup %2182 }
  0xde   :  { %v137_v40 = vadd.f32 1.0, %v2183_v39  ;;  %v2185_v41 = vpop.eup %2184 }
  0xdf   :  { %v275_v42 = vadd.f32 1.0, %v2185_v41 }
  0xe0   :  { %2186 = vrcp.f32 %v137_v40 }
  0xe1   :  { %2188 = vrcp.f32 %v275_v42 }
  0xed   :  { %v2187_v43 = vpop.eup %2186 }
  0xee   :  { %v2189_v46 = vpop.eup %2188  ;;  %v167_v58 = vsub.f32 1.0, %v2187_v43 }
  0xef   :  { %v305_v5 = vsub.f32 1.0, %v2189_v46 }
 0x142   :  { %v158_v44 = vpop.permute.xlu1 %157 }
 0x143   :  { %v160_v45 = vmul.f32 %v2187_v43, %v158_v44 }
 0x145   :  { %162 = vrot.lane.b32.xlu0 %v160_v45, %s2280_s28 }
 0x146   :  { %v296_v47 = vpop.permute.xlu1 %295 }
 0x147   :  { %v298_v48 = vmul.f32 %v2189_v46, %v296_v47 }
 0x149   :  { %300 = vrot.lane.b32.xlu1 %v298_v48, %s2280_s28 }
 0x14d   :  { %181 = vrot.lane.b32.xlu1 %v180_v49, %s2282_s8 }
 0x151   :  { %319 = vrot.lane.b32.xlu1 %v318_v50, %s2282_s8 }
 0x1b7   :  { %v163_v51 = vpop.permute.xlu0 %162 }
 0x1b8   :  { %v165_v52 = vadd.f32 %v163_v51, %v132_v32  ;;  %v1956_v32 = vld [vmem:[%s2939_s1 + $0xe] sm:$0x1] }
 0x1b9   :  { %v507_v34 = vunpack.c.l.bf16 %v1956_v32 }
 0x1ba   :  { %2190 = vtanh.f32 %v165_v52 }
 0x1bb   :  { %v301_v53 = vpop.permute.xlu1 %300 }
 0x1bc   :  { %v303_v54 = vadd.f32 %v301_v53, %v270_v35 }
 0x1be   :  { %2192 = vtanh.f32 %v303_v54 }
 0x1bf   :  { %v182_v57 = vpop.permute.xlu1 %181 }
 0x1c0   :  { %v184_v60 = vmul.f32 %v2187_v43, %v182_v57 }
 0x1c3   :  { %v320_v62 = vpop.permute.xlu1 %319 }
 0x1c4   :  { %v322_v7 = vmul.f32 %v2189_v46, %v320_v62 }
 0x1c7   :  { %v2191_v55 = vpop.eup %2190 }
 0x1c8   :  { %169 = vrot.lane.b32.xlu0 %v2191_v55, %s2283_s9 }
 0x1cb   :  { %v2193_v56 = vpop.eup %2192 }
 0x1cc   :  { %307 = vrot.lane.b32.xlu0 %v2193_v56, %s2283_s9 }
 0x23a   :  { %v170_v59 = vpop.permute.xlu0 %169 }
 0x23b   :  { %v172_v61 = vmul.f32 %v170_v59, %v167_v58 }
 0x23d   :  { %v2412_v63 = vadd.f32 %v184_v60, %v172_v61 }
 0x23e   :  { %v308_v6 = vpop.permute.xlu0 %307 }
 0x23f   :  { %v310_v8 = vmul.f32 %v308_v6, %v305_v5  ;;  %v351_v9 = vpack.c.bf16 %v2412_v63, %v2412_v63 }
 0x241   :  { %v2416_v10 = vadd.f32 %v322_v7, %v310_v8  ;;  %353 = vrot.lane.b32.xlu0 %v351_v9, %s2283_s9 }
 0x243   :  { %v460_v11 = vpack.c.bf16 %v2416_v10, %v2416_v10 }
 0x245   :  { %462 = vrot.lane.b32.xlu1 %v460_v11, %s2283_s9 }
 0x2b3   :  { %v354_v12 = vpop.permute.xlu0 %353 }
 0x2b4   :  { %2064 = vmatmul.mubr.msk.bf16.vlgmr.msra.gmra.mxu0 %vm88_vm2, %v354_v12 }
 0x2b5   :  { %2076 = vmatpush3.bf16.msra.mxu0 %v2320_v1  ;;  %2079 = vmatprep.mubr.msk.bf16.mxu0 %vm2279_vm1, %v2278_v0 }
 0x2b6   :  { %2077 = vmatprep.subr.bf16.mxu0 %v2278_v0 }
 0x2b7   :  { %v463_v13 = vpop.permute.xlu1 %462 }
 0x2b8   :  { %2072 = vmatmul.mubr.msk.bf16.vlgmr.msra.gmra.mxu1 %vm88_vm2, %v463_v13 }
 0x2b9   :  { %2078 = vmatpush3.bf16.msra.mxu0 %v2339_v3  ;;  %2084 = vmatpush3.bf16.msra.mxu1 %v2329_v2 }
 0x2ba   :  { %2085 = vmatprep.subr.bf16.mxu1 %v2278_v0  ;;  %2087 = vmatprep.mubr.msk.bf16.mxu1 %vm2279_vm1, %v2278_v0 }
 0x2bb   :  { %2091 = vmatprep.subr.bf16.mxu0 %v2278_v0 }
 0x2bd   :  { %2086 = vmatpush3.bf16.msra.mxu1 %v2346_v4 }
 0x2be   :  { %2099 = vmatprep.subr.bf16.mxu1 %v2278_v0 }
 0x374   :  { %v392_v15 = vpop.f32.mrf.mxu0 }
 0x375   :  { %v406_v19 = vadd.f32 %v392_v15, %v2383_v14  ;;  %v399_v33 = vadd.f32 %v398_v31, %v392_v15 }
 0x376   :  { %v2065_v20 = vpop.f32.mrf.mxu0 }
 0x377   :  { %v414_v21 = vrot.slane %v406_v19, %v2390_v18  ;;  %v1955_v35 = vmul.f32 -1.442695, %v399_v33 }
 0x378   :  { %v395_v22 = vpop.f32.mrf.mxu0  ;;  %v501_v23 = vpop.f32.mrf.mxu1 }
 0x379   :  { %v515_v24 = vadd.f32 %v501_v23, %v2387_v17  ;;  %415 = vrot.lane.b32.xlu0 %v414_v21, %s2280_s28  ;;  %v508_v36 = vadd.f32 %v507_v34, %v501_v23  ;;  %2194 = vpow2.f32 %v1955_v35 }
 0x37a   :  { %v2066_v25 = vpop.f32.mrf.mxu0  ;;  %v2073_v26 = vpop.f32.mrf.mxu1 }
 0x37b   :  { %v523_v27 = vrot.slane %v515_v24, %v2390_v18  ;;  %v1958_v37 = vmul.f32 -1.442695, %v508_v36 }
 0x37c   :  { %v504_v28 = vpop.f32.mrf.mxu1 }
 0x37d   :  { %524 = vrot.lane.b32.xlu1 %v523_v27, %s2280_s28  ;;  %2196 = vpow2.f32 %v1958_v37  ;;  %v1959_v27 = vld [vmem:[%s2938_s0 + $0x2] sm:$0x1] }
 0x37e   :  { %v2074_v29 = vpop.f32.mrf.mxu1  ;;  %v616_v28 = vunpack.c.l.bf16 %v1959_v27 }
 0x37f   :  { %v1962_v29 = vld [vmem:[%s2939_s1 + $0xd] sm:$0x1] }
 0x386   :  { %v2195_v38 = vpop.eup %2194 }
 0x387   :  { %v403_v39 = vadd.f32 1.0, %v2195_v38 }
 0x389   :  { %2198 = vrcp.f32 %v403_v39 }
 0x38a   :  { %v2197_v40 = vpop.eup %2196 }
 0x38b   :  { %v512_v41 = vadd.f32 1.0, %v2197_v40 }
 0x38d   :  { %2200 = vrcp.f32 %v512_v41 }
 0x396   :  { %v2199_v42 = vpop.eup %2198 }
 0x397   :  { %v425_v54 = vsub.f32 1.0, %v2199_v42  ;;  %v431_v56 = vmul.f32 %v2199_v42, %v2412_v63 }
 0x39a   :  { %v2201_v45 = vpop.eup %2200 }
 0x39b   :  { %v534_v59 = vsub.f32 1.0, %v2201_v45  ;;  %v540_v61 = vmul.f32 %v2201_v45, %v2416_v10 }
 0x3eb   :  { %v416_v43 = vpop.permute.xlu0 %415 }
 0x3ec   :  { %v418_v44 = vmul.f32 %v2199_v42, %v416_v43 }
 0x3ee   :  { %420 = vrot.lane.b32.xlu0 %v418_v44, %s2280_s28 }
 0x3ef   :  { %v525_v46 = vpop.permute.xlu1 %524 }
 0x3f0   :  { %v527_v47 = vmul.f32 %v2201_v45, %v525_v46 }
 0x3f2   :  { %529 = vrot.lane.b32.xlu1 %v527_v47, %s2280_s28 }
 0x460   :  { %v421_v48 = vpop.permute.xlu0 %420 }
 0x461   :  { %v423_v49 = vadd.f32 %v421_v48, %v398_v31  ;;  %v725_v31 = vunpack.c.l.bf16 %v1962_v29 }
 0x463   :  { %2202 = vtanh.f32 %v423_v49 }
 0x464   :  { %v530_v50 = vpop.permute.xlu1 %529 }
 0x465   :  { %v532_v51 = vadd.f32 %v530_v50, %v507_v34 }
 0x467   :  { %2204 = vtanh.f32 %v532_v51 }
 0x470   :  { %v2203_v52 = vpop.eup %2202 }
 0x471   :  { %427 = vrot.lane.b32.xlu0 %v2203_v52, %s2283_s9 }
 0x474   :  { %v2205_v53 = vpop.eup %2204 }
 0x475   :  { %536 = vrot.lane.b32.xlu1 %v2205_v53, %s2283_s9 }
 0x4e3   :  { %v428_v55 = vpop.permute.xlu0 %427 }
 0x4e4   :  { %v430_v57 = vmul.f32 %v428_v55, %v425_v54 }
 0x4e6   :  { %v2453_v58 = vadd.f32 %v431_v56, %v430_v57 }
 0x4e7   :  { %v537_v60 = vpop.permute.xlu1 %536 }
 0x4e8   :  { %v539_v62 = vmul.f32 %v537_v60, %v534_v59  ;;  %v569_v5 = vpack.c.bf16 %v2453_v58, %v2453_v58 }
 0x4ea   :  { %v2458_v6 = vadd.f32 %v540_v61, %v539_v62  ;;  %571 = vrot.lane.b32.xlu0 %v569_v5, %s2283_s9 }
 0x4ec   :  { %v678_v7 = vpack.c.bf16 %v2458_v6, %v2458_v6 }
 0x4ee   :  { %680 = vrot.lane.b32.xlu1 %v678_v7, %s2283_s9 }
 0x55c   :  { %v572_v8 = vpop.permute.xlu0 %571 }
 0x55d   :  { %2080 = vmatmul.mubr.msk.bf16.vlgmr.msra.gmra.mxu0 %vm88_vm2, %v572_v8 }
 0x55e   :  { %2092 = vmatpush3.bf16.msra.mxu0 %v2320_v1  ;;  %2095 = vmatprep.mubr.msk.bf16.mxu0 %vm2279_vm1, %v2278_v0 }
 0x55f   :  { %2093 = vmatprep.subr.bf16.mxu0 %v2278_v0 }
 0x560   :  { %v681_v9 = vpop.permute.xlu1 %680 }
 0x561   :  { %2088 = vmatmul.mubr.msk.bf16.vlgmr.msra.gmra.mxu1 %vm88_vm2, %v681_v9 }
 0x562   :  { %2094 = vmatpush3.bf16.msra.mxu0 %v2339_v3  ;;  %2100 = vmatpush3.bf16.msra.mxu1 %v2329_v2 }
 0x563   :  { %2101 = vmatprep.subr.bf16.mxu1 %v2278_v0  ;;  %2103 = vmatprep.mubr.msk.bf16.mxu1 %vm2279_vm1, %v2278_v0 }
 0x564   :  { %2107 = vmatprep.subr.bf16.mxu0 %v2278_v0 }
 0x566   :  { %2102 = vmatpush3.bf16.msra.mxu1 %v2346_v4 }
 0x567   :  { %2115 = vmatprep.subr.bf16.mxu1 %v2278_v0 }
 0x61d   :  { %v610_v11 = vpop.f32.mrf.mxu0 }
 0x61e   :  { %v624_v12 = vadd.f32 %v610_v11, %v2383_v14  ;;  %v617_v30 = vadd.f32 %v616_v28, %v610_v11 }
 0x61f   :  { %v2081_v13 = vpop.f32.mrf.mxu0 }
 0x620   :  { %v632_v15 = vrot.slane %v624_v12, %v2390_v18  ;;  %v1961_v32 = vmul.f32 -1.442695, %v617_v30 }
 0x621   :  { %v613_v19 = vpop.f32.mrf.mxu0  ;;  %v719_v20 = vpop.f32.mrf.mxu1 }
 0x622   :  { %v733_v21 = vadd.f32 %v719_v20, %v2387_v17  ;;  %633 = vrot.lane.b32.xlu0 %v632_v15, %s2280_s28  ;;  %v726_v33 = vadd.f32 %v725_v31, %v719_v20  ;;  %2206 = vpow2.f32 %v1961_v32 }
 0x623   :  { %v2082_v22 = vpop.f32.mrf.mxu0  ;;  %v2089_v23 = vpop.f32.mrf.mxu1 }
 0x624   :  { %v741_v24 = vrot.slane %v733_v21, %v2390_v18  ;;  %v1964_v34 = vmul.f32 -1.442695, %v726_v33 }
 0x625   :  { %v722_v25 = vpop.f32.mrf.mxu1 }
 0x626   :  { %742 = vrot.lane.b32.xlu1 %v741_v24, %s2280_s28  ;;  %2208 = vpow2.f32 %v1964_v34 }
 0x627   :  { %v2090_v26 = vpop.f32.mrf.mxu1 }
 0x628   :  { %v1965_v26 = vld [vmem:[%s2938_s0 + $0x3] sm:$0x1] }
 0x629   :  { %v834_v27 = vunpack.c.l.bf16 %v1965_v26 }
 0x62f   :  { %v2207_v35 = vpop.eup %2206 }
 0x630   :  { %v621_v36 = vadd.f32 1.0, %v2207_v35 }
 0x632   :  { %2210 = vrcp.f32 %v621_v36 }
 0x633   :  { %v2209_v37 = vpop.eup %2208 }
 0x634   :  { %v730_v38 = vadd.f32 1.0, %v2209_v37 }
 0x636   :  { %2212 = vrcp.f32 %v730_v38 }
 0x63f   :  { %v2211_v39 = vpop.eup %2210 }
 0x640   :  { %v643_v51 = vsub.f32 1.0, %v2211_v39  ;;  %v649_v53 = vmul.f32 %v2211_v39, %v2453_v58 }
 0x643   :  { %v2213_v42 = vpop.eup %2212 }
 0x644   :  { %v752_v56 = vsub.f32 1.0, %v2213_v42  ;;  %v758_v59 = vmul.f32 %v2213_v42, %v2458_v6 }
 0x694   :  { %v634_v40 = vpop.permute.xlu0 %633 }
 0x695   :  { %v636_v41 = vmul.f32 %v2211_v39, %v634_v40 }
 0x697   :  { %638 = vrot.lane.b32.xlu0 %v636_v41, %s2280_s28 }
 0x698   :  { %v743_v43 = vpop.permute.xlu1 %742 }
 0x699   :  { %v745_v44 = vmul.f32 %v2213_v42, %v743_v43 }
 0x69b   :  { %747 = vrot.lane.b32.xlu1 %v745_v44, %s2280_s28 }
 0x709   :  { %v639_v45 = vpop.permute.xlu0 %638 }
 0x70a   :  { %v641_v46 = vadd.f32 %v639_v45, %v616_v28  ;;  %v1968_v28 = vld [vmem:[%s2939_s1 + $0xc] sm:$0x1] }
 0x70b   :  { %v943_v30 = vunpack.c.l.bf16 %v1968_v28 }
 0x70c   :  { %2214 = vtanh.f32 %v641_v46 }
 0x70d   :  { %v748_v47 = vpop.permute.xlu1 %747 }
 0x70e   :  { %v750_v48 = vadd.f32 %v748_v47, %v725_v31 }
 0x710   :  { %2216 = vtanh.f32 %v750_v48 }
 0x719   :  { %v2215_v49 = vpop.eup %2214 }
 0x71a   :  { %645 = vrot.lane.b32.xlu0 %v2215_v49, %s2283_s9 }
 0x71d   :  { %v2217_v50 = vpop.eup %2216 }
 0x71e   :  { %754 = vrot.lane.b32.xlu1 %v2217_v50, %s2283_s9 }
 0x78c   :  { %v646_v52 = vpop.permute.xlu0 %645 }
 0x78d   :  { %v648_v54 = vmul.f32 %v646_v52, %v643_v51 }
 0x78f   :  { %v2495_v55 = vadd.f32 %v649_v53, %v648_v54 }
 0x790   :  { %v755_v57 = vpop.permute.xlu1 %754 }
 0x791   :  { %v757_v60 = vmul.f32 %v755_v57, %v752_v56  ;;  %v787_v61 = vpack.c.bf16 %v2495_v55, %v2495_v55 }
 0x793   :  { %v2500_v62 = vadd.f32 %v758_v59, %v757_v60  ;;  %789 = vrot.lane.b32.xlu0 %v787_v61, %s2283_s9 }
 0x795   :  { %v896_v5 = vpack.c.bf16 %v2500_v62, %v2500_v62 }
 0x797   :  { %898 = vrot.lane.b32.xlu1 %v896_v5, %s2283_s9 }
 0x805   :  { %v790_v7 = vpop.permute.xlu0 %789 }
 0x806   :  { %2096 = vmatmul.mubr.msk.bf16.vlgmr.msra.gmra.mxu0 %vm88_vm2, %v790_v7 }
 0x807   :  { %2108 = vmatpush3.bf16.msra.mxu0 %v2320_v1  ;;  %2111 = vmatprep.mubr.msk.bf16.mxu0 %vm2279_vm1, %v2278_v0 }
 0x808   :  { %2109 = vmatprep.subr.bf16.mxu0 %v2278_v0 }
 0x809   :  { %v899_v8 = vpop.permute.xlu1 %898 }
 0x80a   :  { %2104 = vmatmul.mubr.msk.bf16.vlgmr.msra.gmra.mxu1 %vm88_vm2, %v899_v8 }
 0x80b   :  { %2110 = vmatpush3.bf16.msra.mxu0 %v2339_v3  ;;  %2116 = vmatpush3.bf16.msra.mxu1 %v2329_v2 }
 0x80c   :  { %2117 = vmatprep.subr.bf16.mxu1 %v2278_v0  ;;  %2119 = vmatprep.mubr.msk.bf16.mxu1 %vm2279_vm1, %v2278_v0 }
 0x80d   :  { %2123 = vmatprep.subr.bf16.mxu0 %v2278_v0 }
 0x80f   :  { %2118 = vmatpush3.bf16.msra.mxu1 %v2346_v4 }
 0x810   :  { %2131 = vmatprep.subr.bf16.mxu1 %v2278_v0 }
 0x8c6   :  { %v828_v9 = vpop.f32.mrf.mxu0 }
 0x8c7   :  { %v842_v11 = vadd.f32 %v828_v9, %v2383_v14  ;;  %v835_v29 = vadd.f32 %v834_v27, %v828_v9 }
 0x8c8   :  { %v2097_v12 = vpop.f32.mrf.mxu0 }
 0x8c9   :  { %v850_v13 = vrot.slane %v842_v11, %v2390_v18  ;;  %v1967_v31 = vmul.f32 -1.442695, %v835_v29  ;;  %v1974_v29 = vld [vmem:[%s2939_s1 + $0xb] sm:$0x1] }
 0x8ca   :  { %v831_v15 = vpop.f32.mrf.mxu0  ;;  %v937_v19 = vpop.f32.mrf.mxu1 }
 0x8cb   :  { %v951_v20 = vadd.f32 %v937_v19, %v2387_v17  ;;  %851 = vrot.lane.b32.xlu0 %v850_v13, %s2280_s28  ;;  %v944_v32 = vadd.f32 %v943_v30, %v937_v19  ;;  %2218 = vpow2.f32 %v1967_v31  ;;  %v1161_v31 = vunpack.c.l.bf16 %v1974_v29 }
 0x8cc   :  { %v2098_v21 = vpop.f32.mrf.mxu0  ;;  %v2105_v22 = vpop.f32.mrf.mxu1 }
 0x8cd   :  { %v959_v23 = vrot.slane %v951_v20, %v2390_v18  ;;  %v1970_v33 = vmul.f32 -1.442695, %v944_v32 }
 0x8ce   :  { %v940_v24 = vpop.f32.mrf.mxu1 }
 0x8cf   :  { %960 = vrot.lane.b32.xlu1 %v959_v23, %s2280_s28  ;;  %2220 = vpow2.f32 %v1970_v33 }
 0x8d0   :  { %v2106_v25 = vpop.f32.mrf.mxu1 }
 0x8d8   :  { %v2219_v34 = vpop.eup %2218 }
 0x8d9   :  { %v839_v35 = vadd.f32 1.0, %v2219_v34 }
 0x8db   :  { %2222 = vrcp.f32 %v839_v35 }
 0x8dc   :  { %v2221_v36 = vpop.eup %2220 }
 0x8dd   :  { %v948_v37 = vadd.f32 1.0, %v2221_v36 }
 0x8df   :  { %2224 = vrcp.f32 %v948_v37 }
 0x8e8   :  { %v2223_v38 = vpop.eup %2222 }
 0x8e9   :  { %v861_v50 = vsub.f32 1.0, %v2223_v38  ;;  %v867_v52 = vmul.f32 %v2223_v38, %v2495_v55 }
 0x8ec   :  { %v2225_v41 = vpop.eup %2224 }
 0x8ed   :  { %v970_v56 = vsub.f32 1.0, %v2225_v41  ;;  %v976_v59 = vmul.f32 %v2225_v41, %v2500_v62 }
 0x93d   :  { %v852_v39 = vpop.permute.xlu0 %851 }
 0x93e   :  { %v854_v40 = vmul.f32 %v2223_v38, %v852_v39 }
 0x940   :  { %856 = vrot.lane.b32.xlu0 %v854_v40, %s2280_s28 }
 0x941   :  { %v961_v42 = vpop.permute.xlu1 %960 }
 0x942   :  { %v963_v43 = vmul.f32 %v2225_v41, %v961_v42 }
 0x944   :  { %965 = vrot.lane.b32.xlu1 %v963_v43, %s2280_s28 }
 0x9b2   :  { %v857_v44 = vpop.permute.xlu0 %856 }
 0x9b3   :  { %v859_v45 = vadd.f32 %v857_v44, %v834_v27  ;;  %v1971_v27 = vld [vmem:[%s2938_s0 + $0x4] sm:$0x1] }
 0x9b4   :  { %v1052_v28 = vunpack.c.l.bf16 %v1971_v27 }
 0x9b5   :  { %2226 = vtanh.f32 %v859_v45 }
 0x9b6   :  { %v966_v46 = vpop.permute.xlu1 %965 }
 0x9b7   :  { %v968_v47 = vadd.f32 %v966_v46, %v943_v30 }
 0x9b9   :  { %2228 = vtanh.f32 %v968_v47 }
 0x9c2   :  { %v2227_v48 = vpop.eup %2226 }
 0x9c3   :  { %863 = vrot.lane.b32.xlu0 %v2227_v48, %s2283_s9 }
 0x9c6   :  { %v2229_v49 = vpop.eup %2228 }
 0x9c7   :  { %972 = vrot.lane.b32.xlu1 %v2229_v49, %s2283_s9 }
 0xa35   :  { %v864_v51 = vpop.permute.xlu0 %863 }
 0xa36   :  { %v866_v53 = vmul.f32 %v864_v51, %v861_v50 }
 0xa38   :  { %v2537_v54 = vadd.f32 %v867_v52, %v866_v53 }
 0xa39   :  { %v973_v57 = vpop.permute.xlu1 %972 }
 0xa3a   :  { %v975_v60 = vmul.f32 %v973_v57, %v970_v56  ;;  %v1005_v61 = vpack.c.bf16 %v2537_v54, %v2537_v54 }
 0xa3c   :  { %v2542_v5 = vadd.f32 %v976_v59, %v975_v60  ;;  %1007 = vrot.lane.b32.xlu0 %v1005_v61, %s2283_s9 }
 0xa3e   :  { %v1114_v7 = vpack.c.bf16 %v2542_v5, %v2542_v5 }
 0xa40   :  { %1116 = vrot.lane.b32.xlu1 %v1114_v7, %s2283_s9 }
 0xaae   :  { %v1008_v8 = vpop.permute.xlu0 %1007 }
 0xaaf   :  { %2112 = vmatmul.mubr.msk.bf16.vlgmr.msra.gmra.mxu0 %vm88_vm2, %v1008_v8 }
 0xab0   :  { %2124 = vmatpush3.bf16.msra.mxu0 %v2320_v1  ;;  %2127 = vmatprep.mubr.msk.bf16.mxu0 %vm2279_vm1, %v2278_v0 }
 0xab1   :  { %2125 = vmatprep.subr.bf16.mxu0 %v2278_v0 }
 0xab2   :  { %v1117_v9 = vpop.permute.xlu1 %1116 }
 0xab3   :  { %2120 = vmatmul.mubr.msk.bf16.vlgmr.msra.gmra.mxu1 %vm88_vm2, %v1117_v9 }
 0xab4   :  { %2126 = vmatpush3.bf16.msra.mxu0 %v2339_v3  ;;  %2132 = vmatpush3.bf16.msra.mxu1 %v2329_v2 }
 0xab5   :  { %2133 = vmatprep.subr.bf16.mxu1 %v2278_v0  ;;  %2135 = vmatprep.mubr.msk.bf16.mxu1 %vm2279_vm1, %v2278_v0 }
 0xab6   :  { %2139 = vmatprep.subr.bf16.mxu0 %v2278_v0 }
 0xab8   :  { %2134 = vmatpush3.bf16.msra.mxu1 %v2346_v4 }
 0xab9   :  { %2147 = vmatprep.subr.bf16.mxu1 %v2278_v0 }
 0xb6f   :  { %v1046_v11 = vpop.f32.mrf.mxu0 }
 0xb70   :  { %v1060_v12 = vadd.f32 %v1046_v11, %v2383_v14  ;;  %v1053_v30 = vadd.f32 %v1052_v28, %v1046_v11 }
 0xb71   :  { %v2113_v13 = vpop.f32.mrf.mxu0 }
 0xb72   :  { %v1068_v15 = vrot.slane %v1060_v12, %v2390_v18  ;;  %v1973_v32 = vmul.f32 -1.442695, %v1053_v30  ;;  %v1977_v30 = vld [vmem:[%s2938_s0 + $0x5] sm:$0x1] }
 0xb73   :  { %v1049_v19 = vpop.f32.mrf.mxu0  ;;  %v1155_v20 = vpop.f32.mrf.mxu1 }
 0xb74   :  { %v1169_v21 = vadd.f32 %v1155_v20, %v2387_v17  ;;  %1069 = vrot.lane.b32.xlu0 %v1068_v15, %s2280_s28  ;;  %v1162_v33 = vadd.f32 %v1161_v31, %v1155_v20  ;;  %2230 = vpow2.f32 %v1973_v32  ;;  %v1980_v32 = vld [vmem:[%s2939_s1 + $0xa] sm:$0x1] }
 0xb75   :  { %v2114_v22 = vpop.f32.mrf.mxu0  ;;  %v2121_v23 = vpop.f32.mrf.mxu1 }
 0xb76   :  { %v1177_v24 = vrot.slane %v1169_v21, %v2390_v18  ;;  %v1976_v34 = vmul.f32 -1.442695, %v1162_v33 }
 0xb77   :  { %v1158_v25 = vpop.f32.mrf.mxu1 }
 0xb78   :  { %1178 = vrot.lane.b32.xlu1 %v1177_v24, %s2280_s28  ;;  %2232 = vpow2.f32 %v1976_v34  ;;  %v1379_v34 = vunpack.c.l.bf16 %v1980_v32  ;;  %v1986_v32 = vld [vmem:[%s2939_s1 + $0x9] sm:$0x1] }
 0xb79   :  { %v2122_v26 = vpop.f32.mrf.mxu1 }
 0xb81   :  { %v2231_v35 = vpop.eup %2230 }
 0xb82   :  { %v1057_v36 = vadd.f32 1.0, %v2231_v35 }
 0xb84   :  { %2234 = vrcp.f32 %v1057_v36 }
 0xb85   :  { %v2233_v37 = vpop.eup %2232 }
 0xb86   :  { %v1166_v38 = vadd.f32 1.0, %v2233_v37 }
 0xb88   :  { %2236 = vrcp.f32 %v1166_v38 }
 0xb91   :  { %v2235_v39 = vpop.eup %2234 }
 0xb92   :  { %v1079_v51 = vsub.f32 1.0, %v2235_v39  ;;  %v1085_v53 = vmul.f32 %v2235_v39, %v2537_v54 }
 0xb95   :  { %v2237_v42 = vpop.eup %2236 }
 0xb96   :  { %v1188_v59 = vsub.f32 1.0, %v2237_v42  ;;  %v1194_v61 = vmul.f32 %v2237_v42, %v2542_v5 }
 0xbe6   :  { %v1070_v40 = vpop.permute.xlu0 %1069 }
 0xbe7   :  { %v1072_v41 = vmul.f32 %v2235_v39, %v1070_v40 }
 0xbe9   :  { %1074 = vrot.lane.b32.xlu0 %v1072_v41, %s2280_s28 }
 0xbea   :  { %v1179_v43 = vpop.permute.xlu1 %1178 }
 0xbeb   :  { %v1181_v44 = vmul.f32 %v2237_v42, %v1179_v43 }
 0xbed   :  { %1183 = vrot.lane.b32.xlu1 %v1181_v44, %s2280_s28 }
 0xc5b   :  { %v1075_v45 = vpop.permute.xlu0 %1074 }
 0xc5c   :  { %v1077_v46 = vadd.f32 %v1075_v45, %v1052_v28 }
 0xc5e   :  { %2238 = vtanh.f32 %v1077_v46 }
 0xc5f   :  { %v1184_v47 = vpop.permute.xlu1 %1183 }
 0xc60   :  { %v1186_v48 = vadd.f32 %v1184_v47, %v1161_v31  ;;  %v1270_v31 = vunpack.c.l.bf16 %v1977_v30 }
 0xc62   :  { %2240 = vtanh.f32 %v1186_v48 }
 0xc6b   :  { %v2239_v49 = vpop.eup %2238 }
 0xc6c   :  { %1081 = vrot.lane.b32.xlu0 %v2239_v49, %s2283_s9 }
 0xc6f   :  { %v2241_v50 = vpop.eup %2240 }
 0xc70   :  { %1190 = vrot.lane.b32.xlu1 %v2241_v50, %s2283_s9 }
 0xcde   :  { %v1082_v52 = vpop.permute.xlu0 %1081 }
 0xcdf   :  { %v1084_v56 = vmul.f32 %v1082_v52, %v1079_v51 }
 0xce1   :  { %v2579_v57 = vadd.f32 %v1085_v53, %v1084_v56 }
 0xce2   :  { %v1191_v60 = vpop.permute.xlu1 %1190 }
 0xce3   :  { %v1193_v7 = vmul.f32 %v1191_v60, %v1188_v59  ;;  %v1223_v8 = vpack.c.bf16 %v2579_v57, %v2579_v57 }
 0xce5   :  { %v2584_v9 = vadd.f32 %v1194_v61, %v1193_v7  ;;  %1225 = vrot.lane.b32.xlu0 %v1223_v8, %s2283_s9 }
 0xce7   :  { %v1332_v11 = vpack.c.bf16 %v2584_v9, %v2584_v9 }
 0xce9   :  { %1334 = vrot.lane.b32.xlu1 %v1332_v11, %s2283_s9 }
 0xd57   :  { %v1226_v12 = vpop.permute.xlu0 %1225 }
 0xd58   :  { %2128 = vmatmul.mubr.msk.bf16.vlgmr.msra.gmra.mxu0 %vm88_vm2, %v1226_v12 }
 0xd59   :  { %2140 = vmatpush3.bf16.msra.mxu0 %v2320_v1  ;;  %2143 = vmatprep.mubr.msk.bf16.mxu0 %vm2279_vm1, %v2278_v0 }
 0xd5a   :  { %2141 = vmatprep.subr.bf16.mxu0 %v2278_v0 }
 0xd5b   :  { %v1335_v13 = vpop.permute.xlu1 %1334 }
 0xd5c   :  { %2136 = vmatmul.mubr.msk.bf16.vlgmr.msra.gmra.mxu1 %vm88_vm2, %v1335_v13 }
 0xd5d   :  { %2142 = vmatpush3.bf16.msra.mxu0 %v2339_v3  ;;  %2148 = vmatpush3.bf16.msra.mxu1 %v2329_v2 }
 0xd5e   :  { %2149 = vmatprep.subr.bf16.mxu1 %v2278_v0  ;;  %2151 = vmatprep.mubr.msk.bf16.mxu1 %vm2279_vm1, %v2278_v0 }
 0xd5f   :  { %2155 = vmatprep.subr.bf16.mxu0 %v2278_v0 }
 0xd61   :  { %2150 = vmatpush3.bf16.msra.mxu1 %v2346_v4 }
 0xd62   :  { %2163 = vmatprep.subr.bf16.mxu1 %v2278_v0 }
 0xe18   :  { %v1264_v15 = vpop.f32.mrf.mxu0 }
 0xe19   :  { %v1278_v19 = vadd.f32 %v1264_v15, %v2383_v14  ;;  %v1271_v33 = vadd.f32 %v1270_v31, %v1264_v15 }
 0xe1a   :  { %v2129_v20 = vpop.f32.mrf.mxu0 }
 0xe1b   :  { %v1286_v21 = vrot.slane %v1278_v19, %v2390_v18  ;;  %v1979_v35 = vmul.f32 -1.442695, %v1271_v33 }
 0xe1c   :  { %v1267_v22 = vpop.f32.mrf.mxu0  ;;  %v1373_v23 = vpop.f32.mrf.mxu1 }
 0xe1d   :  { %v1387_v24 = vadd.f32 %v1373_v23, %v2387_v17  ;;  %1287 = vrot.lane.b32.xlu0 %v1286_v21, %s2280_s28  ;;  %v1380_v36 = vadd.f32 %v1379_v34, %v1373_v23  ;;  %2242 = vpow2.f32 %v1979_v35 }
 0xe1e   :  { %v2130_v25 = vpop.f32.mrf.mxu0  ;;  %v2137_v26 = vpop.f32.mrf.mxu1 }
 0xe1f   :  { %v1395_v27 = vrot.slane %v1387_v24, %v2390_v18  ;;  %v1982_v37 = vmul.f32 -1.442695, %v1380_v36 }
 0xe20   :  { %v1376_v28 = vpop.f32.mrf.mxu1 }
 0xe21   :  { %1396 = vrot.lane.b32.xlu1 %v1395_v27, %s2280_s28  ;;  %2244 = vpow2.f32 %v1982_v37 }
 0xe22   :  { %v2138_v29 = vpop.f32.mrf.mxu1 }
 0xe2a   :  { %v2243_v38 = vpop.eup %2242 }
 0xe2b   :  { %v1275_v39 = vadd.f32 1.0, %v2243_v38 }
 0xe2d   :  { %2246 = vrcp.f32 %v1275_v39 }
 0xe2e   :  { %v2245_v40 = vpop.eup %2244 }
 0xe2f   :  { %v1384_v41 = vadd.f32 1.0, %v2245_v40 }
 0xe31   :  { %2248 = vrcp.f32 %v1384_v41 }
 0xe3a   :  { %v2247_v42 = vpop.eup %2246 }
 0xe3b   :  { %v1297_v56 = vsub.f32 1.0, %v2247_v42  ;;  %v1303_v60 = vmul.f32 %v2247_v42, %v2579_v57 }
 0xe3e   :  { %v2249_v45 = vpop.eup %2248 }
 0xe3f   :  { %v1406_v8 = vsub.f32 1.0, %v2249_v45  ;;  %v1412_v12 = vmul.f32 %v2249_v45, %v2584_v9 }
 0xe8f   :  { %v1288_v43 = vpop.permute.xlu0 %1287 }
 0xe90   :  { %v1290_v44 = vmul.f32 %v2247_v42, %v1288_v43 }
 0xe92   :  { %1292 = vrot.lane.b32.xlu0 %v1290_v44, %s2280_s28 }
 0xe93   :  { %v1397_v46 = vpop.permute.xlu1 %1396 }
 0xe94   :  { %v1399_v47 = vmul.f32 %v2249_v45, %v1397_v46 }
 0xe96   :  { %1401 = vrot.lane.b32.xlu1 %v1399_v47, %s2280_s28 }
 0xf04   :  { %v1293_v48 = vpop.permute.xlu0 %1292 }
 0xf05   :  { %v1295_v49 = vadd.f32 %v1293_v48, %v1270_v31 }
 0xf07   :  { %2250 = vtanh.f32 %v1295_v49 }
 0xf08   :  { %v1402_v50 = vpop.permute.xlu1 %1401 }
 0xf09   :  { %v1404_v51 = vadd.f32 %v1402_v50, %v1379_v34  ;;  %v1597_v34 = vunpack.c.l.bf16 %v1986_v32 }
 0xf0b   :  { %2252 = vtanh.f32 %v1404_v51 }
 0xf14   :  { %v2251_v52 = vpop.eup %2250 }
 0xf15   :  { %1299 = vrot.lane.b32.xlu0 %v2251_v52, %s2283_s9 }
 0xf18   :  { %v2253_v53 = vpop.eup %2252 }
 0xf19   :  { %1408 = vrot.lane.b32.xlu1 %v2253_v53, %s2283_s9 }
 0xf87   :  { %v1300_v59 = vpop.permute.xlu0 %1299 }
 0xf88   :  { %v1302_v61 = vmul.f32 %v1300_v59, %v1297_v56 }
 0xf8a   :  { %v2621_v7 = vadd.f32 %v1303_v60, %v1302_v61 }
 0xf8b   :  { %v1409_v11 = vpop.permute.xlu1 %1408 }
 0xf8c   :  { %v1411_v13 = vmul.f32 %v1409_v11, %v1406_v8  ;;  %v1441_v15 = vpack.c.bf16 %v2621_v7, %v2621_v7 }
 0xf8e   :  { %v2626_v19 = vadd.f32 %v1412_v12, %v1411_v13  ;;  %1443 = vrot.lane.b32.xlu0 %v1441_v15, %s2283_s9 }
 0xf90   :  { %v1550_v20 = vpack.c.bf16 %v2626_v19, %v2626_v19 }
 0xf92   :  { %1552 = vrot.lane.b32.xlu1 %v1550_v20, %s2283_s9 }
0x1000   :  { %v1444_v21 = vpop.permute.xlu0 %1443 }
0x1001   :  { %2144 = vmatmul.mubr.msk.bf16.vlgmr.msra.gmra.mxu0 %vm88_vm2, %v1444_v21 }
0x1002   :  { %2156 = vmatpush3.bf16.msra.mxu0 %v2320_v1  ;;  %2159 = vmatprep.mubr.msk.bf16.mxu0 %vm2279_vm1, %v2278_v0 }
0x1003   :  { %2157 = vmatprep.subr.bf16.mxu0 %v2278_v0 }
0x1004   :  { %v1553_v22 = vpop.permute.xlu1 %1552 }
0x1005   :  { %2152 = vmatmul.mubr.msk.bf16.vlgmr.msra.gmra.mxu1 %vm88_vm2, %v1553_v22 }
0x1006   :  { %2158 = vmatpush3.bf16.msra.mxu0 %v2339_v3  ;;  %2164 = vmatpush3.bf16.msra.mxu1 %v2329_v2 }
0x1007   :  { %2165 = vmatprep.subr.bf16.mxu1 %v2278_v0  ;;  %2167 = vmatprep.mubr.msk.bf16.mxu1 %vm2279_vm1, %v2278_v0 }
0x100a   :  { %2166 = vmatpush3.bf16.msra.mxu1 %v2346_v4  ;;  %v1983_v4 = vld [vmem:[%s2938_s0 + $0x6] sm:$0x1] }
0x100b   :  { %v1488_v31 = vunpack.c.l.bf16 %v1983_v4 }
0x10c1   :  { %v1482_v1 = vpop.f32.mrf.mxu0 }
0x10c2   :  { %v1496_v23 = vadd.f32 %v1482_v1, %v2383_v14  ;;  %v1489_v33 = vadd.f32 %v1488_v31, %v1482_v1 }
0x10c3   :  { %v2145_v24 = vpop.f32.mrf.mxu0 }
0x10c4   :  { %v1504_v25 = vrot.slane %v1496_v23, %v2390_v18  ;;  %v1985_v35 = vmul.f32 -1.442695, %v1489_v33  ;;  %v1992_v33 = vld [vmem:[%s2939_s1 + $0x8] sm:$0x1] }
0x10c5   :  { %v1485_v26 = vpop.f32.mrf.mxu0  ;;  %v1591_v27 = vpop.f32.mrf.mxu1 }
0x10c6   :  { %v1605_v28 = vadd.f32 %v1591_v27, %v2387_v17  ;;  %1505 = vrot.lane.b32.xlu0 %v1504_v25, %s2280_s28  ;;  %v1598_v36 = vadd.f32 %v1597_v34, %v1591_v27  ;;  %2254 = vpow2.f32 %v1985_v35 }
0x10c7   :  { %v2146_v2 = vpop.f32.mrf.mxu0  ;;  %v2153_v3 = vpop.f32.mrf.mxu1 }
0x10c8   :  { %v1613_v29 = vrot.slane %v1605_v28, %v2390_v18  ;;  %v1988_v37 = vmul.f32 -1.442695, %v1598_v36 }
0x10c9   :  { %v1594_v30 = vpop.f32.mrf.mxu1 }
0x10ca   :  { %1614 = vrot.lane.b32.xlu1 %v1613_v29, %s2280_s28  ;;  %2256 = vpow2.f32 %v1988_v37 }
0x10cb   :  { %v2154_v0 = vpop.f32.mrf.mxu1 }
0x10d3   :  { %v2255_v38 = vpop.eup %2254 }
0x10d4   :  { %v1493_v39 = vadd.f32 1.0, %v2255_v38 }
0x10d6   :  { %2258 = vrcp.f32 %v1493_v39 }
0x10d7   :  { %v2257_v40 = vpop.eup %2256 }
0x10d8   :  { %v1602_v41 = vadd.f32 1.0, %v2257_v40 }
0x10da   :  { %2260 = vrcp.f32 %v1602_v41 }
0x10e3   :  { %v2259_v42 = vpop.eup %2258 }
0x10e4   :  { %v1515_v56 = vsub.f32 1.0, %v2259_v42  ;;  %v1521_v60 = vmul.f32 %v2259_v42, %v2621_v7 }
0x10e7   :  { %v2261_v45 = vpop.eup %2260 }
0x10e8   :  { %v1624_v11 = vsub.f32 1.0, %v2261_v45  ;;  %v1630_v13 = vmul.f32 %v2261_v45, %v2626_v19 }
0x1138   :  { %v1506_v43 = vpop.permute.xlu0 %1505 }
0x1139   :  { %v1508_v44 = vmul.f32 %v2259_v42, %v1506_v43 }
0x113b   :  { %1510 = vrot.lane.b32.xlu0 %v1508_v44, %s2280_s28 }
0x113c   :  { %v1615_v46 = vpop.permute.xlu1 %1614 }
0x113d   :  { %v1617_v47 = vmul.f32 %v2261_v45, %v1615_v46 }
0x113f   :  { %1619 = vrot.lane.b32.xlu1 %v1617_v47, %s2280_s28 }
0x11ad   :  { %v1511_v48 = vpop.permute.xlu0 %1510 }
0x11ae   :  { %v1513_v49 = vadd.f32 %v1511_v48, %v1488_v31 }
0x11b0   :  { %2262 = vtanh.f32 %v1513_v49 }
0x11b1   :  { %v1620_v50 = vpop.permute.xlu1 %1619 }
0x11b2   :  { %v1622_v51 = vadd.f32 %v1620_v50, %v1597_v34  ;;  %v1814_v34 = vunpack.c.l.bf16 %v1992_v33  ;;  %v2284_v50 = vmov 1966171168  }
0x11b4   :  { %2264 = vtanh.f32 %v1622_v51  ;;  %v188_v51 = vunpack.c.l.s4 %v2284_v50 }
0x11bd   :  { %v2263_v52 = vpop.eup %2262 }
0x11be   :  { %1517 = vrot.lane.b32.xlu0 %v2263_v52, %s2283_s9 }
0x11c1   :  { %v2265_v53 = vpop.eup %2264 }
0x11c2   :  { %1626 = vrot.lane.b32.xlu1 %v2265_v53, %s2283_s9 }
0x1230   :  { %v1518_v59 = vpop.permute.xlu0 %1517 }
0x1231   :  { %v1520_v61 = vmul.f32 %v1518_v59, %v1515_v56  ;;  %v189_v56 = vunpack.c.0.s8 %v188_v51 }
0x1233   :  { %v2661_v8 = vadd.f32 %v1521_v60, %v1520_v61  ;;  %v2695_v59 = vsub.s32 %v189_v56, %v2385_v16  ;;  %v2698_v60 = vsub.s32 0, %v2385_v16 }
0x1234   :  { %v1627_v12 = vpop.permute.xlu1 %1626 }
0x1235   :  { %v1629_v15 = vmul.f32 %v1627_v12, %v1624_v11  ;;  %v1659_v20 = vpack.c.bf16 %v2661_v8, %v2661_v8  ;;  %v193_v61 = vrot.slane %v2412_v63, %v2695_v59  ;;  %v440_v63 = vrot.slane %v2453_v58, %v2695_v59 }
0x1237   :  { %v2666_v21 = vadd.f32 %v1630_v13, %v1629_v15  ;;  %1661 = vrot.lane.b32.xlu0 %v1659_v20, %s2283_s9  ;;  %v198_v12 = vrot.slane %v193_v61, %v2698_v60  ;;  %v194_v13 = vcombine.high %v193_v61, %v193_v61  ;;  %v331_v15 = vrot.slane %v2416_v10, %v2695_v59 }
0x1238   :  { %v445_v10 = vrot.slane %v440_v63, %v2698_v60 }
0x1239   :  { %v1767_v22 = vpack.c.bf16 %v2666_v21, %v2666_v21  ;;  %v202_v16 = vrot.slane %v194_v13, %v2698_v60  ;;  %v1639_v51 = vrot.slane %v2666_v21, %v2695_v59 }
0x123b   :  { %1769 = vrot.lane.b32.xlu1 %v1767_v22, %s2283_s9  ;;  %v336_v22 = vrot.slane %v331_v15, %v2698_v60  ;;  %v1640_v56 = vcombine.high %v1639_v51, %v1639_v51 }
0x123d   :  { %v1648_v61 = vrot.slane %v1640_v56, %v2698_v60 }
0x12a9   :  { %v1662_v1 = vpop.permute.xlu0 %1661 }
0x12aa   :  { %2160 = vmatmul.mubr.msk.bf16.vlgmr.msra.gmra.mxu0 %vm88_vm2, %v1662_v1  ;;  %v332_v1 = vcombine.high %v331_v15, %v331_v15 }
0x12ad   :  { %v1770_v23 = vpop.permute.xlu1 %1769 }
0x12ae   :  { %2168 = vmatmul.mubr.msk.bf16.vlgmr.msra.gmra.mxu1 %vm88_vm2, %v1770_v23  ;;  %v340_v23 = vrot.slane %v332_v1, %v2698_v60 }
0x136a   :  { %v1700_v24 = vpop.f32.mrf.mxu0 }
0x136b   :  { %v1714_v25 = vadd.f32 %v1700_v24, %v2383_v14  ;;  %v1989_v14 = vld [vmem:[%s2938_s0 + $0x7] sm:$0x1] }
0x136c   :  { %v2161_v26 = vpop.f32.mrf.mxu0  ;;  %v1706_v32 = vunpack.c.l.bf16 %v1989_v14 }
0x136d   :  { %v1722_v27 = vrot.slane %v1714_v25, %v2390_v18  ;;  %v549_v25 = vrot.slane %v2458_v6, %v2695_v59 }
0x136e   :  { %v1703_v28 = vpop.f32.mrf.mxu0  ;;  %v1808_v2 = vpop.f32.mrf.mxu1 }
0x136f   :  { %v1822_v3 = vadd.f32 %v1808_v2, %v2387_v17  ;;  %1723 = vrot.lane.b32.xlu0 %v1722_v27, %s2280_s28  ;;  %v1707_v17 = vadd.f32 %v1706_v32, %v1700_v24  ;;  %v1815_v36 = vadd.f32 %v1814_v34, %v1808_v2  ;;  %v441_v24 = vcombine.high %v440_v63, %v440_v63 }
0x1370   :  { %v2162_v29 = vpop.f32.mrf.mxu0  ;;  %v2169_v30 = vpop.f32.mrf.mxu1  ;;  %v554_v58 = vrot.slane %v549_v25, %v2698_v60  ;;  %v550_v27 = vcombine.high %v549_v25, %v549_v25  ;;  %v658_v28 = vrot.slane %v2495_v55, %v2695_v59 }
0x1371   :  { %v1830_v0 = vrot.slane %v1822_v3, %v2390_v18  ;;  %v1991_v35 = vmul.f32 -1.442695, %v1707_v17  ;;  %v1994_v37 = vmul.f32 -1.442695, %v1815_v36  ;;  %v449_v26 = vrot.slane %v441_v24, %v2698_v60 }
0x1372   :  { %v1811_v4 = vpop.f32.mrf.mxu1  ;;  %v558_v2 = vrot.slane %v550_v27, %v2698_v60  ;;  %v663_v6 = vrot.slane %v658_v28, %v2698_v60  ;;  %v659_v3 = vcombine.high %v658_v28, %v658_v28  ;;  %v767_v29 = vrot.slane %v2500_v62, %v2695_v59 }
0x1373   :  { %1831 = vrot.lane.b32.xlu1 %v1830_v0, %s2280_s28  ;;  %2266 = vpow2.f32 %v1991_v35  ;;  %v876_v4 = vrot.slane %v2537_v54, %v2695_v59 }
0x1374   :  { %v2170_v31 = vpop.f32.mrf.mxu1  ;;  %2268 = vpow2.f32 %v1994_v37  ;;  %v667_v30 = vrot.slane %v659_v3, %v2698_v60  ;;  %v772_v55 = vrot.slane %v767_v29, %v2698_v60  ;;  %v768_v0 = vcombine.high %v767_v29, %v767_v29 }
0x1375   :  { %v881_v62 = vrot.slane %v876_v4, %v2698_v60  ;;  %v877_v14 = vcombine.high %v876_v4, %v876_v4  ;;  %v1203_v37 = vrot.slane %v2584_v9, %v2695_v59 }
0x1376   :  { %v776_v31 = vrot.slane %v768_v0, %v2698_v60 }
0x1377   :  { %v885_v33 = vrot.slane %v877_v14, %v2698_v60 }
0x1380   :  { %v2267_v38 = vpop.eup %2266 }
0x1381   :  { %v1711_v39 = vadd.f32 1.0, %v2267_v38  ;;  %v2269_v40 = vpop.eup %2268 }
0x1382   :  { %v1819_v41 = vadd.f32 1.0, %v2269_v40  ;;  %v1312_v40 = vrot.slane %v2621_v7, %v2695_v59 }
0x1383   :  { %2270 = vrcp.f32 %v1711_v39  ;;  %v1204_v39 = vcombine.high %v1203_v37, %v1203_v37 }
0x1384   :  { %2272 = vrcp.f32 %v1819_v41  ;;  %v1317_v9 = vrot.slane %v1312_v40, %v2698_v60 }
0x1385   :  { %v1212_v41 = vrot.slane %v1204_v39, %v2698_v60 }
0x1390   :  { %v2686_v42 = vpop.eup %2270 }
0x1391   :  { %v2690_v45 = vpop.eup %2272  ;;  %v1739_v13 = vmul.f32 %v2686_v42, %v2661_v8 }
0x13e1   :  { %v1724_v43 = vpop.permute.xlu0 %1723 }
0x13e2   :  { %v1726_v44 = vmul.f32 %v2686_v42, %v1724_v43  ;;  %v1313_v43 = vcombine.high %v1312_v40, %v1312_v40 }
0x13e4   :  { %1728 = vrot.lane.b32.xlu0 %v1726_v44, %s2280_s28  ;;  %v1421_v44 = vrot.slane %v2626_v19, %v2695_v59 }
0x13e5   :  { %v1832_v46 = vpop.permute.xlu1 %1831 }
0x13e6   :  { %v1834_v47 = vmul.f32 %v2690_v45, %v1832_v46  ;;  %v1321_v46 = vrot.slane %v1313_v43, %v2698_v60  ;;  %v1426_v7 = vrot.slane %v1421_v44, %v2698_v60 }
0x13e8   :  { %1836 = vrot.lane.b32.xlu1 %v1834_v47, %s2280_s28  ;;  %v1422_v47 = vcombine.high %v1421_v44, %v1421_v44 }
0x1456   :  { %v1729_v48 = vpop.permute.xlu0 %1728 }
0x1457   :  { %v1731_v49 = vadd.f32 %v1729_v48, %v1706_v32  ;;  %v985_v32 = vrot.slane %v2542_v5, %v2695_v59  ;;  %v1530_v48 = vrot.slane %v2661_v8, %v2695_v59 }
0x1459   :  { %2274 = vtanh.f32 %v1731_v49  ;;  %v990_v54 = vrot.slane %v985_v32, %v2698_v60  ;;  %v986_v17 = vcombine.high %v985_v32, %v985_v32  ;;  %v1430_v49 = vrot.slane %v1422_v47, %v2698_v60 }
0x145a   :  { %v1837_v52 = vpop.permute.xlu1 %1836  ;;  %v1535_v19 = vrot.slane %v1530_v48, %v2698_v60  ;;  %v1531_v50 = vcombine.high %v1530_v48, %v1530_v48 }
0x145b   :  { %v1839_v53 = vadd.f32 %v1837_v52, %v1814_v34  ;;  %v1094_v34 = vrot.slane %v2579_v57, %v2695_v59  ;;  %v994_v35 = vrot.slane %v986_v17, %v2698_v60  ;;  %v1208_v57 = vrot.slane %v1203_v37, %v2698_v60 }
0x145c   :  { %v1539_v52 = vrot.slane %v1531_v50, %v2698_v60 }
0x145d   :  { %2276 = vtanh.f32 %v1839_v53  ;;  %v1099_v5 = vrot.slane %v1094_v34, %v2698_v60  ;;  %v1095_v36 = vcombine.high %v1094_v34, %v1094_v34  ;;  %v1644_v53 = vrot.slane %v1639_v51, %v2698_v60 }
0x145f   :  { %v1103_v38 = vrot.slane %v1095_v36, %v2698_v60 }
0x1466   :  { %v2275_v11 = vpop.eup %2274 }
0x1467   :  { %1735 = vrot.lane.b32.xlu0 %v2275_v11, %s2283_s9  ;;  %v1733_v11 = vsub.f32 1.0, %v2686_v42 }
0x146a   :  { %v2277_v20 = vpop.eup %2276 }
0x146b   :  { %1843 = vrot.lane.b32.xlu1 %v2277_v20, %s2283_s9  ;;  %203 = vrot.lane.b32.xlu0 %v198_v12, %s2283_s9 }
0x146f   :  { %205 = vrot.lane.b32.xlu1 %v202_v16, %s2283_s9  ;;  %341 = vrot.lane.b32.xlu0 %v336_v22, %s2283_s9  ;;  %v1841_v16 = vsub.f32 1.0, %v2690_v45 }
0x1473   :  { %343 = vrot.lane.b32.xlu1 %v340_v23, %s2283_s9  ;;  %450 = vrot.lane.b32.xlu0 %v445_v10, %s2283_s9  ;;  %v1847_v23 = vmul.f32 %v2690_v45, %v2666_v21 }
0x1477   :  { %452 = vrot.lane.b32.xlu1 %v449_v26, %s2283_s9  ;;  %559 = vrot.lane.b32.xlu0 %v554_v58, %s2283_s9 }
0x147b   :  { %561 = vrot.lane.b32.xlu1 %v558_v2, %s2283_s9  ;;  %668 = vrot.lane.b32.xlu0 %v663_v6, %s2283_s9 }
0x147f   :  { %670 = vrot.lane.b32.xlu1 %v667_v30, %s2283_s9  ;;  %777 = vrot.lane.b32.xlu0 %v772_v55, %s2283_s9 }
0x1483   :  { %779 = vrot.lane.b32.xlu1 %v776_v31, %s2283_s9  ;;  %886 = vrot.lane.b32.xlu0 %v881_v62, %s2283_s9 }
0x1487   :  { %888 = vrot.lane.b32.xlu1 %v885_v33, %s2283_s9  ;;  %995 = vrot.lane.b32.xlu0 %v990_v54, %s2283_s9 }
0x148b   :  { %997 = vrot.lane.b32.xlu1 %v994_v35, %s2283_s9  ;;  %1104 = vrot.lane.b32.xlu0 %v1099_v5, %s2283_s9 }
0x148f   :  { %1106 = vrot.lane.b32.xlu1 %v1103_v38, %s2283_s9  ;;  %1213 = vrot.lane.b32.xlu0 %v1208_v57, %s2283_s9 }
0x1493   :  { %1215 = vrot.lane.b32.xlu1 %v1212_v41, %s2283_s9  ;;  %1322 = vrot.lane.b32.xlu0 %v1317_v9, %s2283_s9 }
0x1497   :  { %1324 = vrot.lane.b32.xlu1 %v1321_v46, %s2283_s9  ;;  %1431 = vrot.lane.b32.xlu0 %v1426_v7, %s2283_s9 }
0x149b   :  { %1433 = vrot.lane.b32.xlu1 %v1430_v49, %s2283_s9  ;;  %1540 = vrot.lane.b32.xlu0 %v1535_v19, %s2283_s9 }
0x149f   :  { %1542 = vrot.lane.b32.xlu1 %v1539_v52, %s2283_s9  ;;  %1649 = vrot.lane.b32.xlu0 %v1644_v53, %s2283_s9 }
0x14a3   :  { %1651 = vrot.lane.b32.xlu1 %v1648_v61, %s2283_s9 }
0x14d9   :  { %v1736_v12 = vpop.permute.xlu0 %1735 }
0x14da   :  { %v1738_v15 = vmul.f32 %v1736_v12, %v1733_v11 }
0x14dc   :  { %v1740_v20 = vadd.f32 %v1739_v13, %v1738_v15 }
0x14dd   :  { %v1844_v22 = vpop.permute.xlu1 %1843  ;;  %v204_v1 = vpop.permute.xlu0 %203 }
0x14de   :  { %v1748_v63 = vrot.slane %v1740_v20, %v2695_v59  ;;  %v1846_v10 = vmul.f32 %v1844_v22, %v1841_v16  ;;  %210 = vst.msk [vmem:[%s2940_s4] sm:$0x1] %vm209_vm3, %v204_v1  ;;  %v1880_v6 = vrot.slane %v1740_v20, %v2390_v18 }
0x14e0   :  { %v1848_v24 = vadd.f32 %v1847_v23, %v1846_v10  ;;  %v1753_v8 = vrot.slane %v1748_v63, %v2698_v60  ;;  %v1749_v42 = vcombine.high %v1748_v63, %v1748_v63 }
0x14e1   :  { %v206_v25 = vpop.permute.xlu1 %205  ;;  %v342_v26 = vpop.permute.xlu0 %341 }
0x14e2   :  { %v1856_v58 = vrot.slane %v1848_v24, %v2695_v59  ;;  %211 = vst.msk [vmem:[%s2940_s4 + $0x8] sm:$0x1] %vm209_vm3, %v206_v25  ;;  %347 = vst.msk [vmem:[%s2941_s5 + $0x7] sm:$0x1] %vm209_vm3, %v342_v26  ;;  %1758 = vrot.lane.b32.xlu0 %v1753_v8, %s2283_s9  ;;  %v1757_v21 = vrot.slane %v1749_v42, %v2698_v60  ;;  %v1892_v30 = vrot.slane %v1848_v24, %v2390_v18 }
0x14e4   :  { %1760 = vrot.lane.b32.xlu1 %v1757_v21, %s2283_s9  ;;  %v1861_v45 = vrot.slane %v1856_v58, %v2698_v60  ;;  %v1857_v27 = vcombine.high %v1856_v58, %v1856_v58 }
0x14e5   :  { %v344_v59 = vpop.permute.xlu1 %343  ;;  %v451_v28 = vpop.permute.xlu0 %450 }
0x14e6   :  { %348 = vst.msk [vmem:[%s2941_s5 + $0xf] sm:$0x1] %vm209_vm3, %v344_v59  ;;  %456 = vst.msk [vmem:[%s2940_s4 + $0x1] sm:$0x1] %vm209_vm3, %v451_v28  ;;  %1866 = vrot.lane.b32.xlu0 %v1861_v45, %s2283_s9  ;;  %v1865_v2 = vrot.slane %v1857_v27, %v2698_v60 }
0x14e8   :  { %1868 = vrot.lane.b32.xlu1 %v1865_v2, %s2283_s9 }
0x14e9   :  { %v453_v3 = vpop.permute.xlu1 %452  ;;  %v560_v29 = vpop.permute.xlu0 %559 }
0x14ea   :  { %457 = vst.msk [vmem:[%s2940_s4 + $0x9] sm:$0x1] %vm209_vm3, %v453_v3  ;;  %565 = vst.msk [vmem:[%s2941_s5 + $0x6] sm:$0x1] %vm209_vm3, %v560_v29  ;;  %1881 = vrot.lane.b32.xlu0 %v1880_v6, %s2283_s9 }
0x14ec   :  { %1893 = vrot.lane.b32.xlu1 %v1892_v30, %s2283_s9 }
0x14ed   :  { %v562_v60 = vpop.permute.xlu1 %561  ;;  %v669_v55 = vpop.permute.xlu0 %668 }
0x14ee   :  { %566 = vst.msk [vmem:[%s2941_s5 + $0xe] sm:$0x1] %vm209_vm3, %v562_v60  ;;  %674 = vst.msk [vmem:[%s2940_s4 + $0x2] sm:$0x1] %vm209_vm3, %v669_v55 }
0x14f1   :  { %v671_v18 = vpop.permute.xlu1 %670  ;;  %v778_v0 = vpop.permute.xlu0 %777 }
0x14f2   :  { %675 = vst.msk [vmem:[%s2940_s4 + $0xa] sm:$0x1] %vm209_vm3, %v671_v18  ;;  %783 = vst.msk [vmem:[%s2941_s5 + $0x5] sm:$0x1] %vm209_vm3, %v778_v0 }
0x14f5   :  { %v780_v4 = vpop.permute.xlu1 %779  ;;  %v887_v31 = vpop.permute.xlu0 %886 }
0x14f6   :  { %784 = vst.msk [vmem:[%s2941_s5 + $0xd] sm:$0x1] %vm209_vm3, %v780_v4  ;;  %892 = vst.msk [vmem:[%s2940_s4 + $0x3] sm:$0x1] %vm209_vm3, %v887_v31 }
0x14f9   :  { %v889_v62 = vpop.permute.xlu1 %888  ;;  %v996_v14 = vpop.permute.xlu0 %995 }
0x14fa   :  { %893 = vst.msk [vmem:[%s2940_s4 + $0xb] sm:$0x1] %vm209_vm3, %v889_v62  ;;  %1001 = vst.msk [vmem:[%s2941_s5 + $0x4] sm:$0x1] %vm209_vm3, %v996_v14 }
0x14fd   :  { %v998_v32 = vpop.permute.xlu1 %997  ;;  %v1105_v33 = vpop.permute.xlu0 %1104 }
0x14fe   :  { %1002 = vst.msk [vmem:[%s2941_s5 + $0xc] sm:$0x1] %vm209_vm3, %v998_v32  ;;  %1110 = vst.msk [vmem:[%s2940_s4 + $0x4] sm:$0x1] %vm209_vm3, %v1105_v33 }
0x1501   :  { %v1107_v54 = vpop.permute.xlu1 %1106  ;;  %v1214_v17 = vpop.permute.xlu0 %1213 }
0x1502   :  { %1111 = vst.msk [vmem:[%s2940_s4 + $0xc] sm:$0x1] %vm209_vm3, %v1107_v54  ;;  %1219 = vst.msk [vmem:[%s2941_s5 + $0x3] sm:$0x1] %vm209_vm3, %v1214_v17 }
0x1505   :  { %v1216_v34 = vpop.permute.xlu1 %1215  ;;  %v1323_v35 = vpop.permute.xlu0 %1322 }
0x1506   :  { %1220 = vst.msk [vmem:[%s2941_s5 + $0xb] sm:$0x1] %vm209_vm3, %v1216_v34  ;;  %1328 = vst.msk [vmem:[%s2940_s4 + $0x5] sm:$0x1] %vm209_vm3, %v1323_v35 }
0x1509   :  { %v1325_v5 = vpop.permute.xlu1 %1324  ;;  %v1432_v36 = vpop.permute.xlu0 %1431 }
0x150a   :  { %1329 = vst.msk [vmem:[%s2940_s4 + $0xd] sm:$0x1] %vm209_vm3, %v1325_v5  ;;  %1437 = vst.msk [vmem:[%s2941_s5 + $0x2] sm:$0x1] %vm209_vm3, %v1432_v36 }
0x150d   :  { %v1434_v37 = vpop.permute.xlu1 %1433  ;;  %v1541_v38 = vpop.permute.xlu0 %1540 }
0x150e   :  { %1438 = vst.msk [vmem:[%s2941_s5 + $0xa] sm:$0x1] %vm209_vm3, %v1434_v37  ;;  %1546 = vst.msk [vmem:[%s2940_s4 + $0x6] sm:$0x1] %vm209_vm3, %v1541_v38 }
0x1511   :  { %v1543_v57 = vpop.permute.xlu1 %1542  ;;  %v1650_v39 = vpop.permute.xlu0 %1649 }
0x1512   :  { %1547 = vst.msk [vmem:[%s2940_s4 + $0xe] sm:$0x1] %vm209_vm3, %v1543_v57  ;;  %1655 = vst.msk [vmem:[%s2941_s5 + $0x1] sm:$0x1] %vm209_vm3, %v1650_v39 }
0x1515   :  { %v1652_v40 = vpop.permute.xlu1 %1651 }
0x1516   :  { %1656 = vst.msk [vmem:[%s2941_s5 + $0x9] sm:$0x1] %vm209_vm3, %v1652_v40 }
0x1554   :  { %v1759_v41 = vpop.permute.xlu0 %1758 }
0x1555   :  { %1764 = vst.msk [vmem:[%s2940_s4 + $0x7] sm:$0x1] %vm209_vm3, %v1759_v41 }
0x1556   :  { %v1761_v9 = vpop.permute.xlu1 %1760 }
0x1557   :  { %1765 = vst.msk [vmem:[%s2940_s4 + $0xf] sm:$0x1] %vm209_vm3, %v1761_v9 }
0x1558   :  { %v1867_v43 = vpop.permute.xlu0 %1866 }
0x1559   :  { %1872 = vst.msk [vmem:[%s2941_s5] sm:$0x1] %vm209_vm3, %v1867_v43 }
0x155a   :  { %v1869_v44 = vpop.permute.xlu1 %1868 }
0x155b   :  { %1873 = vst.msk [vmem:[%s2941_s5 + $0x8] sm:$0x1] %vm209_vm3, %v1869_v44 }
0x155c   :  { %v1882_v46 = vpop.permute.xlu0 %1881 }
0x155d   :  { %1885 = vst.msk [vmem:[#allocation2] sm:$0x3] %vm57_vm0, %v1882_v46 }
0x155e   :  { %v1894_v7 = vpop.permute.xlu1 %1893 }
0x155f   :  { %1896 = vst.msk [vmem:[#allocation3] sm:$0x3] %vm57_vm0, %v1894_v7 }

</bundles_post_ra>
